<compile_context>
chip_gen: v7x
topology: tpu7x:2x2x1
jax: 0.10.0
libtpu: 0.0.40
codegen_flags: <defaults>
</compile_context>

<pallas_src>
import functools

import jax
import jax.numpy as jnp
from jax.experimental import pallas as pl
from jax.experimental.pallas import tpu as pltpu

LAYER_CFG = [
    # (Cin, Cout, K, pad, dilation) -- every layer preserves H
    (512, 256, 7, 3, 1),
    (256, 256, 5, 2, 1),
    (256, 256, 5, 4, 2),
    (256, 256, 5, 8, 4),
    (256, 256, 5, 16, 8),
    (256, 256, 5, 32, 16),
]
BN_EPS = 1e-5
COUT = 256
CIN0 = LAYER_CFG[0][0]


def _round16(v):
    # bf16 packs 16 rows per (8,128) tile; 16-row halos keep the main store tile-aligned.
    return ((v + 15) // 16) * 16


HALO0 = _round16(LAYER_CFG[0][3])                                 # 512-ch input halo
HALO = _round16(max(p for (_, _, _, p, _) in LAYER_CFG[1:]))      # 256-ch activation halo


# ----------------------------- Fused Pallas kernel ----------------------------- #

def _fused_kernel(x_ref, w0, w1, w2, w3, w4, w5, sc_ref, sh_ref, m_ref,
                  o_ref, act0_ref, act_ref, *, H, TN):
    M = TN * H
    # per-row timestep (row layout is (sample, time)); computed in-kernel, no DMA'd index
    h = jax.lax.broadcasted_iota(jnp.int32, (M, 1), 0) % H

    # Stage the bf16 input tile into the halo'd bf16 working buffer; zero the halos.
    act0_ref[pl.ds(HALO0, M), :] = x_ref[...]
    act0_ref[pl.ds(0, HALO0), :] = jnp.zeros((HALO0, CIN0), jnp.bfloat16)
    act0_ref[pl.ds(HALO0 + M, HALO0), :] = jnp.zeros((HALO0, CIN0), jnp.bfloat16)
    act_ref[pl.ds(0, HALO), :] = jnp.zeros((HALO, COUT), jnp.bfloat16)
    act_ref[pl.ds(HALO + M, HALO), :] = jnp.zeros((HALO, COUT), jnp.bfloat16)

    w_refs = (w0, w1, w2, w3, w4, w5)
    n_layers = len(LAYER_CFG)
    y = None
    for l, (cin, cout, K, pad, dil) in enumerate(LAYER_CFG):
        src_ref, off = (act0_ref, HALO0) if l == 0 else (act_ref, HALO)
        acc = None                                       # taps accumulate in registers/MRB
        for k in range(K):                               # static unroll over taps
            s = k * dil - pad                            # row shift of this tap
            if s <= -H or s >= H:                        # tap only ever reads zero padding
                continue
            a = src_ref[pl.ds(off + s, M), :]            # (M, cin) bf16, shifted view
            if s > 0:                                    # mask rows whose source timestep
                a = jnp.where(h < H - s, a, jnp.zeros((), jnp.bfloat16))
            elif s < 0:                                  # falls in padding / adjacent sample
                a = jnp.where(h >= -s, a, jnp.zeros((), jnp.bfloat16))
            contrib = jnp.dot(a, w_refs[l][k], preferred_element_type=jnp.float32)
            acc = contrib if acc is None else acc + contrib
        if acc is None:                                  # no tap overlaps the signal
            acc = jnp.zeros((M, cout), jnp.float32)
        # folded BatchNorm (+ conv bias) and ReLU, in f32 on the accumulator
        yl = jnp.maximum(acc * sc_ref[pl.ds(l, 1), :] + sh_ref[pl.ds(l, 1), :], 0.0)
        if l + 1 < n_layers:
            act_ref[pl.ds(HALO, M), :] = yl.astype(jnp.bfloat16)   # feed next layer (VMEM)
        else:
            y = yl                                                  # final activation

    # Fused bilinear epilogue: ONE matmul per tile using the constant block-diagonal
    # (TN*F, TN*H) interpolation matrix -> one lane-dense (TN*F, 256) store.
    o_ref[...] = jnp.dot(m_ref[...], y.astype(jnp.bfloat16),
                         preferred_element_type=jnp.float32)


def _fused_visual_stack(x_flat, ws, sc, sh, m_bd, *, TN, H, F, Np):
    M = TN * H
    in_specs = [pl.BlockSpec((M, CIN0), lambda i: (i, 0))]          # activation tile
    for w in ws:                                                    # full weight blocks
        in_specs.append(pl.BlockSpec(w.shape, lambda i: (0, 0, 0)))
    nl = len(ws)
    in_specs += [
        pl.BlockSpec((nl, COUT), lambda i: (0, 0)),                 # folded BN scale
        pl.BlockSpec((nl, COUT), lambda i: (0, 0)),                 # folded BN shift
        pl.BlockSpec(m_bd.shape, lambda i: (0, 0)),                 # block-diag interp mat
    ]

    flops = 2 * Np * H * sum(k * cin * cout for (cin, cout, k, _, _) in LAYER_CFG)
    flops += 2 * Np * F * H * COUT
    bytes_accessed = (x_flat.size * x_flat.dtype.itemsize
                      + sum(w.size * w.dtype.itemsize for w in ws)
                      + m_bd.size * m_bd.dtype.itemsize
                      + Np * F * COUT * 4)

    return pl.pallas_call(
        functools.partial(_fused_kernel, H=H, TN=TN),
        out_shape=jax.ShapeDtypeStruct((Np * F, COUT), jnp.float32),
        grid=(Np // TN,),
        in_specs=in_specs,
        out_specs=pl.BlockSpec((TN * F, COUT), lambda i: (i, 0)),
        scratch_shapes=[
            pltpu.VMEM((M + 2 * HALO0, CIN0), jnp.bfloat16),   # layer-0 input + halo
            pltpu.VMEM((M + 2 * HALO, COUT), jnp.bfloat16),    # inter-layer act + halo
        ],
        compiler_params=pltpu.CompilerParams(
            dimension_semantics=("parallel",),                 # independent N tiles
            vmem_limit_bytes=64 * 1024 * 1024),
        cost_estimate=pl.CostEstimate(
            flops=int(flops), transcendentals=0, bytes_accessed=int(bytes_accessed)),
    )(x_flat, *ws, sc, sh, m_bd)


# --------------------------------- JAX glue ------------------------------------ #

def bilinear_matrix(in_size, out_size):
    # matches F.interpolate(mode='bilinear', align_corners=False) along one axis
    scale = in_size / out_size
    dst = jnp.arange(out_size, dtype=jnp.float32)
    src = jnp.maximum((dst + 0.5) * scale - 0.5, 0.0)
    lo = jnp.clip(jnp.floor(src).astype(jnp.int32), 0, in_size - 1)
    hi = jnp.minimum(lo + 1, in_size - 1)
    lam = src - lo.astype(jnp.float32)
    rows = jnp.arange(out_size)
    m = jnp.zeros((out_size, in_size), jnp.float32)
    m = m.at[rows, lo].add(1.0 - lam)
    m = m.at[rows, hi].add(lam)
    return m


def init_params(key):
    params = []
    for i, (cin, cout, k, pad, dil) in enumerate(LAYER_CFG):
        kw, kb = jax.random.split(jax.random.fold_in(key, i))
        fan_in = cin * k
        w = jax.random.normal(kw, (k, cin, cout), jnp.float32) / jnp.sqrt(fan_in)
        b = 0.01 * jax.random.normal(kb, (cout,), jnp.float32)
        # BatchNorm2d params at their deterministic defaults (inference mode)
        gamma = jnp.ones((cout,), jnp.float32)
        beta = jnp.zeros((cout,), jnp.float32)
        rmean = jnp.zeros((cout,), jnp.float32)
        rvar = jnp.ones((cout,), jnp.float32)
        s = gamma / jnp.sqrt(rvar + BN_EPS)
        scale = s.reshape(1, cout)
        shift = (beta + (b - rmean) * s).reshape(1, cout)
        params.append((w.astype(jnp.bfloat16), scale, shift))
    return params


def _pick_tn(N, H, F):
    # Pick samples-per-tile: blocks must be (8,)-row friendly; prefer ~512 accumulator
    # rows, >=2 grid steps (v7x dual TC), no padded samples, bounded block-diag matrix.
    def ok(t):
        return (t * H) % 8 == 0 and (t * F) % 8 == 0

    valid = [t for t in range(1, N + 1) if ok(t)]
    if not valid:
        t = N
        while not ok(t):
            t += 1
        return t

    def score(t):
        rows = t * H
        steps = -(-N // t)
        return (
            rows <= 1024,                       # keep accumulator / scratch modest
            steps >= 2,                         # >=2 grid steps for megacore sharding
            t * t * H * F * 2 <= (4 << 20),     # block-diag interp matrix stays small
            N % t == 0,                         # no padded (wasted) samples
            min(rows, 512),                     # amortize per-grid-step overhead
        )

    return max(valid, key=score)


@functools.partial(jax.jit, static_argnames=("num_freq",))
def visual_stream_forward(x, params, num_freq):
    # x: (B, H, W, 512, S) -- exactly what the PyTorch forward receives (pre-permute)
    B, H, W, C, S = x.shape
    F = num_freq

    # Fold width and speakers into the batch and flatten to the (N*H, C) kernel layout.
    N = B * W * S
    v = jnp.transpose(x, (0, 2, 4, 1, 3)).reshape(N, H, C)      # rows ordered (b, w, s)

    TN = _pick_tn(N, H, F)
    Np = -(-N // TN) * TN
    if Np != N:
        v = jnp.pad(v, ((0, Np - N), (0, 0), (0, 0)))
    x_flat = v.reshape(Np * H, C).astype(jnp.bfloat16)

    # First interp axis (256 -> 256) is an exact identity under align_corners=False,
    # so only the H -> num_freq axis needs real interpolation.  Block-diagonal copy of
    # the (F, H) matrix lets the epilogue be a single matmul per tile.
    m = bilinear_matrix(H, F)
    m_bd = jnp.kron(jnp.eye(TN, dtype=jnp.float32), m).astype(jnp.bfloat16)

    ws = [p[0] for p in params]
    sc = jnp.concatenate([p[1] for p in params], axis=0)        # (6, 256)
    sh = jnp.concatenate([p[2] for p in params], axis=0)        # (6, 256)

    out_flat = _fused_visual_stack(x_flat, ws, sc, sh, m_bd, TN=TN, H=H, F=F, Np=Np)
    out_flat = out_flat[: N * F]

    # (N, F, 256) with N ordered (b, w, s)  ->  torch cat/permute layout (B, 256*S, F, W)
    out = out_flat.reshape(B, W, S, F, COUT)
    out = jnp.transpose(out, (0, 2, 4, 3, 1)).reshape(B, S * COUT, F, W)
    # matches torch `.view((-1, x.shape[1], x.shape[2]))` on a contiguous tensor
    return out.reshape(-1, S * COUT, F)


def _reference_forward(x, params, num_freq):
    # Pure-JAX f32 reference (same bf16 weights / bf16-rounded input, f32 math).
    B, H, W, C, S = x.shape
    m = bilinear_matrix(H, num_freq)
    v = jnp.transpose(x, (0, 2, 4, 1, 3)).reshape(-1, H, C)
    v = v.astype(jnp.bfloat16).astype(jnp.float32)
    for (w, scale, shift), (cin, cout, K, pad, dil) in zip(params, LAYER_CFG):
        wp = w.astype(jnp.float32)
        vp = jnp.pad(v, ((0, 0), (pad, pad), (0, 0)))
        acc = jnp.zeros((v.shape[0], H, cout), jnp.float32)
        for k in range(K):
            acc = acc + jnp.einsum("nhc,co->nho", vp[:, k * dil:k * dil + H, :], wp[k])
        v = jnp.maximum(acc * scale[0] + shift[0], 0.0)
    y = jnp.einsum("fh,nhc->nfc", m, v)
    out = y.reshape(B, W, S, num_freq, COUT)
    out = jnp.transpose(out, (0, 2, 4, 3, 1)).reshape(B, S * COUT, num_freq, W)
    return out.reshape(-1, S * COUT, num_freq)


if __name__ == "__main__":
    key = jax.random.PRNGKey(0)
    k_x, k_p = jax.random.split(key)

    # small config: batch=2, time=8, width=1, channels=512 (fixed by module),
    # num_speakers=2, num_freq=8
    B, H, W, C, S = 2, 8, 1, 512, 2
    NUM_FREQ = 8

    x = jax.random.normal(k_x, (B, H, W, C, S), jnp.float32)
    params = init_params(k_p)

    out = visual_stream_forward(x, params, num_freq=NUM_FREQ)
    out = jax.block_until_ready(out)

    assert out.shape == (B * W, 256 * S, NUM_FREQ), out.shape
    assert bool(jnp.all(jnp.isfinite(out)))

    ref = _reference_forward(x, params, NUM_FREQ)
    err = float(jnp.max(jnp.abs(out - ref)))
    tol = 0.05 * float(jnp.max(jnp.abs(ref))) + 1e-2   # bf16-matmul tolerance
    assert err <= tol, (err, tol)

    print("KERNEL_OK")
</pallas_src>

<mosaic_0001>
module attributes {stable_mosaic.version = 11 : i64} {
  func.func @_fused_kernel(%arg0: i32, %arg1: memref<16x512xbf16, #tpu.memory_space<vmem>>, %arg2: memref<7x512x256xbf16, #tpu.memory_space<vmem>>, %arg3: memref<5x256x256xbf16, #tpu.memory_space<vmem>>, %arg4: memref<5x256x256xbf16, #tpu.memory_space<vmem>>, %arg5: memref<5x256x256xbf16, #tpu.memory_space<vmem>>, %arg6: memref<5x256x256xbf16, #tpu.memory_space<vmem>>, %arg7: memref<5x256x256xbf16, #tpu.memory_space<vmem>>, %arg8: memref<6x256xf32, #tpu.memory_space<vmem>>, %arg9: memref<6x256xf32, #tpu.memory_space<vmem>>, %arg10: memref<16x16xbf16, #tpu.memory_space<vmem>>, %arg11: memref<16x256xf32, #tpu.memory_space<vmem>>, %arg12: memref<48x512xbf16, #tpu.memory_space<vmem>>, %arg13: memref<80x256xbf16, #tpu.memory_space<vmem>>) attributes {dimension_semantics = [#tpu.dimension_semantics<parallel>], iteration_bounds = array<i64: 2>, scalar_prefetch = 0 : i64, scratch_operands = 2 : i64, tpu.core_type = #tpu.core_type<tc>, window_params = [{transform_indices = @transform_0, window_bounds = array<i64: 16, 512>}, {pipeline_mode = #tpu.pipeline_mode<synchronous>, transform_indices = @transform_1, window_bounds = array<i64: 7, 512, 256>}, {pipeline_mode = #tpu.pipeline_mode<synchronous>, transform_indices = @transform_2, window_bounds = array<i64: 5, 256, 256>}, {pipeline_mode = #tpu.pipeline_mode<synchronous>, transform_indices = @transform_3, window_bounds = array<i64: 5, 256, 256>}, {pipeline_mode = #tpu.pipeline_mode<synchronous>, transform_indices = @transform_4, window_bounds = array<i64: 5, 256, 256>}, {pipeline_mode = #tpu.pipeline_mode<synchronous>, transform_indices = @transform_5, window_bounds = array<i64: 5, 256, 256>}, {pipeline_mode = #tpu.pipeline_mode<synchronous>, transform_indices = @transform_6, window_bounds = array<i64: 5, 256, 256>}, {pipeline_mode = #tpu.pipeline_mode<synchronous>, transform_indices = @transform_7, window_bounds = array<i64: 6, 256>}, {pipeline_mode = #tpu.pipeline_mode<synchronous>, transform_indices = @transform_8, window_bounds = array<i64: 6, 256>}, {pipeline_mode = #tpu.pipeline_mode<synchronous>, transform_indices = @transform_9, window_bounds = array<i64: 16, 16>}, {transform_indices = @transform_10, window_bounds = array<i64: 16, 256>}]} {
    %0 = tpu.iota {dimensions = array<i32: 0>} : vector<16x1xi32>
    %c8_i32 = arith.constant 8 : i32
    %c0_i32 = arith.constant 0 : i32
    %1 = arith.cmpi eq, %c8_i32, %c0_i32 : i32
    %c1_i32 = arith.constant 1 : i32
    %2 = arith.select %1, %c1_i32, %c8_i32 : i32
    %3 = vector.broadcast %2 : i32 to vector<16x1xi32>
    %4 = arith.remsi %0, %3 : vector<16x1xi32>
    %c0_i32_0 = arith.constant 0 : i32
    %5 = vector.broadcast %c0_i32_0 : i32 to vector<16x1xi32>
    %6 = arith.cmpi ne, %4, %5 : vector<16x1xi32>
    %c0_i32_1 = arith.constant 0 : i32
    %7 = vector.broadcast %c0_i32_1 : i32 to vector<16x1xi32>
    %8 = arith.cmpi slt, %4, %7 : vector<16x1xi32>
    %c0_i32_2 = arith.constant 0 : i32
    %9 = arith.cmpi slt, %2, %c0_i32_2 : i32
    %10 = vector.broadcast %9 : i1 to vector<16x1xi1>
    %11 = vector.broadcast %10 : vector<16x1xi1> to vector<16x1xi1>
    %12 = arith.xori %8, %11 : vector<16x1xi1>
    %13 = arith.andi %12, %6 : vector<16x1xi1>
    %14 = vector.broadcast %2 : i32 to vector<16x1xi32>
    %15 = arith.addi %4, %14 : vector<16x1xi32>
    %16 = arith.select %13, %15, %4 : vector<16x1xi1>, vector<16x1xi32>
    %c0 = arith.constant 0 : index
    %c0_3 = arith.constant 0 : index
    %17 = vector.load %arg1[%c0, %c0_3] : memref<16x512xbf16, #tpu.memory_space<vmem>>, vector<16x512xbf16>
    %c16 = arith.constant 16 : index
    %c0_4 = arith.constant 0 : index
    %18 = vector.load %arg12[%c16, %c0_4] : memref<48x512xbf16, #tpu.memory_space<vmem>>, vector<16x512xbf16>
    tpu.vector_store %arg12[%c16, %c0_4], %17 {strides = array<i32>} : memref<48x512xbf16, #tpu.memory_space<vmem>>, vector<16x512xbf16>,
    %cst = arith.constant 0.000000e+00 : bf16
    %19 = vector.broadcast %cst : bf16 to vector<16x512xbf16>
    %c0_5 = arith.constant 0 : index
    %c0_6 = arith.constant 0 : index
    %20 = vector.load %arg12[%c0_5, %c0_6] : memref<48x512xbf16, #tpu.memory_space<vmem>>, vector<16x512xbf16>
    tpu.vector_store %arg12[%c0_5, %c0_6], %19 {strides = array<i32>} : memref<48x512xbf16, #tpu.memory_space<vmem>>, vector<16x512xbf16>,
    %cst_7 = arith.constant 0.000000e+00 : bf16
    %21 = vector.broadcast %cst_7 : bf16 to vector<16x512xbf16>
    %c32 = arith.constant 32 : index
    %c0_8 = arith.constant 0 : index
    %22 = vector.load %arg12[%c32, %c0_8] : memref<48x512xbf16, #tpu.memory_space<vmem>>, vector<16x512xbf16>
    tpu.vector_store %arg12[%c32, %c0_8], %21 {strides = array<i32>} : memref<48x512xbf16, #tpu.memory_space<vmem>>, vector<16x512xbf16>,
    %cst_9 = arith.constant 0.000000e+00 : bf16
    %23 = vector.broadcast %cst_9 : bf16 to vector<32x256xbf16>
    %c0_10 = arith.constant 0 : index
    %c0_11 = arith.constant 0 : index
    %24 = vector.load %arg13[%c0_10, %c0_11] : memref<80x256xbf16, #tpu.memory_space<vmem>>, vector<32x256xbf16>
    tpu.vector_store %arg13[%c0_10, %c0_11], %23 {strides = array<i32>} : memref<80x256xbf16, #tpu.memory_space<vmem>>, vector<32x256xbf16>,
    %cst_12 = arith.constant 0.000000e+00 : bf16
    %25 = vector.broadcast %cst_12 : bf16 to vector<32x256xbf16>
    %c48 = arith.constant 48 : index
    %c0_13 = arith.constant 0 : index
    %26 = vector.load %arg13[%c48, %c0_13] : memref<80x256xbf16, #tpu.memory_space<vmem>>, vector<32x256xbf16>
    tpu.vector_store %arg13[%c48, %c0_13], %25 {strides = array<i32>} : memref<80x256xbf16, #tpu.memory_space<vmem>>, vector<32x256xbf16>,
    %c13 = arith.constant 13 : index
    %c0_14 = arith.constant 0 : index
    %27 = vector.load %arg12[%c13, %c0_14] : memref<48x512xbf16, #tpu.memory_space<vmem>>, vector<16x512xbf16>
    %c3_i32 = arith.constant 3 : i32
    %28 = vector.broadcast %c3_i32 : i32 to vector<16x1xi32>
    %29 = arith.cmpi sge, %16, %28 : vector<16x1xi32>
    %cst_15 = arith.constant 0.000000e+00 : bf16
    %30 = vector.shape_cast %29 : vector<16x1xi1> to vector<16x1xi1>
    %31 = vector.broadcast %30 : vector<16x1xi1> to vector<16x512xi1>
    %32 = vector.broadcast %cst_15 : bf16 to vector<16x512xbf16>
    %33 = arith.select %31, %27, %32 : vector<16x512xi1>, vector<16x512xbf16>
    %c0_16 = arith.constant 0 : index
    %c0_17 = arith.constant 0 : index
    %c0_18 = arith.constant 0 : index
    %34 = vector.load %arg2[%c0_16, %c0_17, %c0_18] : memref<7x512x256xbf16, #tpu.memory_space<vmem>>, vector<1x512x256xbf16>
    %35 = vector.shape_cast %34 : vector<1x512x256xbf16> to vector<512x256xbf16>
    %cst_19 = arith.constant dense<0.000000e+00> : vector<16x256xf32>
    %36 = tpu.matmul %33, %35, %cst_19 {dimension_numbers = #tpu.dot_dimension_numbers<[1], [0], [0], [1], [0, 0, 1, 1], [], []>} : vector<16x512xbf16>, vector<512x256xbf16>, vector<16x256xf32> -> vector<16x256xf32>
    %c14 = arith.constant 14 : index
    %c0_20 = arith.constant 0 : index
    %37 = vector.load %arg12[%c14, %c0_20] : memref<48x512xbf16, #tpu.memory_space<vmem>>, vector<16x512xbf16>
    %c2_i32 = arith.constant 2 : i32
    %38 = vector.broadcast %c2_i32 : i32 to vector<16x1xi32>
    %39 = arith.cmpi sge, %16, %38 : vector<16x1xi32>
    %cst_21 = arith.constant 0.000000e+00 : bf16
    %40 = vector.shape_cast %39 : vector<16x1xi1> to vector<16x1xi1>
    %41 = vector.broadcast %40 : vector<16x1xi1> to vector<16x512xi1>
    %42 = vector.broadcast %cst_21 : bf16 to vector<16x512xbf16>
    %43 = arith.select %41, %37, %42 : vector<16x512xi1>, vector<16x512xbf16>
    %c1 = arith.constant 1 : index
    %c0_22 = arith.constant 0 : index
    %c0_23 = arith.constant 0 : index
    %44 = vector.load %arg2[%c1, %c0_22, %c0_23] : memref<7x512x256xbf16, #tpu.memory_space<vmem>>, vector<1x512x256xbf16>
    %45 = vector.shape_cast %44 : vector<1x512x256xbf16> to vector<512x256xbf16>
    %cst_24 = arith.constant dense<0.000000e+00> : vector<16x256xf32>
    %46 = tpu.matmul %43, %45, %cst_24 {dimension_numbers = #tpu.dot_dimension_numbers<[1], [0], [0], [1], [0, 0, 1, 1], [], []>} : vector<16x512xbf16>, vector<512x256xbf16>, vector<16x256xf32> -> vector<16x256xf32>
    %47 = arith.addf %36, %46 : vector<16x256xf32>
    %c15 = arith.constant 15 : index
    %c0_25 = arith.constant 0 : index
    %48 = vector.load %arg12[%c15, %c0_25] : memref<48x512xbf16, #tpu.memory_space<vmem>>, vector<16x512xbf16>
    %c1_i32_26 = arith.constant 1 : i32
    %49 = vector.broadcast %c1_i32_26 : i32 to vector<16x1xi32>
    %50 = arith.cmpi sge, %16, %49 : vector<16x1xi32>
    %cst_27 = arith.constant 0.000000e+00 : bf16
    %51 = vector.shape_cast %50 : vector<16x1xi1> to vector<16x1xi1>
    %52 = vector.broadcast %51 : vector<16x1xi1> to vector<16x512xi1>
    %53 = vector.broadcast %cst_27 : bf16 to vector<16x512xbf16>
    %54 = arith.select %52, %48, %53 : vector<16x512xi1>, vector<16x512xbf16>
    %c2 = arith.constant 2 : index
    %c0_28 = arith.constant 0 : index
    %c0_29 = arith.constant 0 : index
    %55 = vector.load %arg2[%c2, %c0_28, %c0_29] : memref<7x512x256xbf16, #tpu.memory_space<vmem>>, vector<1x512x256xbf16>
    %56 = vector.shape_cast %55 : vector<1x512x256xbf16> to vector<512x256xbf16>
    %cst_30 = arith.constant dense<0.000000e+00> : vector<16x256xf32>
    %57 = tpu.matmul %54, %56, %cst_30 {dimension_numbers = #tpu.dot_dimension_numbers<[1], [0], [0], [1], [0, 0, 1, 1], [], []>} : vector<16x512xbf16>, vector<512x256xbf16>, vector<16x256xf32> -> vector<16x256xf32>
    %58 = arith.addf %47, %57 : vector<16x256xf32>
    %c16_31 = arith.constant 16 : index
    %c0_32 = arith.constant 0 : index
    %59 = vector.load %arg12[%c16_31, %c0_32] : memref<48x512xbf16, #tpu.memory_space<vmem>>, vector<16x512xbf16>
    %c3 = arith.constant 3 : index
    %c0_33 = arith.constant 0 : index
    %c0_34 = arith.constant 0 : index
    %60 = vector.load %arg2[%c3, %c0_33, %c0_34] : memref<7x512x256xbf16, #tpu.memory_space<vmem>>, vector<1x512x256xbf16>
    %61 = vector.shape_cast %60 : vector<1x512x256xbf16> to vector<512x256xbf16>
    %cst_35 = arith.constant dense<0.000000e+00> : vector<16x256xf32>
    %62 = tpu.matmul %59, %61, %cst_35 {dimension_numbers = #tpu.dot_dimension_numbers<[1], [0], [0], [1], [0, 0, 1, 1], [], []>} : vector<16x512xbf16>, vector<512x256xbf16>, vector<16x256xf32> -> vector<16x256xf32>
    %63 = arith.addf %58, %62 : vector<16x256xf32>
    %c17 = arith.constant 17 : index
    %c0_36 = arith.constant 0 : index
    %64 = vector.load %arg12[%c17, %c0_36] : memref<48x512xbf16, #tpu.memory_space<vmem>>, vector<16x512xbf16>
    %c7_i32 = arith.constant 7 : i32
    %65 = vector.broadcast %c7_i32 : i32 to vector<16x1xi32>
    %66 = arith.cmpi slt, %16, %65 : vector<16x1xi32>
    %cst_37 = arith.constant 0.000000e+00 : bf16
    %67 = vector.shape_cast %66 : vector<16x1xi1> to vector<16x1xi1>
    %68 = vector.broadcast %67 : vector<16x1xi1> to vector<16x512xi1>
    %69 = vector.broadcast %cst_37 : bf16 to vector<16x512xbf16>
    %70 = arith.select %68, %64, %69 : vector<16x512xi1>, vector<16x512xbf16>
    %c4 = arith.constant 4 : index
    %c0_38 = arith.constant 0 : index
    %c0_39 = arith.constant 0 : index
    %71 = vector.load %arg2[%c4, %c0_38, %c0_39] : memref<7x512x256xbf16, #tpu.memory_space<vmem>>, vector<1x512x256xbf16>
    %72 = vector.shape_cast %71 : vector<1x512x256xbf16> to vector<512x256xbf16>
    %cst_40 = arith.constant dense<0.000000e+00> : vector<16x256xf32>
    %73 = tpu.matmul %70, %72, %cst_40 {dimension_numbers = #tpu.dot_dimension_numbers<[1], [0], [0], [1], [0, 0, 1, 1], [], []>} : vector<16x512xbf16>, vector<512x256xbf16>, vector<16x256xf32> -> vector<16x256xf32>
    %74 = arith.addf %63, %73 : vector<16x256xf32>
    %c18 = arith.constant 18 : index
    %c0_41 = arith.constant 0 : index
    %75 = vector.load %arg12[%c18, %c0_41] : memref<48x512xbf16, #tpu.memory_space<vmem>>, vector<16x512xbf16>
    %c6_i32 = arith.constant 6 : i32
    %76 = vector.broadcast %c6_i32 : i32 to vector<16x1xi32>
    %77 = arith.cmpi slt, %16, %76 : vector<16x1xi32>
    %cst_42 = arith.constant 0.000000e+00 : bf16
    %78 = vector.shape_cast %77 : vector<16x1xi1> to vector<16x1xi1>
    %79 = vector.broadcast %78 : vector<16x1xi1> to vector<16x512xi1>
    %80 = vector.broadcast %cst_42 : bf16 to vector<16x512xbf16>
    %81 = arith.select %79, %75, %80 : vector<16x512xi1>, vector<16x512xbf16>
    %c5 = arith.constant 5 : index
    %c0_43 = arith.constant 0 : index
    %c0_44 = arith.constant 0 : index
    %82 = vector.load %arg2[%c5, %c0_43, %c0_44] : memref<7x512x256xbf16, #tpu.memory_space<vmem>>, vector<1x512x256xbf16>
    %83 = vector.shape_cast %82 : vector<1x512x256xbf16> to vector<512x256xbf16>
    %cst_45 = arith.constant dense<0.000000e+00> : vector<16x256xf32>
    %84 = tpu.matmul %81, %83, %cst_45 {dimension_numbers = #tpu.dot_dimension_numbers<[1], [0], [0], [1], [0, 0, 1, 1], [], []>} : vector<16x512xbf16>, vector<512x256xbf16>, vector<16x256xf32> -> vector<16x256xf32>
    %85 = arith.addf %74, %84 : vector<16x256xf32>
    %c19 = arith.constant 19 : index
    %c0_46 = arith.constant 0 : index
    %86 = vector.load %arg12[%c19, %c0_46] : memref<48x512xbf16, #tpu.memory_space<vmem>>, vector<16x512xbf16>
    %c5_i32 = arith.constant 5 : i32
    %87 = vector.broadcast %c5_i32 : i32 to vector<16x1xi32>
    %88 = arith.cmpi slt, %16, %87 : vector<16x1xi32>
    %cst_47 = arith.constant 0.000000e+00 : bf16
    %89 = vector.shape_cast %88 : vector<16x1xi1> to vector<16x1xi1>
    %90 = vector.broadcast %89 : vector<16x1xi1> to vector<16x512xi1>
    %91 = vector.broadcast %cst_47 : bf16 to vector<16x512xbf16>
    %92 = arith.select %90, %86, %91 : vector<16x512xi1>, vector<16x512xbf16>
    %c6 = arith.constant 6 : index
    %c0_48 = arith.constant 0 : index
    %c0_49 = arith.constant 0 : index
    %93 = vector.load %arg2[%c6, %c0_48, %c0_49] : memref<7x512x256xbf16, #tpu.memory_space<vmem>>, vector<1x512x256xbf16>
    %94 = vector.shape_cast %93 : vector<1x512x256xbf16> to vector<512x256xbf16>
    %cst_50 = arith.constant dense<0.000000e+00> : vector<16x256xf32>
    %95 = tpu.matmul %92, %94, %cst_50 {dimension_numbers = #tpu.dot_dimension_numbers<[1], [0], [0], [1], [0, 0, 1, 1], [], []>} : vector<16x512xbf16>, vector<512x256xbf16>, vector<16x256xf32> -> vector<16x256xf32>
    %96 = arith.addf %85, %95 : vector<16x256xf32>
    %c0_51 = arith.constant 0 : index
    %c0_52 = arith.constant 0 : index
    %97 = vector.load %arg8[%c0_51, %c0_52] : memref<6x256xf32, #tpu.memory_space<vmem>>, vector<1x256xf32>
    %98 = vector.broadcast %97 : vector<1x256xf32> to vector<16x256xf32>
    %99 = arith.mulf %96, %98 : vector<16x256xf32>
    %c0_53 = arith.constant 0 : index
    %c0_54 = arith.constant 0 : index
    %100 = vector.load %arg9[%c0_53, %c0_54] : memref<6x256xf32, #tpu.memory_space<vmem>>, vector<1x256xf32>
    %101 = vector.broadcast %100 : vector<1x256xf32> to vector<16x256xf32>
    %102 = arith.addf %99, %101 : vector<16x256xf32>
    %cst_55 = arith.constant 0.000000e+00 : f32
    %103 = vector.broadcast %cst_55 : f32 to vector<16x256xf32>
    %104 = arith.maximumf %102, %103 : vector<16x256xf32>
    %105 = arith.truncf %104 : vector<16x256xf32> to vector<16x256xbf16>
    %c32_56 = arith.constant 32 : index
    %c0_57 = arith.constant 0 : index
    %106 = vector.load %arg13[%c32_56, %c0_57] : memref<80x256xbf16, #tpu.memory_space<vmem>>, vector<16x256xbf16>
    tpu.vector_store %arg13[%c32_56, %c0_57], %105 {strides = array<i32>} : memref<80x256xbf16, #tpu.memory_space<vmem>>, vector<16x256xbf16>,
    %c30 = arith.constant 30 : index
    %c0_58 = arith.constant 0 : index
    %107 = vector.load %arg13[%c30, %c0_58] : memref<80x256xbf16, #tpu.memory_space<vmem>>, vector<16x256xbf16>
    %c2_i32_59 = arith.constant 2 : i32
    %108 = vector.broadcast %c2_i32_59 : i32 to vector<16x1xi32>
    %109 = arith.cmpi sge, %16, %108 : vector<16x1xi32>
    %cst_60 = arith.constant 0.000000e+00 : bf16
    %110 = vector.shape_cast %109 : vector<16x1xi1> to vector<16x1xi1>
    %111 = vector.broadcast %110 : vector<16x1xi1> to vector<16x256xi1>
    %112 = vector.broadcast %cst_60 : bf16 to vector<16x256xbf16>
    %113 = arith.select %111, %107, %112 : vector<16x256xi1>, vector<16x256xbf16>
    %c0_61 = arith.constant 0 : index
    %c0_62 = arith.constant 0 : index
    %c0_63 = arith.constant 0 : index
    %114 = vector.load %arg3[%c0_61, %c0_62, %c0_63] : memref<5x256x256xbf16, #tpu.memory_space<vmem>>, vector<1x256x256xbf16>
    %115 = vector.shape_cast %114 : vector<1x256x256xbf16> to vector<256x256xbf16>
    %cst_64 = arith.constant dense<0.000000e+00> : vector<16x256xf32>
    %116 = tpu.matmul %113, %115, %cst_64 {dimension_numbers = #tpu.dot_dimension_numbers<[1], [0], [0], [1], [0, 0, 1, 1], [], []>} : vector<16x256xbf16>, vector<256x256xbf16>, vector<16x256xf32> -> vector<16x256xf32>
    %c31 = arith.constant 31 : index
    %c0_65 = arith.constant 0 : index
    %117 = vector.load %arg13[%c31, %c0_65] : memref<80x256xbf16, #tpu.memory_space<vmem>>, vector<16x256xbf16>
    %c1_i32_66 = arith.constant 1 : i32
    %118 = vector.broadcast %c1_i32_66 : i32 to vector<16x1xi32>
    %119 = arith.cmpi sge, %16, %118 : vector<16x1xi32>
    %cst_67 = arith.constant 0.000000e+00 : bf16
    %120 = vector.shape_cast %119 : vector<16x1xi1> to vector<16x1xi1>
    %121 = vector.broadcast %120 : vector<16x1xi1> to vector<16x256xi1>
    %122 = vector.broadcast %cst_67 : bf16 to vector<16x256xbf16>
    %123 = arith.select %121, %117, %122 : vector<16x256xi1>, vector<16x256xbf16>
    %c1_68 = arith.constant 1 : index
    %c0_69 = arith.constant 0 : index
    %c0_70 = arith.constant 0 : index
    %124 = vector.load %arg3[%c1_68, %c0_69, %c0_70] : memref<5x256x256xbf16, #tpu.memory_space<vmem>>, vector<1x256x256xbf16>
    %125 = vector.shape_cast %124 : vector<1x256x256xbf16> to vector<256x256xbf16>
    %cst_71 = arith.constant dense<0.000000e+00> : vector<16x256xf32>
    %126 = tpu.matmul %123, %125, %cst_71 {dimension_numbers = #tpu.dot_dimension_numbers<[1], [0], [0], [1], [0, 0, 1, 1], [], []>} : vector<16x256xbf16>, vector<256x256xbf16>, vector<16x256xf32> -> vector<16x256xf32>
    %127 = arith.addf %116, %126 : vector<16x256xf32>
    %c32_72 = arith.constant 32 : index
    %c0_73 = arith.constant 0 : index
    %128 = vector.load %arg13[%c32_72, %c0_73] : memref<80x256xbf16, #tpu.memory_space<vmem>>, vector<16x256xbf16>
    %c2_74 = arith.constant 2 : index
    %c0_75 = arith.constant 0 : index
    %c0_76 = arith.constant 0 : index
    %129 = vector.load %arg3[%c2_74, %c0_75, %c0_76] : memref<5x256x256xbf16, #tpu.memory_space<vmem>>, vector<1x256x256xbf16>
    %130 = vector.shape_cast %129 : vector<1x256x256xbf16> to vector<256x256xbf16>
    %cst_77 = arith.constant dense<0.000000e+00> : vector<16x256xf32>
    %131 = tpu.matmul %128, %130, %cst_77 {dimension_numbers = #tpu.dot_dimension_numbers<[1], [0], [0], [1], [0, 0, 1, 1], [], []>} : vector<16x256xbf16>, vector<256x256xbf16>, vector<16x256xf32> -> vector<16x256xf32>
    %132 = arith.addf %127, %131 : vector<16x256xf32>
    %c33 = arith.constant 33 : index
    %c0_78 = arith.constant 0 : index
    %133 = vector.load %arg13[%c33, %c0_78] : memref<80x256xbf16, #tpu.memory_space<vmem>>, vector<16x256xbf16>
    %c7_i32_79 = arith.constant 7 : i32
    %134 = vector.broadcast %c7_i32_79 : i32 to vector<16x1xi32>
    %135 = arith.cmpi slt, %16, %134 : vector<16x1xi32>
    %cst_80 = arith.constant 0.000000e+00 : bf16
    %136 = vector.shape_cast %135 : vector<16x1xi1> to vector<16x1xi1>
    %137 = vector.broadcast %136 : vector<16x1xi1> to vector<16x256xi1>
    %138 = vector.broadcast %cst_80 : bf16 to vector<16x256xbf16>
    %139 = arith.select %137, %133, %138 : vector<16x256xi1>, vector<16x256xbf16>
    %c3_81 = arith.constant 3 : index
    %c0_82 = arith.constant 0 : index
    %c0_83 = arith.constant 0 : index
    %140 = vector.load %arg3[%c3_81, %c0_82, %c0_83] : memref<5x256x256xbf16, #tpu.memory_space<vmem>>, vector<1x256x256xbf16>
    %141 = vector.shape_cast %140 : vector<1x256x256xbf16> to vector<256x256xbf16>
    %cst_84 = arith.constant dense<0.000000e+00> : vector<16x256xf32>
    %142 = tpu.matmul %139, %141, %cst_84 {dimension_numbers = #tpu.dot_dimension_numbers<[1], [0], [0], [1], [0, 0, 1, 1], [], []>} : vector<16x256xbf16>, vector<256x256xbf16>, vector<16x256xf32> -> vector<16x256xf32>
    %143 = arith.addf %132, %142 : vector<16x256xf32>
    %c34 = arith.constant 34 : index
    %c0_85 = arith.constant 0 : index
    %144 = vector.load %arg13[%c34, %c0_85] : memref<80x256xbf16, #tpu.memory_space<vmem>>, vector<16x256xbf16>
    %c6_i32_86 = arith.constant 6 : i32
    %145 = vector.broadcast %c6_i32_86 : i32 to vector<16x1xi32>
    %146 = arith.cmpi slt, %16, %145 : vector<16x1xi32>
    %cst_87 = arith.constant 0.000000e+00 : bf16
    %147 = vector.shape_cast %146 : vector<16x1xi1> to vector<16x1xi1>
    %148 = vector.broadcast %147 : vector<16x1xi1> to vector<16x256xi1>
    %149 = vector.broadcast %cst_87 : bf16 to vector<16x256xbf16>
    %150 = arith.select %148, %144, %149 : vector<16x256xi1>, vector<16x256xbf16>
    %c4_88 = arith.constant 4 : index
    %c0_89 = arith.constant 0 : index
    %c0_90 = arith.constant 0 : index
    %151 = vector.load %arg3[%c4_88, %c0_89, %c0_90] : memref<5x256x256xbf16, #tpu.memory_space<vmem>>, vector<1x256x256xbf16>
    %152 = vector.shape_cast %151 : vector<1x256x256xbf16> to vector<256x256xbf16>
    %cst_91 = arith.constant dense<0.000000e+00> : vector<16x256xf32>
    %153 = tpu.matmul %150, %152, %cst_91 {dimension_numbers = #tpu.dot_dimension_numbers<[1], [0], [0], [1], [0, 0, 1, 1], [], []>} : vector<16x256xbf16>, vector<256x256xbf16>, vector<16x256xf32> -> vector<16x256xf32>
    %154 = arith.addf %143, %153 : vector<16x256xf32>
    %c1_92 = arith.constant 1 : index
    %c0_93 = arith.constant 0 : index
    %155 = vector.load %arg8[%c1_92, %c0_93] : memref<6x256xf32, #tpu.memory_space<vmem>>, vector<1x256xf32>
    %156 = vector.broadcast %155 : vector<1x256xf32> to vector<16x256xf32>
    %157 = arith.mulf %154, %156 : vector<16x256xf32>
    %c1_94 = arith.constant 1 : index
    %c0_95 = arith.constant 0 : index
    %158 = vector.load %arg9[%c1_94, %c0_95] : memref<6x256xf32, #tpu.memory_space<vmem>>, vector<1x256xf32>
    %159 = vector.broadcast %158 : vector<1x256xf32> to vector<16x256xf32>
    %160 = arith.addf %157, %159 : vector<16x256xf32>
    %cst_96 = arith.constant 0.000000e+00 : f32
    %161 = vector.broadcast %cst_96 : f32 to vector<16x256xf32>
    %162 = arith.maximumf %160, %161 : vector<16x256xf32>
    %163 = arith.truncf %162 : vector<16x256xf32> to vector<16x256xbf16>
    %c32_97 = arith.constant 32 : index
    %c0_98 = arith.constant 0 : index
    %164 = vector.load %arg13[%c32_97, %c0_98] : memref<80x256xbf16, #tpu.memory_space<vmem>>, vector<16x256xbf16>
    tpu.vector_store %arg13[%c32_97, %c0_98], %163 {strides = array<i32>} : memref<80x256xbf16, #tpu.memory_space<vmem>>, vector<16x256xbf16>,
    %c28 = arith.constant 28 : index
    %c0_99 = arith.constant 0 : index
    %165 = vector.load %arg13[%c28, %c0_99] : memref<80x256xbf16, #tpu.memory_space<vmem>>, vector<16x256xbf16>
    %c4_i32 = arith.constant 4 : i32
    %166 = vector.broadcast %c4_i32 : i32 to vector<16x1xi32>
    %167 = arith.cmpi sge, %16, %166 : vector<16x1xi32>
    %cst_100 = arith.constant 0.000000e+00 : bf16
    %168 = vector.shape_cast %167 : vector<16x1xi1> to vector<16x1xi1>
    %169 = vector.broadcast %168 : vector<16x1xi1> to vector<16x256xi1>
    %170 = vector.broadcast %cst_100 : bf16 to vector<16x256xbf16>
    %171 = arith.select %169, %165, %170 : vector<16x256xi1>, vector<16x256xbf16>
    %c0_101 = arith.constant 0 : index
    %c0_102 = arith.constant 0 : index
    %c0_103 = arith.constant 0 : index
    %172 = vector.load %arg4[%c0_101, %c0_102, %c0_103] : memref<5x256x256xbf16, #tpu.memory_space<vmem>>, vector<1x256x256xbf16>
    %173 = vector.shape_cast %172 : vector<1x256x256xbf16> to vector<256x256xbf16>
    %cst_104 = arith.constant dense<0.000000e+00> : vector<16x256xf32>
    %174 = tpu.matmul %171, %173, %cst_104 {dimension_numbers = #tpu.dot_dimension_numbers<[1], [0], [0], [1], [0, 0, 1, 1], [], []>} : vector<16x256xbf16>, vector<256x256xbf16>, vector<16x256xf32> -> vector<16x256xf32>
    %c30_105 = arith.constant 30 : index
    %c0_106 = arith.constant 0 : index
    %175 = vector.load %arg13[%c30_105, %c0_106] : memref<80x256xbf16, #tpu.memory_space<vmem>>, vector<16x256xbf16>
    %c2_i32_107 = arith.constant 2 : i32
    %176 = vector.broadcast %c2_i32_107 : i32 to vector<16x1xi32>
    %177 = arith.cmpi sge, %16, %176 : vector<16x1xi32>
    %cst_108 = arith.constant 0.000000e+00 : bf16
    %178 = vector.shape_cast %177 : vector<16x1xi1> to vector<16x1xi1>
    %179 = vector.broadcast %178 : vector<16x1xi1> to vector<16x256xi1>
    %180 = vector.broadcast %cst_108 : bf16 to vector<16x256xbf16>
    %181 = arith.select %179, %175, %180 : vector<16x256xi1>, vector<16x256xbf16>
    %c1_109 = arith.constant 1 : index
    %c0_110 = arith.constant 0 : index
    %c0_111 = arith.constant 0 : index
    %182 = vector.load %arg4[%c1_109, %c0_110, %c0_111] : memref<5x256x256xbf16, #tpu.memory_space<vmem>>, vector<1x256x256xbf16>
    %183 = vector.shape_cast %182 : vector<1x256x256xbf16> to vector<256x256xbf16>
    %cst_112 = arith.constant dense<0.000000e+00> : vector<16x256xf32>
    %184 = tpu.matmul %181, %183, %cst_112 {dimension_numbers = #tpu.dot_dimension_numbers<[1], [0], [0], [1], [0, 0, 1, 1], [], []>} : vector<16x256xbf16>, vector<256x256xbf16>, vector<16x256xf32> -> vector<16x256xf32>
    %185 = arith.addf %174, %184 : vector<16x256xf32>
    %c32_113 = arith.constant 32 : index
    %c0_114 = arith.constant 0 : index
    %186 = vector.load %arg13[%c32_113, %c0_114] : memref<80x256xbf16, #tpu.memory_space<vmem>>, vector<16x256xbf16>
    %c2_115 = arith.constant 2 : index
    %c0_116 = arith.constant 0 : index
    %c0_117 = arith.constant 0 : index
    %187 = vector.load %arg4[%c2_115, %c0_116, %c0_117] : memref<5x256x256xbf16, #tpu.memory_space<vmem>>, vector<1x256x256xbf16>
    %188 = vector.shape_cast %187 : vector<1x256x256xbf16> to vector<256x256xbf16>
    %cst_118 = arith.constant dense<0.000000e+00> : vector<16x256xf32>
    %189 = tpu.matmul %186, %188, %cst_118 {dimension_numbers = #tpu.dot_dimension_numbers<[1], [0], [0], [1], [0, 0, 1, 1], [], []>} : vector<16x256xbf16>, vector<256x256xbf16>, vector<16x256xf32> -> vector<16x256xf32>
    %190 = arith.addf %185, %189 : vector<16x256xf32>
    %c34_119 = arith.constant 34 : index
    %c0_120 = arith.constant 0 : index
    %191 = vector.load %arg13[%c34_119, %c0_120] : memref<80x256xbf16, #tpu.memory_space<vmem>>, vector<16x256xbf16>
    %c6_i32_121 = arith.constant 6 : i32
    %192 = vector.broadcast %c6_i32_121 : i32 to vector<16x1xi32>
    %193 = arith.cmpi slt, %16, %192 : vector<16x1xi32>
    %cst_122 = arith.constant 0.000000e+00 : bf16
    %194 = vector.shape_cast %193 : vector<16x1xi1> to vector<16x1xi1>
    %195 = vector.broadcast %194 : vector<16x1xi1> to vector<16x256xi1>
    %196 = vector.broadcast %cst_122 : bf16 to vector<16x256xbf16>
    %197 = arith.select %195, %191, %196 : vector<16x256xi1>, vector<16x256xbf16>
    %c3_123 = arith.constant 3 : index
    %c0_124 = arith.constant 0 : index
    %c0_125 = arith.constant 0 : index
    %198 = vector.load %arg4[%c3_123, %c0_124, %c0_125] : memref<5x256x256xbf16, #tpu.memory_space<vmem>>, vector<1x256x256xbf16>
    %199 = vector.shape_cast %198 : vector<1x256x256xbf16> to vector<256x256xbf16>
    %cst_126 = arith.constant dense<0.000000e+00> : vector<16x256xf32>
    %200 = tpu.matmul %197, %199, %cst_126 {dimension_numbers = #tpu.dot_dimension_numbers<[1], [0], [0], [1], [0, 0, 1, 1], [], []>} : vector<16x256xbf16>, vector<256x256xbf16>, vector<16x256xf32> -> vector<16x256xf32>
    %201 = arith.addf %190, %200 : vector<16x256xf32>
    %c36 = arith.constant 36 : index
    %c0_127 = arith.constant 0 : index
    %202 = vector.load %arg13[%c36, %c0_127] : memref<80x256xbf16, #tpu.memory_space<vmem>>, vector<16x256xbf16>
    %c4_i32_128 = arith.constant 4 : i32
    %203 = vector.broadcast %c4_i32_128 : i32 to vector<16x1xi32>
    %204 = arith.cmpi slt, %16, %203 : vector<16x1xi32>
    %cst_129 = arith.constant 0.000000e+00 : bf16
    %205 = vector.shape_cast %204 : vector<16x1xi1> to vector<16x1xi1>
    %206 = vector.broadcast %205 : vector<16x1xi1> to vector<16x256xi1>
    %207 = vector.broadcast %cst_129 : bf16 to vector<16x256xbf16>
    %208 = arith.select %206, %202, %207 : vector<16x256xi1>, vector<16x256xbf16>
    %c4_130 = arith.constant 4 : index
    %c0_131 = arith.constant 0 : index
    %c0_132 = arith.constant 0 : index
    %209 = vector.load %arg4[%c4_130, %c0_131, %c0_132] : memref<5x256x256xbf16, #tpu.memory_space<vmem>>, vector<1x256x256xbf16>
    %210 = vector.shape_cast %209 : vector<1x256x256xbf16> to vector<256x256xbf16>
    %cst_133 = arith.constant dense<0.000000e+00> : vector<16x256xf32>
    %211 = tpu.matmul %208, %210, %cst_133 {dimension_numbers = #tpu.dot_dimension_numbers<[1], [0], [0], [1], [0, 0, 1, 1], [], []>} : vector<16x256xbf16>, vector<256x256xbf16>, vector<16x256xf32> -> vector<16x256xf32>
    %212 = arith.addf %201, %211 : vector<16x256xf32>
    %c2_134 = arith.constant 2 : index
    %c0_135 = arith.constant 0 : index
    %213 = vector.load %arg8[%c2_134, %c0_135] : memref<6x256xf32, #tpu.memory_space<vmem>>, vector<1x256xf32>
    %214 = vector.broadcast %213 : vector<1x256xf32> to vector<16x256xf32>
    %215 = arith.mulf %212, %214 : vector<16x256xf32>
    %c2_136 = arith.constant 2 : index
    %c0_137 = arith.constant 0 : index
    %216 = vector.load %arg9[%c2_136, %c0_137] : memref<6x256xf32, #tpu.memory_space<vmem>>, vector<1x256xf32>
    %217 = vector.broadcast %216 : vector<1x256xf32> to vector<16x256xf32>
    %218 = arith.addf %215, %217 : vector<16x256xf32>
    %cst_138 = arith.constant 0.000000e+00 : f32
    %219 = vector.broadcast %cst_138 : f32 to vector<16x256xf32>
    %220 = arith.maximumf %218, %219 : vector<16x256xf32>
    %221 = arith.truncf %220 : vector<16x256xf32> to vector<16x256xbf16>
    %c32_139 = arith.constant 32 : index
    %c0_140 = arith.constant 0 : index
    %222 = vector.load %arg13[%c32_139, %c0_140] : memref<80x256xbf16, #tpu.memory_space<vmem>>, vector<16x256xbf16>
    tpu.vector_store %arg13[%c32_139, %c0_140], %221 {strides = array<i32>} : memref<80x256xbf16, #tpu.memory_space<vmem>>, vector<16x256xbf16>,
    %c28_141 = arith.constant 28 : index
    %c0_142 = arith.constant 0 : index
    %223 = vector.load %arg13[%c28_141, %c0_142] : memref<80x256xbf16, #tpu.memory_space<vmem>>, vector<16x256xbf16>
    %c4_i32_143 = arith.constant 4 : i32
    %224 = vector.broadcast %c4_i32_143 : i32 to vector<16x1xi32>
    %225 = arith.cmpi sge, %16, %224 : vector<16x1xi32>
    %cst_144 = arith.constant 0.000000e+00 : bf16
    %226 = vector.shape_cast %225 : vector<16x1xi1> to vector<16x1xi1>
    %227 = vector.broadcast %226 : vector<16x1xi1> to vector<16x256xi1>
    %228 = vector.broadcast %cst_144 : bf16 to vector<16x256xbf16>
    %229 = arith.select %227, %223, %228 : vector<16x256xi1>, vector<16x256xbf16>
    %c1_145 = arith.constant 1 : index
    %c0_146 = arith.constant 0 : index
    %c0_147 = arith.constant 0 : index
    %230 = vector.load %arg5[%c1_145, %c0_146, %c0_147] : memref<5x256x256xbf16, #tpu.memory_space<vmem>>, vector<1x256x256xbf16>
    %231 = vector.shape_cast %230 : vector<1x256x256xbf16> to vector<256x256xbf16>
    %cst_148 = arith.constant dense<0.000000e+00> : vector<16x256xf32>
    %232 = tpu.matmul %229, %231, %cst_148 {dimension_numbers = #tpu.dot_dimension_numbers<[1], [0], [0], [1], [0, 0, 1, 1], [], []>} : vector<16x256xbf16>, vector<256x256xbf16>, vector<16x256xf32> -> vector<16x256xf32>
    %c32_149 = arith.constant 32 : index
    %c0_150 = arith.constant 0 : index
    %233 = vector.load %arg13[%c32_149, %c0_150] : memref<80x256xbf16, #tpu.memory_space<vmem>>, vector<16x256xbf16>
    %c2_151 = arith.constant 2 : index
    %c0_152 = arith.constant 0 : index
    %c0_153 = arith.constant 0 : index
    %234 = vector.load %arg5[%c2_151, %c0_152, %c0_153] : memref<5x256x256xbf16, #tpu.memory_space<vmem>>, vector<1x256x256xbf16>
    %235 = vector.shape_cast %234 : vector<1x256x256xbf16> to vector<256x256xbf16>
    %cst_154 = arith.constant dense<0.000000e+00> : vector<16x256xf32>
    %236 = tpu.matmul %233, %235, %cst_154 {dimension_numbers = #tpu.dot_dimension_numbers<[1], [0], [0], [1], [0, 0, 1, 1], [], []>} : vector<16x256xbf16>, vector<256x256xbf16>, vector<16x256xf32> -> vector<16x256xf32>
    %237 = arith.addf %232, %236 : vector<16x256xf32>
    %c36_155 = arith.constant 36 : index
    %c0_156 = arith.constant 0 : index
    %238 = vector.load %arg13[%c36_155, %c0_156] : memref<80x256xbf16, #tpu.memory_space<vmem>>, vector<16x256xbf16>
    %c4_i32_157 = arith.constant 4 : i32
    %239 = vector.broadcast %c4_i32_157 : i32 to vector<16x1xi32>
    %240 = arith.cmpi slt, %16, %239 : vector<16x1xi32>
    %cst_158 = arith.constant 0.000000e+00 : bf16
    %241 = vector.shape_cast %240 : vector<16x1xi1> to vector<16x1xi1>
    %242 = vector.broadcast %241 : vector<16x1xi1> to vector<16x256xi1>
    %243 = vector.broadcast %cst_158 : bf16 to vector<16x256xbf16>
    %244 = arith.select %242, %238, %243 : vector<16x256xi1>, vector<16x256xbf16>
    %c3_159 = arith.constant 3 : index
    %c0_160 = arith.constant 0 : index
    %c0_161 = arith.constant 0 : index
    %245 = vector.load %arg5[%c3_159, %c0_160, %c0_161] : memref<5x256x256xbf16, #tpu.memory_space<vmem>>, vector<1x256x256xbf16>
    %246 = vector.shape_cast %245 : vector<1x256x256xbf16> to vector<256x256xbf16>
    %cst_162 = arith.constant dense<0.000000e+00> : vector<16x256xf32>
    %247 = tpu.matmul %244, %246, %cst_162 {dimension_numbers = #tpu.dot_dimension_numbers<[1], [0], [0], [1], [0, 0, 1, 1], [], []>} : vector<16x256xbf16>, vector<256x256xbf16>, vector<16x256xf32> -> vector<16x256xf32>
    %248 = arith.addf %237, %247 : vector<16x256xf32>
    %c3_163 = arith.constant 3 : index
    %c0_164 = arith.constant 0 : index
    %249 = vector.load %arg8[%c3_163, %c0_164] : memref<6x256xf32, #tpu.memory_space<vmem>>, vector<1x256xf32>
    %250 = vector.broadcast %249 : vector<1x256xf32> to vector<16x256xf32>
    %251 = arith.mulf %248, %250 : vector<16x256xf32>
    %c3_165 = arith.constant 3 : index
    %c0_166 = arith.constant 0 : index
    %252 = vector.load %arg9[%c3_165, %c0_166] : memref<6x256xf32, #tpu.memory_space<vmem>>, vector<1x256xf32>
    %253 = vector.broadcast %252 : vector<1x256xf32> to vector<16x256xf32>
    %254 = arith.addf %251, %253 : vector<16x256xf32>
    %cst_167 = arith.constant 0.000000e+00 : f32
    %255 = vector.broadcast %cst_167 : f32 to vector<16x256xf32>
    %256 = arith.maximumf %254, %255 : vector<16x256xf32>
    %257 = arith.truncf %256 : vector<16x256xf32> to vector<16x256xbf16>
    %c32_168 = arith.constant 32 : index
    %c0_169 = arith.constant 0 : index
    %258 = vector.load %arg13[%c32_168, %c0_169] : memref<80x256xbf16, #tpu.memory_space<vmem>>, vector<16x256xbf16>
    tpu.vector_store %arg13[%c32_168, %c0_169], %257 {strides = array<i32>} : memref<80x256xbf16, #tpu.memory_space<vmem>>, vector<16x256xbf16>,
    %c32_170 = arith.constant 32 : index
    %c0_171 = arith.constant 0 : index
    %259 = vector.load %arg13[%c32_170, %c0_171] : memref<80x256xbf16, #tpu.memory_space<vmem>>, vector<16x256xbf16>
    %c2_172 = arith.constant 2 : index
    %c0_173 = arith.constant 0 : index
    %c0_174 = arith.constant 0 : index
    %260 = vector.load %arg6[%c2_172, %c0_173, %c0_174] : memref<5x256x256xbf16, #tpu.memory_space<vmem>>, vector<1x256x256xbf16>
    %261 = vector.shape_cast %260 : vector<1x256x256xbf16> to vector<256x256xbf16>
    %cst_175 = arith.constant dense<0.000000e+00> : vector<16x256xf32>
    %262 = tpu.matmul %259, %261, %cst_175 {dimension_numbers = #tpu.dot_dimension_numbers<[1], [0], [0], [1], [0, 0, 1, 1], [], []>} : vector<16x256xbf16>, vector<256x256xbf16>, vector<16x256xf32> -> vector<16x256xf32>
    %c4_176 = arith.constant 4 : index
    %c0_177 = arith.constant 0 : index
    %263 = vector.load %arg8[%c4_176, %c0_177] : memref<6x256xf32, #tpu.memory_space<vmem>>, vector<1x256xf32>
    %264 = vector.broadcast %263 : vector<1x256xf32> to vector<16x256xf32>
    %265 = arith.mulf %262, %264 : vector<16x256xf32>
    %c4_178 = arith.constant 4 : index
    %c0_179 = arith.constant 0 : index
    %266 = vector.load %arg9[%c4_178, %c0_179] : memref<6x256xf32, #tpu.memory_space<vmem>>, vector<1x256xf32>
    %267 = vector.broadcast %266 : vector<1x256xf32> to vector<16x256xf32>
    %268 = arith.addf %265, %267 : vector<16x256xf32>
    %cst_180 = arith.constant 0.000000e+00 : f32
    %269 = vector.broadcast %cst_180 : f32 to vector<16x256xf32>
    %270 = arith.maximumf %268, %269 : vector<16x256xf32>
    %271 = arith.truncf %270 : vector<16x256xf32> to vector<16x256xbf16>
    %c32_181 = arith.constant 32 : index
    %c0_182 = arith.constant 0 : index
    %272 = vector.load %arg13[%c32_181, %c0_182] : memref<80x256xbf16, #tpu.memory_space<vmem>>, vector<16x256xbf16>
    tpu.vector_store %arg13[%c32_181, %c0_182], %271 {strides = array<i32>} : memref<80x256xbf16, #tpu.memory_space<vmem>>, vector<16x256xbf16>,
    %c32_183 = arith.constant 32 : index
    %c0_184 = arith.constant 0 : index
    %273 = vector.load %arg13[%c32_183, %c0_184] : memref<80x256xbf16, #tpu.memory_space<vmem>>, vector<16x256xbf16>
    %c2_185 = arith.constant 2 : index
    %c0_186 = arith.constant 0 : index
    %c0_187 = arith.constant 0 : index
    %274 = vector.load %arg7[%c2_185, %c0_186, %c0_187] : memref<5x256x256xbf16, #tpu.memory_space<vmem>>, vector<1x256x256xbf16>
    %275 = vector.shape_cast %274 : vector<1x256x256xbf16> to vector<256x256xbf16>
    %cst_188 = arith.constant dense<0.000000e+00> : vector<16x256xf32>
    %276 = tpu.matmul %273, %275, %cst_188 {dimension_numbers = #tpu.dot_dimension_numbers<[1], [0], [0], [1], [0, 0, 1, 1], [], []>} : vector<16x256xbf16>, vector<256x256xbf16>, vector<16x256xf32> -> vector<16x256xf32>
    %c5_189 = arith.constant 5 : index
    %c0_190 = arith.constant 0 : index
    %277 = vector.load %arg8[%c5_189, %c0_190] : memref<6x256xf32, #tpu.memory_space<vmem>>, vector<1x256xf32>
    %278 = vector.broadcast %277 : vector<1x256xf32> to vector<16x256xf32>
    %279 = arith.mulf %276, %278 : vector<16x256xf32>
    %c5_191 = arith.constant 5 : index
    %c0_192 = arith.constant 0 : index
    %280 = vector.load %arg9[%c5_191, %c0_192] : memref<6x256xf32, #tpu.memory_space<vmem>>, vector<1x256xf32>
    %281 = vector.broadcast %280 : vector<1x256xf32> to vector<16x256xf32>
    %282 = arith.addf %279, %281 : vector<16x256xf32>
    %cst_193 = arith.constant 0.000000e+00 : f32
    %283 = vector.broadcast %cst_193 : f32 to vector<16x256xf32>
    %284 = arith.maximumf %282, %283 : vector<16x256xf32>
    %c0_194 = arith.constant 0 : index
    %c0_195 = arith.constant 0 : index
    %285 = vector.load %arg10[%c0_194, %c0_195] : memref<16x16xbf16, #tpu.memory_space<vmem>>, vector<16x16xbf16>
    %286 = arith.truncf %284 : vector<16x256xf32> to vector<16x256xbf16>
    %cst_196 = arith.constant dense<0.000000e+00> : vector<16x256xf32>
    %287 = tpu.matmul %285, %286, %cst_196 {dimension_numbers = #tpu.dot_dimension_numbers<[1], [0], [0], [1], [0, 0, 1, 1], [], []>} : vector<16x16xbf16>, vector<16x256xbf16>, vector<16x256xf32> -> vector<16x256xf32>
    %c0_197 = arith.constant 0 : index
    %c0_198 = arith.constant 0 : index
    %288 = vector.load %arg11[%c0_197, %c0_198] : memref<16x256xf32, #tpu.memory_space<vmem>>, vector<16x256xf32>
    tpu.vector_store %arg11[%c0_197, %c0_198], %287 {strides = array<i32>} : memref<16x256xf32, #tpu.memory_space<vmem>>, vector<16x256xf32>,
    return
  }
  func.func @transform_0(%arg0: i32) -> (i32, i32) {
    %c0_i32 = arith.constant 0 : i32
    %c0_i32_0 = arith.constant 0 : i32
    return %arg0, %c0_i32 : i32, i32
  }
  func.func @transform_1(%arg0: i32) -> (i32, i32, i32) {
    %c0_i32 = arith.constant 0 : i32
    %c0_i32_0 = arith.constant 0 : i32
    %c0_i32_1 = arith.constant 0 : i32
    %c0_i32_2 = arith.constant 0 : i32
    return %c0_i32, %c0_i32_0, %c0_i32_1 : i32, i32, i32
  }
  func.func @transform_2(%arg0: i32) -> (i32, i32, i32) {
    %c0_i32 = arith.constant 0 : i32
    %c0_i32_0 = arith.constant 0 : i32
    %c0_i32_1 = arith.constant 0 : i32
    %c0_i32_2 = arith.constant 0 : i32
    return %c0_i32, %c0_i32_0, %c0_i32_1 : i32, i32, i32
  }
  func.func @transform_3(%arg0: i32) -> (i32, i32, i32) {
    %c0_i32 = arith.constant 0 : i32
    %c0_i32_0 = arith.constant 0 : i32
    %c0_i32_1 = arith.constant 0 : i32
    %c0_i32_2 = arith.constant 0 : i32
    return %c0_i32, %c0_i32_0, %c0_i32_1 : i32, i32, i32
  }
  func.func @transform_4(%arg0: i32) -> (i32, i32, i32) {
    %c0_i32 = arith.constant 0 : i32
    %c0_i32_0 = arith.constant 0 : i32
    %c0_i32_1 = arith.constant 0 : i32
    %c0_i32_2 = arith.constant 0 : i32
    return %c0_i32, %c0_i32_0, %c0_i32_1 : i32, i32, i32
  }
  func.func @transform_5(%arg0: i32) -> (i32, i32, i32) {
    %c0_i32 = arith.constant 0 : i32
    %c0_i32_0 = arith.constant 0 : i32
    %c0_i32_1 = arith.constant 0 : i32
    %c0_i32_2 = arith.constant 0 : i32
    return %c0_i32, %c0_i32_0, %c0_i32_1 : i32, i32, i32
  }
  func.func @transform_6(%arg0: i32) -> (i32, i32, i32) {
    %c0_i32 = arith.constant 0 : i32
    %c0_i32_0 = arith.constant 0 : i32
    %c0_i32_1 = arith.constant 0 : i32
    %c0_i32_2 = arith.constant 0 : i32
    return %c0_i32, %c0_i32_0, %c0_i32_1 : i32, i32, i32
  }
  func.func @transform_7(%arg0: i32) -> (i32, i32) {
    %c0_i32 = arith.constant 0 : i32
    %c0_i32_0 = arith.constant 0 : i32
    %c0_i32_1 = arith.constant 0 : i32
    return %c0_i32, %c0_i32_0 : i32, i32
  }
  func.func @transform_8(%arg0: i32) -> (i32, i32) {
    %c0_i32 = arith.constant 0 : i32
    %c0_i32_0 = arith.constant 0 : i32
    %c0_i32_1 = arith.constant 0 : i32
    return %c0_i32, %c0_i32_0 : i32, i32
  }
  func.func @transform_9(%arg0: i32) -> (i32, i32) {
    %c0_i32 = arith.constant 0 : i32
    %c0_i32_0 = arith.constant 0 : i32
    %c0_i32_1 = arith.constant 0 : i32
    return %c0_i32, %c0_i32_0 : i32, i32
  }
  func.func @transform_10(%arg0: i32) -> (i32, i32) {
    %c0_i32 = arith.constant 0 : i32
    %c0_i32_0 = arith.constant 0 : i32
    return %arg0, %c0_i32 : i32, i32
  }
}

</mosaic_0001>

<bundles_post_ra>
// kernel: visual_stream_forward.1
= control target key start
LH: loop header
LB: loop body
LE: loop exit
PB: predicated region body
PF: predicated region fallthrough
CT: control target
= control target key end

     0   :  { %s12649_s0 = inlined_call_operand.hbm [shape: bf16[32,512], index: 0, kind: input, shape index: {}]   ;;  %s12650_s1 = inlined_call_operand.hbm [shape: bf16[7,512,256], index: 1, kind: input, shape index: {}]   ;;  %s12651_s2 = inlined_call_operand.hbm [shape: bf16[5,256,256], index: 2, kind: input, shape index: {}]   ;;  %s12652_s3 = inlined_call_operand.hbm [shape: bf16[5,256,256], index: 3, kind: input, shape index: {}]   ;;  %s12653_s4 = inlined_call_operand.hbm [shape: bf16[5,256,256], index: 4, kind: input, shape index: {}]   ;;  %s12654_s5 = inlined_call_operand.hbm [shape: bf16[5,256,256], index: 5, kind: input, shape index: {}]   ;;  %s12655_s6 = inlined_call_operand.hbm [shape: bf16[5,256,256], index: 6, kind: input, shape index: {}]   ;;  %s12656_s7 = inlined_call_operand.hbm [shape: f32[6,256], index: 7, kind: input, shape index: {}]   ;;  %s12657_s8 = inlined_call_operand.hbm [shape: f32[6,256], index: 8, kind: input, shape index: {}]   ;;  %s12658_s9 = inlined_call_operand.hbm [shape: bf16[16,16], index: 9, kind: input, shape index: {}]   ;;  %s12659_s10 = inlined_call_operand.hbm [shape: f32[32,256], index: 10, kind: output, shape index: {}]  }
   0x1   :  { %12665 = sst [smem:[#allocation30_spill]] %s12650_s1 }
   0x2   :  { %12666 = sst [smem:[#allocation31_spill]] %s12659_s10 }
   0x3   :  { %15 = vsyncpa [#allocation5], 0 }
   0x4   :  { %17 = vsyncpa [#allocation5 + $0x1], 0 }
   0x5   :  { %18 = vsyncpa [#allocation8], 0 }
   0x6   :  { %19 = vsyncpa [#allocation11], 0 }
   0x7   :  { %20 = vsyncpa [#allocation14], 0 }
   0x8   :  { %21 = vsyncpa [#allocation17], 0 }
   0x9   :  { %22 = vsyncpa [#allocation20], 0 }
   0xa   :  { %23 = vsyncpa [#allocation6], 0 }
   0xb   :  { %25 = vsyncpa [#allocation6 + $0x1], 0  ;;  %s11782_s13 = smov 0   ;;  %s11784_s14 = smov 0  }
   0xc   :  { %s11786_s15 = smov 0   ;;  %s11788_s16 = smov 0  }
   0xd LB: > { %s11707_s17 = smov [#allocation7]   ;;  %s11803_s19 = sadd.s32 4294967295, %s11705_s16   ;;  %s11705_s16 = sphi %s11788_s16, %s12712_s16   ;;  %s11701_s15 = sphi %s11786_s15, %s12711_s15   ;;  %s11697_s14 = sphi %s11784_s14, %s12710_s14   ;;  %s11693_s13 = sphi %s11782_s13, %s12709_s13  }
   0xe   : > { %s289_s18 = sshll.u32 %s11707_s17, 4  ;;  %p8709_p0 = scmp.ge.s32.totalorder %s11705_s16, 1  ;;  %s11808_s18 = int_to_ptr.vmem [resolvable:$true] %s289_s18 }
   0xf   : > { %p12662_p1 = scmp.eq.s32.totalorder %s11803_s19, 0  ;;  %p277_p2 = scmp.lt.s32.totalorder %s11705_s16, 3 }
  0x10   : > { %s11708_s21 = smov [#allocation10]   ;;  %s11709_s24 = smov [#allocation13]  }
  0x11   : > { %p11810_p3 = pnand %p8709_p0, %p277_p2  ;;  %s315_s22 = sshll.u32 %s11708_s21, 4  ;;  %s11823_s22 = int_to_ptr.vmem [resolvable:$true] %s315_s22 }
  0x12   : > { %s341_s25 = sshll.u32 %s11709_s24, 4  ;;  %s12670_s1 = sld [smem:[#allocation30_spill]]  ;;  %s11825_s25 = int_to_ptr.vmem [resolvable:$true] %s341_s25 }
  0x13   : > { %s12667_s20 = scalar_select %p11810_p3, 1, 0 }
  0x14   : > { %p9820_p5 = pneg %p11810_p3 }
  0x15   : > { %12668 = sst [smem:[#allocation29_spill]] %s12667_s20 }
  0x16   : > { %p11819_p6 = pnand %p9820_p5, %p12662_p1 }
  0x18   : > { %s11337_s28 = scalar_lea.hbm %s12670_s1, 57344  ;;  %p11835_p8 = pneg %p11819_p6 }
  0x19   : > { %p11338_p7 = scmp.ne.s32.totalorder %s12670_s1, %s11337_s28  ;;  %p11344_p11 = scmp.lt.u32.totalorder %s11337_s28, %s12670_s1 }
  0x1b   : > { %p11340_p9 = pnand %p11835_p8, %p11338_p7 }
  0x1d   : > { %p11341_p10 = pneg %p11340_p9 }
  0x1f   : > { %p11346_p12 = pnand %p11344_p11, %p11341_p10 }
  0x21   : > { %11349 = shalt.err (!%p11346_p12)
}
  0x22   : > { %s11350_s21 = scalar_lea.vmem %s11808_s18, 57344  ;;  %p11358_p5 = scmp.lt.s32.totalorder %s11808_s18, %s11808_s18 }
  0x23   : > { %p11351_p13 = scmp.ne.s32.totalorder %s11808_s18, %s11350_s21  ;;  %p11359_p4 = scmp.lt.s32.totalorder %s11350_s21, %s11350_s21 }
  0x25   : > { %p11353_p0 = pnand %p11351_p13, %p11835_p8  ;;  %p11360_p7 = por %p11359_p4, %p11358_p5 }
  0x27   : > { %p11354_p2 = pneg %p11353_p0 }
  0x29   : > { %p11361_p9 = pnand %p11360_p7, %p11354_p2 }
  0x2b   : > { %11364 = shalt.err (!%p11361_p9)
}
  0x2c   : > { %s11710_s24 = smov 128   ;;  %s11711_s26 = smov 8  }
  0x2d   : > { %9823 = dma.hbm_to_vmem [thread:$0]  (!%p11819_p6), %s12670_s1, 57344, %s11808_s18, [#allocation8], %s11710_s24, %s11710_s24, %s11711_s26  }
  0x2e   : > { %s11365_s12 = scalar_lea.hbm %s12652_s3, 20480 }
  0x2f   : > { %p11366_p4 = scmp.ne.s32.totalorder %s12652_s3, %s11365_s12  ;;  %p11372_p12 = scmp.lt.u32.totalorder %s11365_s12, %s12652_s3 }
  0x31   : > { %p11368_p10 = pnand %p11366_p4, %p11835_p8 }
  0x33   : > { %p11369_p11 = pneg %p11368_p10 }
  0x35   : > { %p11374_p13 = pnand %p11372_p12, %p11369_p11 }
  0x37   : > { %11377 = shalt.err (!%p11374_p13)
}
  0x38   : > { %s11378_s18 = scalar_lea.vmem %s11823_s22, 20480  ;;  %p11386_p7 = scmp.lt.s32.totalorder %s11823_s22, %s11823_s22 }
  0x39   : > { %p11379_p0 = scmp.ne.s32.totalorder %s11823_s22, %s11378_s18  ;;  %p11387_p9 = scmp.lt.s32.totalorder %s11378_s18, %s11378_s18 }
  0x3b   : > { %p11381_p2 = pnand %p11379_p0, %p11835_p8  ;;  %p11388_p4 = por %p11387_p9, %p11386_p7 }
  0x3d   : > { %p11382_p5 = pneg %p11381_p2 }
  0x3f   : > { %p11389_p10 = pnand %p11388_p4, %p11382_p5 }
  0x41   : > { %11392 = shalt.err (!%p11389_p10)
}
  0x42   : > { %9829 = dma.hbm_to_vmem [thread:$0]  (!%p11819_p6), %s12652_s3, 20480, %s11823_s22, [#allocation11], %s11710_s24, %s11710_s24, %s11711_s26  }
  0x43   : > { %s11393_s29 = scalar_lea.hbm %s12654_s5, 20480 }
  0x44   : > { %p11394_p11 = scmp.ne.s32.totalorder %s12654_s5, %s11393_s29  ;;  %p11400_p0 = scmp.lt.u32.totalorder %s11393_s29, %s12654_s5 }
  0x46   : > { %p11396_p12 = pnand %p11394_p11, %p11835_p8 }
  0x48   : > { %p11397_p13 = pneg %p11396_p12 }
  0x4a   : > { %p11402_p2 = pnand %p11400_p0, %p11397_p13 }
  0x4c   : > { %11405 = shalt.err (!%p11402_p2)
}
  0x4d   : > { %s11406_s22 = scalar_lea.vmem %s11825_s25, 20480  ;;  %p11414_p4 = scmp.lt.s32.totalorder %s11825_s25, %s11825_s25 }
  0x4e   : > { %p11407_p5 = scmp.ne.s32.totalorder %s11825_s25, %s11406_s22  ;;  %p11415_p10 = scmp.lt.s32.totalorder %s11406_s22, %s11406_s22 }
  0x50   : > { %p11409_p7 = pnand %p11407_p5, %p11835_p8  ;;  %p11416_p11 = por %p11415_p10, %p11414_p4 }
  0x52   : > { %p11410_p9 = pneg %p11409_p7 }
  0x54   : > { %p11417_p12 = pnand %p11416_p11, %p11410_p9 }
  0x56   : > { %11420 = shalt.err (!%p11417_p12)
}
  0x57   : > { %9835 = dma.hbm_to_vmem [thread:$0]  (!%p11819_p6), %s12654_s5, 20480, %s11825_s25, [#allocation14], %s11710_s24, %s11710_s24, %s11711_s26  }
  0x58   : > { %s11712_s20 = smov [#allocation16]   ;;  %s11713_s28 = smov [#allocation9]  }
  0x59   : > { %s368_s27 = sshll.u32 %s11712_s20, 4  ;;  %s302_s29 = sshll.u32 %s11713_s28, 4  ;;  %s369_s27 = int_to_ptr.vmem [resolvable:$true] %s368_s27  ;;  %s303_s29 = int_to_ptr.vmem [resolvable:$true] %s302_s29 }
  0x5a   : > { %s11421_s17 = scalar_lea.hbm %s12656_s7, 256 }
  0x5b   : > { %p11422_p13 = scmp.ne.s32.totalorder %s12656_s7, %s11421_s17  ;;  %p11428_p5 = scmp.lt.u32.totalorder %s11421_s17, %s12656_s7 }
  0x5d   : > { %p11424_p0 = pnand %p11422_p13, %p11835_p8 }
  0x5f   : > { %p11425_p2 = pneg %p11424_p0 }
  0x61   : > { %p11430_p7 = pnand %p11428_p5, %p11425_p2 }
  0x63   : > { %11433 = shalt.err (!%p11430_p7)
}
  0x64   : > { %s11434_s25 = scalar_lea.vmem %s369_s27, 256  ;;  %p11442_p11 = scmp.lt.s32.totalorder %s369_s27, %s369_s27 }
  0x65   : > { %p11435_p9 = scmp.ne.s32.totalorder %s369_s27, %s11434_s25  ;;  %p11443_p12 = scmp.lt.s32.totalorder %s11434_s25, %s11434_s25 }
  0x67   : > { %p11437_p4 = pnand %p11435_p9, %p11835_p8  ;;  %p11444_p1 = por %p11443_p12, %p11442_p11 }
  0x69   : > { %p11438_p10 = pneg %p11437_p4 }
  0x6b   : > { %p11445_p3 = pnand %p11444_p1, %p11438_p10 }
  0x6d   : > { %11448 = shalt.err (!%p11445_p3)
}
  0x6e   : > { %9841 = dma.hbm_to_vmem [thread:$0]  (!%p11819_p6), %s12656_s7, 256, %s369_s27, [#allocation17]  }
  0x6f   : > { %s11449_s30 = scalar_lea.hbm %s12651_s2, 20480 }
  0x70   : > { %p11450_p13 = scmp.ne.s32.totalorder %s12651_s2, %s11449_s30  ;;  %p11456_p3 = scmp.lt.u32.totalorder %s11449_s30, %s12651_s2 }
  0x72   : > { %p11452_p0 = pnand %p11450_p13, %p11835_p8 }
  0x74   : > { %p11453_p1 = pneg %p11452_p0 }
  0x76   : > { %p11458_p2 = pnand %p11456_p3, %p11453_p1 }
  0x78   : > { %11461 = shalt.err (!%p11458_p2)
}
  0x79   : > { %s11462_s18 = scalar_lea.vmem %s303_s29, 20480  ;;  %p11470_p4 = scmp.lt.s32.totalorder %s303_s29, %s303_s29 }
  0x7a   : > { %p11463_p5 = scmp.ne.s32.totalorder %s303_s29, %s11462_s18  ;;  %p11471_p10 = scmp.lt.s32.totalorder %s11462_s18, %s11462_s18 }
  0x7c   : > { %p11465_p7 = pnand %p11463_p5, %p11835_p8  ;;  %p11472_p11 = por %p11471_p10, %p11470_p4 }
  0x7e   : > { %p11466_p9 = pneg %p11465_p7 }
  0x80   : > { %p11473_p12 = pnand %p11472_p11, %p11466_p9 }
  0x82   : > { %11476 = shalt.err (!%p11473_p12)
}
  0x83   : > { %9826 = dma.hbm_to_vmem [thread:$0]  (!%p11819_p6), %s12651_s2, 20480, %s303_s29, [#allocation8], %s11710_s24, %s11710_s24, %s11711_s26  }
  0x84   : > { %s11714_s10 = smov [#allocation12]   ;;  %s11715_s1 = smov [#allocation15]  }
  0x85   : > { %s328_s20 = sshll.u32 %s11714_s10, 4  ;;  %s354_s28 = sshll.u32 %s11715_s1, 4  ;;  %s329_s20 = int_to_ptr.vmem [resolvable:$true] %s328_s20  ;;  %s355_s28 = int_to_ptr.vmem [resolvable:$true] %s354_s28 }
  0x86   : > { %s11477_s17 = scalar_lea.hbm %s12653_s4, 20480 }
  0x87   : > { %p11478_p13 = scmp.ne.s32.totalorder %s12653_s4, %s11477_s17  ;;  %p11484_p3 = scmp.lt.u32.totalorder %s11477_s17, %s12653_s4 }
  0x89   : > { %p11480_p0 = pnand %p11478_p13, %p11835_p8 }
  0x8b   : > { %p11481_p1 = pneg %p11480_p0 }
  0x8d   : > { %p11486_p2 = pnand %p11484_p3, %p11481_p1 }
  0x8f   : > { %11489 = shalt.err (!%p11486_p2)
}
  0x90   : > { %s11490_s29 = scalar_lea.vmem %s329_s20, 20480  ;;  %p11498_p4 = scmp.lt.s32.totalorder %s329_s20, %s329_s20 }
  0x91   : > { %p11491_p5 = scmp.ne.s32.totalorder %s329_s20, %s11490_s29  ;;  %p11499_p10 = scmp.lt.s32.totalorder %s11490_s29, %s11490_s29 }
  0x93   : > { %p11493_p7 = pnand %p11491_p5, %p11835_p8  ;;  %p11500_p11 = por %p11499_p10, %p11498_p4 }
  0x95   : > { %p11494_p9 = pneg %p11493_p7 }
  0x97   : > { %p11501_p12 = pnand %p11500_p11, %p11494_p9 }
  0x99   : > { %11504 = shalt.err (!%p11501_p12)
}
  0x9a   : > { %9832 = dma.hbm_to_vmem [thread:$0]  (!%p11819_p6), %s12653_s4, 20480, %s329_s20, [#allocation11], %s11710_s24, %s11710_s24, %s11711_s26  }
  0x9b   : > { %s11505_s12 = scalar_lea.hbm %s12655_s6, 20480 }
  0x9c   : > { %p11506_p13 = scmp.ne.s32.totalorder %s12655_s6, %s11505_s12  ;;  %p11512_p3 = scmp.lt.u32.totalorder %s11505_s12, %s12655_s6 }
  0x9e   : > { %p11508_p0 = pnand %p11506_p13, %p11835_p8 }
  0xa0   : > { %p11509_p1 = pneg %p11508_p0 }
  0xa2   : > { %p11514_p2 = pnand %p11512_p3, %p11509_p1 }
  0xa4   : > { %11517 = shalt.err (!%p11514_p2)
}
  0xa5   : > { %s11518_s27 = scalar_lea.vmem %s355_s28, 20480  ;;  %p11526_p4 = scmp.lt.s32.totalorder %s355_s28, %s355_s28 }
  0xa6   : > { %p11519_p5 = scmp.ne.s32.totalorder %s355_s28, %s11518_s27  ;;  %p11527_p10 = scmp.lt.s32.totalorder %s11518_s27, %s11518_s27 }
  0xa8   : > { %p11521_p7 = pnand %p11519_p5, %p11835_p8  ;;  %p11528_p11 = por %p11527_p10, %p11526_p4 }
  0xaa   : > { %p11522_p9 = pneg %p11521_p7 }
  0xac   : > { %p11529_p12 = pnand %p11528_p11, %p11522_p9 }
  0xae   : > { %11532 = shalt.err (!%p11529_p12)
}
  0xaf   : > { %9838 = dma.hbm_to_vmem [thread:$0]  (!%p11819_p6), %s12655_s6, 20480, %s355_s28, [#allocation14], %s11710_s24, %s11710_s24, %s11711_s26  }
  0xb0   : > { %s11716_s25 = smov [#allocation18]   ;;  %s11717_s1 = smov [#allocation19]  }
  0xb1   : > { %s379_s10 = sshll.u32 %s11716_s25, 4  ;;  %s389_s30 = sshll.u32 %s11717_s1, 4  ;;  %s380_s10 = int_to_ptr.vmem [resolvable:$true] %s379_s10  ;;  %s390_s30 = int_to_ptr.vmem [resolvable:$true] %s389_s30 }
  0xb2   : > { %s11533_s21 = scalar_lea.hbm %s12657_s8, 256 }
  0xb3   : > { %p11534_p13 = scmp.ne.s32.totalorder %s12657_s8, %s11533_s21  ;;  %p11540_p3 = scmp.lt.u32.totalorder %s11533_s21, %s12657_s8 }
  0xb5   : > { %p11536_p0 = pnand %p11534_p13, %p11835_p8 }
  0xb7   : > { %p11537_p1 = pneg %p11536_p0 }
  0xb9   : > { %p11542_p2 = pnand %p11540_p3, %p11537_p1 }
  0xbb   : > { %11545 = shalt.err (!%p11542_p2)
}
  0xbc   : > { %s11546_s24 = scalar_lea.vmem %s380_s10, 256  ;;  %p11554_p4 = scmp.lt.s32.totalorder %s380_s10, %s380_s10 }
  0xbd   : > { %p11547_p5 = scmp.ne.s32.totalorder %s380_s10, %s11546_s24  ;;  %p11555_p10 = scmp.lt.s32.totalorder %s11546_s24, %s11546_s24 }
  0xbf   : > { %p11549_p7 = pnand %p11547_p5, %p11835_p8  ;;  %p11556_p11 = por %p11555_p10, %p11554_p4 }
  0xc1   : > { %p11550_p9 = pneg %p11549_p7 }
  0xc3   : > { %p11557_p12 = pnand %p11556_p11, %p11550_p9 }
  0xc5   : > { %11560 = shalt.err (!%p11557_p12)
}
  0xc6   : > { %9844 = dma.hbm_to_vmem [thread:$0]  (!%p11819_p6), %s12657_s8, 256, %s380_s10, [#allocation17]  }
  0xc7   : > { %s11561_s1 = scalar_lea.hbm %s12658_s9, 128 }
  0xc8   : > { %p11562_p13 = scmp.ne.s32.totalorder %s12658_s9, %s11561_s1  ;;  %p11568_p3 = scmp.lt.u32.totalorder %s11561_s1, %s12658_s9 }
  0xca   : > { %p11564_p0 = pnand %p11562_p13, %p11835_p8 }
  0xcc   : > { %p11565_p1 = pneg %p11564_p0 }
  0xce   : > { %p11570_p2 = pnand %p11568_p3, %p11565_p1 }
  0xd0   : > { %11573 = shalt.err (!%p11570_p2)
}
  0xd1   : > { %s11574_s18 = scalar_lea.vmem %s390_s30, 128  ;;  %p11582_p4 = scmp.lt.s32.totalorder %s390_s30, %s390_s30 }
  0xd2   : > { %p11575_p5 = scmp.ne.s32.totalorder %s390_s30, %s11574_s18  ;;  %p11583_p10 = scmp.lt.s32.totalorder %s11574_s18, %s11574_s18 }
  0xd4   : > { %p11577_p7 = pnand %p11575_p5, %p11835_p8  ;;  %p11584_p11 = por %p11583_p10, %p11582_p4 }
  0xd6   : > { %p11578_p9 = pneg %p11577_p7 }
  0xd8   : > { %p11585_p12 = pnand %p11584_p11, %p11578_p9 }
  0xda   : > { %11588 = shalt.err (!%p11585_p12)
}
  0xdb   : > { %s11718_s10 = smov 64   ;;  %s11719_s11 = smov 4  }
  0xdc   : > { %9847 = dma.hbm_to_vmem [thread:$0]  (!%p11819_p6), %s12658_s9, 128, %s390_s30, [#allocation20], %s11718_s10, %s11718_s10, %s11719_s11  }
  0xdd   : > { %s8708_s24 = sadd.s32 4294967294, %s11705_s16   ;;  %s12030_s26 = sadd.s32 1, %s11705_s16  }
  0xde   : > { %s38_s28 = sadd.s32 1, %s11701_s15  ;;  %s35_s29 = ssub.s32 %s11705_s16, %s12030_s26 }
  0xdf   : > { %p45_p8 = scmp.ne.s32.totalorder %s11701_s15, %s11697_s14  ;;  %p36_p13 = scmp.eq.s32.totalorder %s35_s29, 0 }
  0xe0   : > { %p46_p0 = scmp.eq.s32.totalorder %s11705_s16, 0  ;;  %p51_p1 = scmp.ne.s32.totalorder %s11697_s14, %s11693_s13 }
  0xe1   : > { %p264_p3 = scmp.eq.s32.totalorder %s11803_s19, 1  ;;  %p12672_p5 = scmp.eq.s32.totalorder %s11803_s19, 0 }
  0xe2   : > { %s12042_s25 = scalar_select %p36_p13, %s11701_s15, %s38_s28  }
  0xe3   : > { %p47_p2 = por %p46_p0, %p45_p8  ;;  %p12046_p7 = por %p12672_p5, %p51_p1 }
  0xe4   : > { %p12050_p6 = por %p264_p3, %p45_p8  ;;  %p270_p9 = scmp.eq.s32.totalorder %s8708_s24, 1 }
  0xe5   : > { %p9865_p4 = scmp.lt.s32.totalorder %s11705_s16, 2  ;;  %s403_s1 = sand.u32 1, %s11701_s15  }
  0xe6   : > { %s12674_s30 = scalar_select %p12050_p6, 1, 0 }
  0xe7   : > { %p12056_p10 = por %p270_p9, %p51_p1  ;;  %s8720_s17 = sshll.u32 %s403_s1, 5 }
  0xe8   : > { %s9685_s21 = sshll.u32 %s11705_s16, 9  ;;  %s407_s11 = scalar_lea.vmem [#allocation4], %s8720_s17 }
  0xe9   : > { %s12675_s12 = scalar_select %p12056_p10, 1, 0 }
  0xea   : > { %s12064_s10 = scalar_lea.hbm %s12649_s0, %s9685_s21  ;;  %s415_s27 = sshll.u32 %s407_s11, 4  ;;  %s12070_s27 = int_to_ptr.vmem [resolvable:$true] %s415_s27 }
  0xeb   : > { %p12066_p11 = pnand %p9865_p4, %p47_p2  ;;  %s12072_s24 = scalar_lea.sflag [#allocation5], %s403_s1 }
  0xec   : > { %s11589_s28 = scalar_lea.hbm %s12064_s10, 512  ;;  %s11594_s21 = scalar_lea.hbm %s12649_s0, 1024 }
  0xed   : > { %p11590_p12 = scmp.ne.s32.totalorder %s12064_s10, %s11589_s28  ;;  %p11591_p8 = pneg %p12066_p11 }
  0xee   : > { %p11595_p1 = scmp.lt.u32.totalorder %s12064_s10, %s12649_s0  ;;  %p11596_p3 = scmp.lt.u32.totalorder %s11594_s21, %s11589_s28 }
  0xef   : > { %p11592_p13 = pnand %p11591_p8, %p11590_p12  ;;  %p11598_p5 = scmp.lt.u32.totalorder %s11589_s28, %s12064_s10 }
  0xf0   : > { %p11597_p2 = por %p11596_p3, %p11595_p1 }
  0xf1   : > { %p11593_p0 = pneg %p11592_p13 }
  0xf2   : > { %p11599_p9 = por %p11598_p5, %p11597_p2 }
  0xf4   : > { %p11600_p4 = pnand %p11599_p9, %p11593_p0 }
  0xf6   : > { %11603 = shalt.err (!%p11600_p4)
}
  0xf7   : > { %s11604_s1 = scalar_lea.vmem %s12070_s27, 512  ;;  %s11720_s11 = smov [#allocation4]  }
  0xf8   : > { %p11605_p12 = scmp.ne.s32.totalorder %s12070_s27, %s11604_s1  ;;  %s11609_s29 = sshll.u32 %s11720_s11, 4  ;;  %s11610_s29 = int_to_ptr.vmem [resolvable:$false] %s11609_s29 }
  0xf9   : > { %s11611_s17 = scalar_lea.vmem %s11610_s29, 1024  ;;  %p11612_p6 = scmp.lt.s32.totalorder %s12070_s27, %s11610_s29 }
  0xfa   : > { %p11607_p13 = pnand %p11605_p12, %p11591_p8  ;;  %p11613_p1 = scmp.lt.s32.totalorder %s11611_s17, %s11604_s1 }
  0xfc   : > { %p11608_p10 = pneg %p11607_p13  ;;  %p11614_p3 = por %p11613_p1, %p11612_p6 }
  0xfe   : > { %p11615_p2 = pnand %p11614_p3, %p11608_p10 }
 0x100   : > { %11618 = shalt.err (!%p11615_p2)
}
 0x101   : > { %s11721_s28 = smov 256   ;;  %s11722_s21 = smov 16  }
 0x102   : > { %9851 = dma.hbm_to_vmem [thread:$0]  (!%p12066_p11), %s12064_s10, 512, %s12070_s27, %s12072_s24, %s11721_s28, %s11721_s28, %s11722_s21  }
 0x103   : > { %s12677_s22 = sld [smem:[#allocation29_spill]] }
 0x109   : > { %p12678_p8 = scmp.ne.s32.totalorder %s12677_s22, 0 }
 0x10a   : > { %s12103_s18 = sand.u32 (!%p12678_p8), 1, %s11697_s14  }
 0x10b   : > { %427 = sbr.rel (%p12678_p8) target bundleno = 3425 (0xd61), region = 60  ;;  %s8725_s1 = sshll.u32 (!%p12678_p8), %s12103_s18, 5 }
 0x10c   : > { %s430_s11 = scalar_lea.sflag (!%p12678_p8), [#allocation5], %s12103_s18  ;;  %s12109_s29 = scalar_lea.vmem (!%p12678_p8), [#allocation4], %s8725_s1 }
 0x112   : > { %11664 = dma.done.wait (%p12046_p7), %s430_s11, 512  }
 0x113   : > { %11666 = vsyncadd (%p12046_p7), %s430_s11, 4294966784  ;;  %p12679_p6 = scmp.eq.s32.totalorder %s11803_s19, 0 }
 0x115   : > { %11668 = dma.done.wait (%p12679_p6), [#allocation8], 77824   ;;  %p12680_p10 = pmov %p12679_p6 }
 0x116   : > { %p12681_p11 = pmov %p12679_p6 }
 0x117   : > { %11670 = vsyncadd (%p12680_p10), [#allocation8], 4294889472 }
 0x118   : > { %11672 = dma.done.wait (%p12681_p11), [#allocation11], 40960   ;;  %p12682_p0 = pmov %p12679_p6 }
 0x11a   : > { %11674 = vsyncadd (%p12682_p0), [#allocation11], 4294926336  ;;  %p12683_p5 = pmov %p12682_p0 }
 0x11b   : > { %p12684_p9 = pmov %p12682_p0 }
 0x11c   : > { %11676 = dma.done.wait (%p12683_p5), [#allocation14], 40960  }
 0x11d   : > { %11678 = vsyncadd (%p12684_p9), [#allocation14], 4294926336  ;;  %p12685_p7 = pmov %p12682_p0 }
 0x11e   : > { %p12686_p4 = pmov %p12682_p0 }
 0x11f   : > { %11680 = dma.done.wait (%p12685_p7), [#allocation17], 512  }
 0x120   : > { %11682 = vsyncadd (%p12686_p4), [#allocation17], 4294966784  ;;  %p12687_p12 = pmov %p12682_p0 }
 0x121   : > { %p12688_p13 = pmov %p12682_p0 }
 0x122   : > { %11684 = dma.done.wait (%p12687_p12), [#allocation20], 128  }
 0x123   : > { %11686 = vsyncadd (%p12688_p13), [#allocation20], 4294967168  ;;  %v11723_v0 = vmov 0   ;;  %v9926_v1 = vld [vmem:[#allocation7 + $0x204] ss:$8 sps:$4 sm:$0xff]   ;;  %v511_v6 = vlaneseq  ;;  %vm784_vm5 = vcmask 1040384  }
 0x124   : > { %574 = vst [vmem:[#allocation3] sm:$0xff] %v11723_v0  ;;  %566 = vst [vmem:[#allocation2] sm:$0xff] %v11723_v0  ;;  %v9928_v2 = vld [vmem:[#allocation7 + $0x200] ss:$8 sps:$4 sm:$0xff]   ;;  %1121 = vmatprep.subr.bf16.mxu0 %v9926_v1  ;;  %v9929_v3 = vld [vmem:[#allocation7 + $0x214] ss:$8 sps:$4 sm:$0xff]  }
 0x125   : > { %567 = vst [vmem:[#allocation2 + $0x8] sm:$0xff] %v11723_v0  ;;  %568 = vst [vmem:[#allocation2 + $0x10] sm:$0xff] %v11723_v0  ;;  %1122 = vmatpush1.bf16.msra.mxu0 %v9928_v2  ;;  %v9931_v4 = vld [vmem:[#allocation7 + $0x210] ss:$8 sps:$4 sm:$0xff]   ;;  %v9932_v5 = vld [vmem:[#allocation7 + $0x224] ss:$8 sps:$4 sm:$0xff]  }
 0x126   : > { %569 = vst [vmem:[#allocation2 + $0x18] sm:$0xff] %v11723_v0  ;;  %570 = vst [vmem:[#allocation2 + $0x40] sm:$0xff] %v11723_v0  ;;  %1123 = vmatprep.subr.bf16.mxu0 %v9929_v3  ;;  %v9934_v7 = vld [vmem:[#allocation7 + $0x220] ss:$8 sps:$4 sm:$0xff]   ;;  %v9935_v8 = vld [vmem:[#allocation7 + $0x234] ss:$8 sps:$4 sm:$0xff]  }
 0x127   : > { %571 = vst [vmem:[#allocation2 + $0x48] sm:$0xff] %v11723_v0  ;;  %572 = vst [vmem:[#allocation2 + $0x50] sm:$0xff] %v11723_v0  ;;  %v12148_v9 = vshrl.u32 %v511_v6, 7  ;;  %v9937_v10 = vld [vmem:[#allocation7 + $0x230] ss:$8 sps:$4 sm:$0xff]   ;;  %s505_s23 = scalar_lea.vmem [#allocation21], %s8725_s1 }
 0x128   : > { %573 = vst [vmem:[#allocation2 + $0x58] sm:$0xff] %v11723_v0  ;;  %576 = vst [vmem:[#allocation3 + $0x10] sm:$0xff] %v11723_v0  ;;  %v9938_v11 = vld [vmem:[#allocation7 + $0x244] ss:$8 sps:$4 sm:$0xff]   ;;  %v9940_v13 = vld [vmem:[#allocation7 + $0x240] ss:$8 sps:$4 sm:$0xff]  }
 0x129   : > { %577 = vst [vmem:[#allocation3 + $0x18] sm:$0xff] %v11723_v0  ;;  %578 = vst [vmem:[#allocation3 + $0x30] sm:$0xff] %v11723_v0  ;;  %1124 = vmatpush1.bf16.msra.mxu0 %v9931_v4  ;;  %v513_v12 = vadd.s32 8, %v12148_v9  ;;  %v9941_v14 = vld [vmem:[#allocation7 + $0x254] ss:$8 sps:$4 sm:$0xff]   ;;  %v12152_v15 = vand.u32 7, %v12148_v9 }
 0x12a   : > { %579 = vst [vmem:[#allocation3 + $0x38] sm:$0xff] %v11723_v0  ;;  %1125 = vmatprep.subr.bf16.mxu0 %v9932_v5  ;;  %v9943_v17 = vld [vmem:[#allocation7 + $0x250] ss:$8 sps:$4 sm:$0xff]   ;;  %v9944_v18 = vld [vmem:[#allocation7 + $0x264] ss:$8 sps:$4 sm:$0xff]   ;;  %s8549_s10 = sshll.u32 %s505_s23, 4  ;;  %s12600_s10 = int_to_ptr.vmem [resolvable:$true] %s8549_s10 }
 0x12b   : > { %v12154_v16 = vand.u32 7, %v513_v12  ;;  %vm688_vm0 = vcmp.ge.s32.totalorder %v12152_v15, 2  ;;  %v9974_v19 = vld [vmem:[%s12109_s29 + $0x4] ss:$16 sps:$4 sm:$0xff]   ;;  %v9946_v20 = vld [vmem:[#allocation7 + $0x260] ss:$8 sps:$4 sm:$0xff]  }
 0x12c   : > { %v9947_v21 = vld [vmem:[#allocation7 + $0x274] ss:$8 sps:$4 sm:$0xff]   ;;  %563 = vst [vmem:[#allocation2 + $0x28] sm:$0xff] %v9974_v19  ;;  %vm694_vm2 = vmpackc.low %vm688_vm0, %vm688_vm0  ;;  %v9979_v23 = vld [vmem:[%s12109_s29] ss:$16 sps:$4 sm:$0xff]   ;;  %vm590_vm6 = vcmp.ge.s32.totalorder %v12152_v15, 3 }
 0x12d   : > { %1126 = vmatpush1.bf16.msra.mxu0 %v9934_v7  ;;  %vm689_vm1 = vcmp.ge.s32.totalorder %v12154_v16, 2  ;;  %v696_v22 = vsel %vm694_vm2, 65537, %v11723_v0  ;;  %v9949_v25 = vld [vmem:[#allocation7 + $0x270] ss:$8 sps:$4 sm:$0xff]   ;;  %562 = vst [vmem:[#allocation2 + $0x20] sm:$0xff] %v9979_v23  ;;  %vm591_vm7 = vcmp.ge.s32.totalorder %v12154_v16, 3  ;;  %vm596_vm8 = vmpackc.low %vm590_vm6, %vm590_vm6 }
 0x12e   : > { %1127 = vmatprep.subr.bf16.mxu0 %v9935_v8  ;;  %vm695_vm3 = vmpackc.low %vm689_vm1, %vm689_vm1  ;;  %v9950_v27 = vld [vmem:[#allocation7 + $0x284] ss:$8 sps:$4 sm:$0xff]   ;;  %v685_v28 = vld [vmem:[#allocation2 + $0x8] sm:$0x80]  ;;  %vm1207_vm11 = vsmask.f32 1280 }
 0x12f   : > { %v697_v24 = vsel %vm695_vm3, 65537, %v11723_v0  ;;  %v9952_v30 = vld [vmem:[#allocation7 + $0x280] ss:$8 sps:$4 sm:$0xff]   ;;  %v9953_v32 = vld [vmem:[#allocation7 + $0x294] ss:$8 sps:$4 sm:$0xff]   ;;  %vm597_vm9 = vmpackc.low %vm591_vm7, %vm591_vm7  ;;  %vm1690_vm12 = vcmp.ge.s32.totalorder %v12152_v15, 1 }
 0x130   : > { %v8741_v26 = vcombine.low %v696_v22, %v697_v24  ;;  %v9955_v37 = vld [vmem:[#allocation7 + $0x290] ss:$8 sps:$4 sm:$0xff]   ;;  %v9956_v39 = vld [vmem:[#allocation7 + $0x2a4] ss:$8 sps:$4 sm:$0xff]   ;;  %v9958_v40 = vld [vmem:[#allocation7 + $0x2a0] ss:$8 sps:$4 sm:$0xff]  }
 0x131   : > { %1128 = vmatpush1.bf16.msra.mxu0 %v9937_v10  ;;  %v9959_v41 = vld [vmem:[#allocation7 + $0x2b4] ss:$8 sps:$4 sm:$0xff]   ;;  %v9961_v42 = vld [vmem:[#allocation7 + $0x2b0] ss:$8 sps:$4 sm:$0xff]   ;;  %v9962_v43 = vld [vmem:[#allocation7 + $0x2c4] ss:$8 sps:$4 sm:$0xff]  }
 0x132   : > { %1129 = vmatprep.subr.bf16.mxu0 %v9938_v11  ;;  %v12162_v29 = vrot.slane %v8741_v26, 1  ;;  %v9964_v44 = vld [vmem:[#allocation7 + $0x2c0] ss:$8 sps:$4 sm:$0xff]   ;;  %v9965_v45 = vld [vmem:[#allocation7 + $0x2d4] ss:$8 sps:$4 sm:$0xff]   ;;  %v598_v22 = vsel %vm596_vm8, 65537, %v11723_v0  ;;  %vm12234_vm14 = vmpackc.low %vm1690_vm12, %vm1690_vm12 }
 0x133   : > { %v12164_v31 = vld [vmem:[#allocation2 + $0x28] sm:$0x7f]  ;;  %v9968_v48 = vld [vmem:[#allocation7 + $0x2e4] ss:$8 sps:$4 sm:$0xff]   ;;  %v684_v49 = vld [vmem:[#allocation2] sm:$0x80] }
 0x134   : > { %vm702_vm4 = vcmp.ne.s16.totalorder %v12162_v29, 0  ;;  %v9967_v46 = vld [vmem:[#allocation7 + $0x2d0] ss:$8 sps:$4 sm:$0xff]   ;;  %v10025_v47 = vld [vmem:[%s12109_s29 + $0xc] ss:$16 sps:$4 sm:$0xff]   ;;  %v599_v23 = vsel %vm597_vm9, 65537, %v11723_v0 }
 0x135   : > { %1130 = vmatpush1.bf16.msra.mxu0 %v9940_v13  ;;  %v704_v33 = vsel %vm702_vm4, %v685_v28, 0  ;;  %v708_v34 = vsel %vm702_vm4, %v12164_v31, 0  ;;  %v12174_v50 = vld [vmem:[#allocation2 + $0x20] sm:$0x7f]  ;;  %565 = vst [vmem:[#allocation2 + $0x38] sm:$0xff] %v10025_v47  ;;  %v703_v55 = vsel %vm702_vm4, %v684_v49, 0  ;;  %v8740_v26 = vcombine.low %v598_v22, %v599_v23 }
 0x136   : > { %1131 = vmatprep.subr.bf16.mxu0 %v9941_v14  ;;  %v788_v35 = vrot.slane %v704_v33, 7  ;;  %v789_v36 = vrot.slane %v708_v34, 7  ;;  %v10030_v51 = vld [vmem:[%s12109_s29 + $0x8] ss:$16 sps:$4 sm:$0xff]   ;;  %v687_v52 = vld [vmem:[#allocation2 + $0x18] sm:$0x80] }
 0x137   : > { %v9970_v53 = vld [vmem:[#allocation7 + $0x2e0] ss:$8 sps:$4 sm:$0xff]   ;;  %564 = vst [vmem:[#allocation2 + $0x30] sm:$0xff] %v10030_v51  ;;  %v9971_v54 = vld [vmem:[#allocation7 + $0x2f4] ss:$8 sps:$4 sm:$0xff]   ;;  %v707_v56 = vsel %vm702_vm4, %v12174_v50, 0 }
 0x138   : > { %v790_v38 = vsel %vm784_vm5, %v788_v35, %v789_v36  ;;  %v706_v57 = vsel %vm702_vm4, %v687_v52, 0  ;;  %v9973_v58 = vld [vmem:[#allocation7 + $0x2f0] ss:$8 sps:$4 sm:$0xff]   ;;  %v785_v59 = vrot.slane %v703_v55, 7  ;;  %v786_v60 = vrot.slane %v707_v56, 7  ;;  %s9687_s27 = sshll.u32 %s11803_s19, 9 }
 0x139   : > { %1132 = vmatpush1.bf16.msra.mxu0 %v9943_v17  ;;  %1153 = vmatprep.mubr.bf16.mxu0 %v790_v38  ;;  %v9978_v61 = vld [vmem:[#allocation7 + $0x304] ss:$8 sps:$4 sm:$0xff]   ;;  %v794_v63 = vrot.slane %v706_v57, 7  ;;  %v9976_v3 = vld [vmem:[#allocation7 + $0x300] ss:$8 sps:$4 sm:$0xff]   ;;  %vm1691_vm13 = vcmp.ge.s32.totalorder %v12154_v16, 1 }
 0x13a   : > { %1133 = vmatprep.subr.bf16.mxu0 %v9944_v18  ;;  %v787_v4 = vsel %vm784_vm5, %v785_v59, %v786_v60  ;;  %v9982_v5 = vld [vmem:[#allocation7 + $0x314] ss:$8 sps:$4 sm:$0xff]   ;;  %v9980_v7 = vld [vmem:[#allocation7 + $0x310] ss:$8 sps:$4 sm:$0xff]   ;;  %v9985_v8 = vld [vmem:[#allocation7 + $0x324] ss:$8 sps:$4 sm:$0xff]  }
 0x13b   : > { %v9983_v10 = vld [vmem:[#allocation7 + $0x320] ss:$8 sps:$4 sm:$0xff]   ;;  %v9988_v11 = vld [vmem:[#allocation7 + $0x334] ss:$8 sps:$4 sm:$0xff]   ;;  %v9986_v12 = vld [vmem:[#allocation7 + $0x330] ss:$8 sps:$4 sm:$0xff]  }
 0x13c   : > { %v12184_v62 = vld [vmem:[#allocation2 + $0x38] sm:$0x7f]  ;;  %v9994_v17 = vld [vmem:[#allocation7 + $0x354] ss:$8 sps:$4 sm:$0xff]   ;;  %v9992_v18 = vld [vmem:[#allocation7 + $0x350] ss:$8 sps:$4 sm:$0xff]  }
 0x13d   : > { %1134 = vmatpush1.bf16.msra.mxu0 %v9946_v20  ;;  %v710_v1 = vsel %vm702_vm4, %v12184_v62, 0  ;;  %v9991_v13 = vld [vmem:[#allocation7 + $0x344] ss:$8 sps:$4 sm:$0xff]   ;;  %v9989_v14 = vld [vmem:[#allocation7 + $0x340] ss:$8 sps:$4 sm:$0xff]   ;;  %vm12238_vm15 = vmpackc.low %vm1691_vm13, %vm1691_vm13  ;;  %vm2731_vm3 = vcmp.lt.s32.totalorder %v12152_v15, 7 }
 0x13e   : > { %1135 = vmatprep.subr.bf16.mxu0 %v9947_v21  ;;  %v795_v2 = vrot.slane %v710_v1, 7  ;;  %v9997_v19 = vld [vmem:[#allocation7 + $0x364] ss:$8 sps:$4 sm:$0xff]   ;;  %v9995_v20 = vld [vmem:[#allocation7 + $0x360] ss:$8 sps:$4 sm:$0xff]   ;;  %vm2732_vm6 = vcmp.lt.s32.totalorder %v12154_v16, 7  ;;  %vm2737_vm7 = vmpackc.low %vm2731_vm3, %vm2731_vm3 }
 0x13f   : > { %v10000_v21 = vld [vmem:[#allocation7 + $0x374] ss:$8 sps:$4 sm:$0xff]   ;;  %v9998_v24 = vld [vmem:[#allocation7 + $0x370] ss:$8 sps:$4 sm:$0xff]   ;;  %v10009_v34 = vld [vmem:[#allocation7 + $0x3a4] ss:$8 sps:$4 sm:$0xff]  }
 0x140   : > { %v796_v6 = vsel %vm784_vm5, %v794_v63, %v795_v2  ;;  %v10006_v28 = vld [vmem:[#allocation7 + $0x394] ss:$8 sps:$4 sm:$0xff]   ;;  %v10004_v33 = vld [vmem:[#allocation7 + $0x390] ss:$8 sps:$4 sm:$0xff]   ;;  %v10021_v52 = vld [vmem:[#allocation7 + $0x3e4] ss:$8 sps:$4 sm:$0xff]  }
 0x141   : > { %1136 = vmatpush1.bf16.msra.mxu0 %v9949_v25  ;;  %v10003_v25 = vld [vmem:[#allocation7 + $0x384] ss:$8 sps:$4 sm:$0xff]   ;;  %v10012_v0 = vld [vmem:[#allocation7 + $0x3b4] ss:$8 sps:$4 sm:$0xff]   ;;  %v10019_v56 = vld [vmem:[#allocation7 + $0x3e0] ss:$8 sps:$4 sm:$0xff]  }
 0x142   : > { %1137 = vmatprep.subr.bf16.mxu0 %v9950_v27  ;;  %v10001_v27 = vld [vmem:[#allocation7 + $0x380] ss:$8 sps:$4 sm:$0xff]   ;;  %v10024_v59 = vld [vmem:[#allocation7 + $0x3f4] ss:$8 sps:$4 sm:$0xff]   ;;  %v10022_v2 = vld [vmem:[#allocation7 + $0x3f0] ss:$8 sps:$4 sm:$0xff]  }
 0x143   : > { %vm1785_vm2 = vsmask.f32 256  ;;  %vm2738_vm8 = vmpackc.low %vm2732_vm6, %vm2732_vm6  ;;  %vm3293_vm12 = vcmp.lt.s32.totalorder %v12152_v15, 6  ;;  %vm3294_vm13 = vcmp.lt.s32.totalorder %v12154_v16, 6  ;;  %vm3389_vm6 = vcmask 1046528   ;;  %s12705_s17 = sld [smem:[#allocation31_spill]] }
 0x144   : > { %s8535_s21 = scalar_lea.sflag [#allocation6], %s12103_s18  ;;  %s11619_s19 = scalar_lea.vmem %s12600_s10, 512 }
 0x145   : > { %1138 = vmatpush1.bf16.msra.mxu0 %v9952_v30  ;;  %v604_v30 = vshrl.u32 %v8740_v26, 16  ;;  %p11620_p1 = scmp.ne.s32.totalorder %s12600_s10, %s11619_s19  ;;  %p12706_p3 = scmp.ne.s32.totalorder %s12674_s30, 0 }
 0x146   : > { %1139 = vmatprep.subr.bf16.mxu0 %v9953_v32  ;;  %v607_v32 = vshll.u32 %v8740_v26, 16  ;;  %s11724_s22 = smov [#allocation21]  }
 0x147   : > { %v606_v35 = vrot.slane %v604_v30, 1  ;;  %p11621_p2 = pnand %p11620_p1, %p12706_p3  ;;  %s11623_s1 = sshll.u32 %s11724_s22, 4  ;;  %s11624_s1 = int_to_ptr.vmem [resolvable:$false] %s11623_s1 }
 0x148   : > { %v609_v36 = vrot.slane %v607_v32, 2  ;;  %v10033_v32 = vld [vmem:[#allocation7 + $0x14] ss:$8 sps:$4 sm:$0xff]   ;;  %s11625_s11 = scalar_lea.vmem %s11624_s1, 1024  ;;  %p11626_p6 = scmp.lt.s32.totalorder %s12600_s10, %s11624_s1 }
 0x149   : > { %1140 = vmatpush1.bf16.msra.mxu0 %v9955_v37  ;;  %v10007_v37 = vld [vmem:[#allocation7 + $0x3a0] ss:$8 sps:$4 sm:$0xff]   ;;  %s12605_s28 = scalar_lea.hbm %s12705_s17, %s9687_s27  ;;  %p11622_p8 = pneg %p11621_p2 }
 0x14a   : > { %1141 = vmatprep.subr.bf16.mxu0 %v9956_v39  ;;  %v610_v38 = vor.u32 %v609_v36, %v606_v35  ;;  %v10010_v39 = vld [vmem:[#allocation7 + $0x3b0] ss:$8 sps:$4 sm:$0xff]   ;;  %p11627_p10 = scmp.lt.s32.totalorder %s11625_s11, %s11619_s19 }
 0x14c   : > { %vm12195_vm10 = vcmp.ne.s16.totalorder %v610_v38, 0  ;;  %p11628_p11 = por %p11627_p10, %p11626_p6 }
 0x14d   : > { %1142 = vmatpush1.bf16.msra.mxu0 %v9958_v40  ;;  %v10015_v40 = vld [vmem:[#allocation7 + $0x3c4] ss:$8 sps:$4 sm:$0xff]  }
 0x14e   : > { %1143 = vmatprep.subr.bf16.mxu0 %v9959_v41  ;;  %v583_v41 = vld [vmem:[#allocation2 + $0x8] sm:$0xc0]  ;;  %p11629_p0 = pnand %p11628_p11, %p11622_p8 }
 0x14f   : > { %v613_v47 = vsel %vm12195_vm10, %v583_v41, 0  ;;  %v10031_v41 = vld [vmem:[#allocation7 + $0x10] ss:$8 sps:$4 sm:$0xff]  }
 0x150   : > { %v1229_v55 = vshll.u32 %v613_v47, 16 }
 0x151   : > { %1144 = vmatpush1.bf16.msra.mxu0 %v9961_v42  ;;  %v10078_v42 = vld [vmem:[#allocation7 + $0x104] ss:$8 sps:$4 sm:$0xff]  }
 0x152   : > { %1145 = vmatprep.subr.bf16.mxu0 %v9962_v43  ;;  %v617_v43 = vsel %vm12195_vm10, %v12164_v31, 0  ;;  %v1231_v63 = vrot.slane %v1229_v55, 7  ;;  %v10051_v55 = vld [vmem:[#allocation7 + $0x74] ss:$8 sps:$4 sm:$0xff]  }
 0x153   : > { %v1234_v49 = vshrl.u32 %v617_v43, 16  ;;  %v1237_v51 = vshll.u32 %v617_v43, 16  ;;  %v10036_v43 = vld [vmem:[#allocation7 + $0x24] ss:$8 sps:$4 sm:$0xff]  }
 0x155   : > { %1146 = vmatpush1.bf16.msra.mxu0 %v9964_v44  ;;  %v10013_v44 = vld [vmem:[#allocation7 + $0x3c0] ss:$8 sps:$4 sm:$0xff]   ;;  %v1236_v57 = vrot.slane %v1234_v49, 6 }
 0x156   : > { %1147 = vmatprep.subr.bf16.mxu0 %v9965_v45  ;;  %v10018_v45 = vld [vmem:[#allocation7 + $0x3d4] ss:$8 sps:$4 sm:$0xff]   ;;  %v10040_v49 = vld [vmem:[#allocation7 + $0x40] ss:$8 sps:$4 sm:$0xff]  }
 0x159   : > { %1148 = vmatpush1.bf16.msra.mxu0 %v9967_v46  ;;  %v686_v46 = vld [vmem:[#allocation2 + $0x10] sm:$0x80] }
 0x15a   : > { %1149 = vmatprep.subr.bf16.mxu0 %v9968_v48  ;;  %v10016_v48 = vld [vmem:[#allocation7 + $0x3d0] ss:$8 sps:$4 sm:$0xff]   ;;  %v705_v31 = vsel %vm702_vm4, %v686_v46, 0  ;;  %v10039_v46 = vld [vmem:[#allocation7 + $0x34] ss:$8 sps:$4 sm:$0xff]  }
 0x15b   : > { %v791_v1 = vrot.slane %v705_v31, 7  ;;  %v10054_v31 = vld [vmem:[#allocation7 + $0x84] ss:$8 sps:$4 sm:$0xff]  }
 0x15d   : > { %1150 = vmatpush1.bf16.msra.mxu0 %v9970_v53  ;;  %v588_v53 = vld [vmem:[#allocation2 + $0x30] sm:$0x7f] }
 0x15e   : > { %1151 = vmatprep.subr.bf16.mxu0 %v9971_v54  ;;  %v1226_v54 = vshrl.u32 %v613_v47, 16  ;;  %v709_v60 = vsel %vm702_vm4, %v588_v53, 0  ;;  %v10037_v47 = vld [vmem:[#allocation7 + $0x30] ss:$8 sps:$4 sm:$0xff]  }
 0x161   : > { %1152 = vmatpush1.bf16.msra.mxu0 %v9973_v58  ;;  %v1239_v58 = vrot.slane %v1237_v51, 7  ;;  %v10045_v51 = vld [vmem:[#allocation7 + $0x54] ss:$8 sps:$4 sm:$0xff]  }
 0x162   : > { %1164 = vmatprep.subr.bf16.mxu0 %v9978_v61  ;;  %v1228_v61 = vrot.slane %v1226_v54, 6  ;;  %v10046_v54 = vld [vmem:[#allocation7 + $0x60] ss:$8 sps:$4 sm:$0xff]  }
 0x164   : > { %1154 = vmatmul.mubr.bf16.vlgmr.msra.gmra.mrb[0].mxu0 %v787_v4  ;;  %v618_v4 = vsel %vm12195_vm10, %v588_v53, 0  ;;  %v10048_v53 = vld [vmem:[#allocation7 + $0x64] ss:$8 sps:$4 sm:$0xff]  }
 0x165   : > { %1165 = vmatpush1.bf16.msra.mxu0 %v9976_v3  ;;  %1196 = vmatprep.mubr.bf16.mxu0 %v796_v6  ;;  %v619_v3 = vsel %vm12195_vm10, %v12184_v62, 0  ;;  %v792_v6 = vrot.slane %v709_v60, 7  ;;  %v10060_v60 = vld [vmem:[#allocation7 + $0xa4] ss:$8 sps:$4 sm:$0xff]  }
 0x166   : > { %1166 = vmatprep.subr.bf16.mxu0 %v9982_v5  ;;  %v585_v5 = vld [vmem:[#allocation2 + $0x18] sm:$0xc0] }
 0x167   : > { %v793_v30 = vsel %vm784_vm5, %v791_v1, %v792_v6  ;;  %v10061_v1 = vld [vmem:[#allocation7 + $0xb0] ss:$8 sps:$4 sm:$0xff]   ;;  %v10069_v6 = vld [vmem:[#allocation7 + $0xd4] ss:$8 sps:$4 sm:$0xff]  }
 0x169   : > { %1167 = vmatpush1.bf16.msra.mxu0 %v9980_v7  ;;  %v1240_v7 = vor.u32 %v1239_v58, %v1236_v57  ;;  %v10052_v57 = vld [vmem:[#allocation7 + $0x80] ss:$8 sps:$4 sm:$0xff]   ;;  %v10057_v58 = vld [vmem:[#allocation7 + $0x94] ss:$8 sps:$4 sm:$0xff]  }
 0x16a   : > { %1168 = vmatprep.subr.bf16.mxu0 %v9985_v8  ;;  %v615_v8 = vsel %vm12195_vm10, %v585_v5, 0  ;;  %v10064_v5 = vld [vmem:[#allocation7 + $0xc0] ss:$8 sps:$4 sm:$0xff]  }
 0x16d   : > { %1169 = vmatpush1.bf16.msra.mxu0 %v9983_v10  ;;  %v584_v10 = vld [vmem:[#allocation2 + $0x10] sm:$0xc0] }
 0x16e   : > { %1170 = vmatprep.subr.bf16.mxu0 %v9988_v11  ;;  %v10029_v11 = vld [vmem:[#allocation7 + $0x4] ss:$8 sps:$4 sm:$0xff]   ;;  %v614_v62 = vsel %vm12195_vm10, %v584_v10, 0 }
 0x16f   : > { %v1243_v22 = vshrl.u32 %v614_v62, 16  ;;  %v1246_v23 = vshll.u32 %v614_v62, 16  ;;  %v10075_v62 = vld [vmem:[#allocation7 + $0xf4] ss:$8 sps:$4 sm:$0xff]  }
 0x171   : > { %1171 = vmatpush1.bf16.msra.mxu0 %v9986_v12  ;;  %v1232_v12 = vor.u32 %v1231_v63, %v1228_v61  ;;  %v1248_v35 = vrot.slane %v1246_v23, 7  ;;  %v10058_v61 = vld [vmem:[#allocation7 + $0xa0] ss:$8 sps:$4 sm:$0xff]   ;;  %v10063_v63 = vld [vmem:[#allocation7 + $0xb4] ss:$8 sps:$4 sm:$0xff]  }
 0x172   : > { %1172 = vmatprep.subr.bf16.mxu0 %v9991_v13  ;;  %v1260_v13 = vshrl.u32 %v615_v8, 16 }
 0x173   : > { %v1241_v36 = vsel %vm1207_vm11, %v1232_v12, %v1240_v7  ;;  %v10072_v12 = vld [vmem:[#allocation7 + $0xe4] ss:$8 sps:$4 sm:$0xff]  }
 0x175   : > { %1173 = vmatpush1.bf16.msra.mxu0 %v9989_v14  ;;  %v1263_v14 = vshll.u32 %v615_v8, 16  ;;  %v10067_v8 = vld [vmem:[#allocation7 + $0xd0] ss:$8 sps:$4 sm:$0xff]  }
 0x176   : > { %1174 = vmatprep.subr.bf16.mxu0 %v9994_v17  ;;  %v1268_v17 = vshrl.u32 %v619_v3, 16 }
 0x179   : > { %1175 = vmatpush1.bf16.msra.mxu0 %v9992_v18  ;;  %v1271_v18 = vshll.u32 %v619_v3, 16  ;;  %v582_v3 = vld [vmem:[#allocation2] sm:$0xc0] }
 0x17a   : > { %1176 = vmatprep.subr.bf16.mxu0 %v9997_v19  ;;  %v1251_v19 = vshrl.u32 %v618_v4, 16  ;;  %v612_v7 = vsel %vm12195_vm10, %v582_v3, 0 }
 0x17c   : > { %v1253_v26 = vrot.slane %v1251_v19, 6 }
 0x17d   : > { %1177 = vmatpush1.bf16.msra.mxu0 %v9995_v20  ;;  %v1262_v20 = vrot.slane %v1260_v13, 6  ;;  %v1209_v13 = vshrl.u32 %v612_v7, 16 }
 0x17e   : > { %1178 = vmatprep.subr.bf16.mxu0 %v10000_v21  ;;  %v1265_v21 = vrot.slane %v1263_v14, 7  ;;  %v1212_v14 = vshll.u32 %v612_v7, 16  ;;  %v11326_v7 = vld [vmem:[#allocation2 + $0x8] sm:$0x80] }
 0x180   : > { %v1214_v19 = vrot.slane %v1212_v14, 7 }
 0x181   : > { %1179 = vmatpush1.bf16.msra.mxu0 %v9998_v24  ;;  %v1270_v24 = vrot.slane %v1268_v17, 6  ;;  %v10070_v17 = vld [vmem:[#allocation7 + $0xe0] ss:$8 sps:$4 sm:$0xff]  }
 0x182   : > { %1180 = vmatprep.subr.bf16.mxu0 %v10003_v25  ;;  %v1273_v25 = vrot.slane %v1271_v18, 7 }
 0x185   : > { %1181 = vmatpush1.bf16.msra.mxu0 %v10001_v27  ;;  %v1254_v27 = vshll.u32 %v618_v4, 16  ;;  %v616_v4 = vsel %vm12195_vm10, %v12174_v50, 0  ;;  %v1211_v50 = vrot.slane %v1209_v13, 6 }
 0x186   : > { %1182 = vmatprep.subr.bf16.mxu0 %v10006_v28  ;;  %v10027_v28 = vld [vmem:[#allocation7] ss:$8 sps:$4 sm:$0xff]   ;;  %v1217_v10 = vshrl.u32 %v616_v4, 16 }
 0x188   : > { %v1219_v18 = vrot.slane %v1217_v10, 6  ;;  %v10118_v10 = vld [vmem:[#allocation7 + $0x1e0] ss:$8 sps:$4 sm:$0xff]  }
 0x189   : > { %1183 = vmatpush1.bf16.msra.mxu0 %v10004_v33  ;;  %v1266_v33 = vor.u32 %v1265_v21, %v1262_v20  ;;  %v10073_v21 = vld [vmem:[#allocation7 + $0xf0] ss:$8 sps:$4 sm:$0xff]  }
 0x18a   : > { %1184 = vmatprep.subr.bf16.mxu0 %v10009_v34  ;;  %v1245_v34 = vrot.slane %v1243_v22, 6  ;;  %v1215_v22 = vor.u32 %v1214_v19, %v1211_v50  ;;  %v10124_v19 = vld [vmem:[#allocation7 + $0x400] ss:$8 sps:$4 sm:$0xff]  }
 0x18c   : > { %v1249_v38 = vor.u32 %v1248_v35, %v1245_v34  ;;  %v10090_v34 = vld [vmem:[#allocation7 + $0x144] ss:$8 sps:$4 sm:$0xff]  }
 0x18d   : > { %1185 = vmatpush1.bf16.msra.mxu0 %v10007_v37  ;;  %v1274_v37 = vor.u32 %v1273_v25, %v1270_v24  ;;  %v10076_v24 = vld [vmem:[#allocation7 + $0x100] ss:$8 sps:$4 sm:$0xff]   ;;  %v10150_v35 = vld [vmem:[#allocation7 + $0x484] ss:$8 sps:$4 sm:$0xff]  }
 0x18e   : > { %1186 = vmatprep.subr.bf16.mxu0 %v10012_v0  ;;  %v1256_v0 = vrot.slane %v1254_v27, 7  ;;  %v10079_v27 = vld [vmem:[#allocation7 + $0x110] ss:$8 sps:$4 sm:$0xff]  }
 0x191   : > { %1187 = vmatpush1.bf16.msra.mxu0 %v10010_v39  ;;  %v12220_v39 = vsel %vm1207_vm11, %v1266_v33, %v1274_v37  ;;  %v10085_v33 = vld [vmem:[#allocation7 + $0x130] ss:$8 sps:$4 sm:$0xff]   ;;  %v10093_v37 = vld [vmem:[#allocation7 + $0x154] ss:$8 sps:$4 sm:$0xff]  }
 0x192   : > { %1188 = vmatprep.subr.bf16.mxu0 %v10015_v40  ;;  %v1257_v40 = vor.u32 %v1256_v0, %v1253_v26  ;;  %v10081_v26 = vld [vmem:[#allocation7 + $0x114] ss:$8 sps:$4 sm:$0xff]   ;;  %v10151_v0 = vld [vmem:[#allocation7 + $0x490] ss:$8 sps:$4 sm:$0xff]  }
 0x195   : > { %1189 = vmatpush1.bf16.msra.mxu0 %v10013_v44  ;;  %v12223_v44 = vsel %vm1207_vm11, %v1249_v38, %v1257_v40  ;;  %v10091_v38 = vld [vmem:[#allocation7 + $0x150] ss:$8 sps:$4 sm:$0xff]   ;;  %v10094_v40 = vld [vmem:[#allocation7 + $0x160] ss:$8 sps:$4 sm:$0xff]  }
 0x196   : > { %1190 = vmatprep.subr.bf16.mxu0 %v10018_v45  ;;  %v10034_v45 = vld [vmem:[#allocation7 + $0x20] ss:$8 sps:$4 sm:$0xff]  }
 0x199   : > { %1191 = vmatpush1.bf16.msra.mxu0 %v10016_v48  ;;  %v10042_v48 = vld [vmem:[#allocation7 + $0x44] ss:$8 sps:$4 sm:$0xff]  }
 0x19a   : > { %1192 = vmatprep.subr.bf16.mxu0 %v10021_v52  ;;  %v10043_v52 = vld [vmem:[#allocation7 + $0x50] ss:$8 sps:$4 sm:$0xff]  }
 0x19d   : > { %1193 = vmatpush1.bf16.msra.mxu0 %v10019_v56  ;;  %v10049_v56 = vld [vmem:[#allocation7 + $0x70] ss:$8 sps:$4 sm:$0xff]  }
 0x19e   : > { %1194 = vmatprep.subr.bf16.mxu0 %v10024_v59  ;;  %v10055_v59 = vld [vmem:[#allocation7 + $0x90] ss:$8 sps:$4 sm:$0xff]  }
 0x1a1   : > { %1195 = vmatpush1.bf16.msra.mxu0 %v10022_v2  ;;  %v10066_v2 = vld [vmem:[#allocation7 + $0xc4] ss:$8 sps:$4 sm:$0xff]  }
 0x1a2   : > { %1600 = vmatprep.subr.bf16.mxu0 %v10029_v11  ;;  %v1220_v11 = vshll.u32 %v616_v4, 16  ;;  %v10115_v4 = vld [vmem:[#allocation7 + $0x1d0] ss:$8 sps:$4 sm:$0xff]  }
 0x1a4   : > { %1197 = vmatmul.mubr.bf16.vlgmr.msra.gmra.mrb[0].mxu0 %v793_v30  ;;  %v1222_v20 = vrot.slane %v1220_v11, 7  ;;  %v10082_v30 = vld [vmem:[#allocation7 + $0x120] ss:$8 sps:$4 sm:$0xff]   ;;  %v10123_v11 = vld [vmem:[#allocation7 + $0x1f4] ss:$8 sps:$4 sm:$0xff]  }
 0x1a5   : > { %1601 = vmatpush1.bf16.msra.mxu0 %v10027_v28  ;;  %1632 = vmatprep.mubr.bf16.mxu0 %v1241_v36  ;;  %v10084_v28 = vld [vmem:[#allocation7 + $0x124] ss:$8 sps:$4 sm:$0xff]   ;;  %v10088_v36 = vld [vmem:[#allocation7 + $0x140] ss:$8 sps:$4 sm:$0xff]  }
 0x1a6   : > { %1602 = vmatprep.subr.bf16.mxu0 %v10033_v32  ;;  %v1223_v23 = vor.u32 %v1222_v20, %v1219_v18  ;;  %v10087_v32 = vld [vmem:[#allocation7 + $0x134] ss:$8 sps:$4 sm:$0xff]   ;;  %v10126_v18 = vld [vmem:[#allocation7 + $0x404] ss:$8 sps:$4 sm:$0xff]  }
 0x1a7   : > { %v10129_v20 = vld [vmem:[#allocation7 + $0x414] ss:$8 sps:$4 sm:$0xff]  }
 0x1a8   : > { %v1224_v25 = vsel %vm1207_vm11, %v1215_v22, %v1223_v23  ;;  %v10132_v22 = vld [vmem:[#allocation7 + $0x424] ss:$8 sps:$4 sm:$0xff]   ;;  %v10130_v23 = vld [vmem:[#allocation7 + $0x420] ss:$8 sps:$4 sm:$0xff]   ;;  %vm2826_vm11 = vsmask.f32 7424 }
 0x1a9   : > { %1603 = vmatpush1.bf16.msra.mxu0 %v10031_v41  ;;  %v10099_v41 = vld [vmem:[#allocation7 + $0x174] ss:$8 sps:$4 sm:$0xff]  }
 0x1aa   : > { %1604 = vmatprep.subr.bf16.mxu0 %v10036_v43  ;;  %v11325_v43 = vld [vmem:[#allocation3] sm:$0xff] }
 0x1ad   : > { %1605 = vmatpush1.bf16.msra.mxu0 %v10034_v45  ;;  %v1698_v45 = vsel %vm12234_vm14, 65537, %v11325_v43  ;;  %vm3299_vm14 = vmpackc.low %vm3293_vm12, %vm3293_vm12 }
 0x1ae   : > { %1606 = vmatprep.subr.bf16.mxu0 %v10039_v46  ;;  %v1699_v46 = vsel %vm12238_vm15, 65537, %v11325_v43  ;;  %v10162_v43 = vld [vmem:[#allocation7 + $0x4c4] ss:$8 sps:$4 sm:$0xff]   ;;  %vm3300_vm15 = vmpackc.low %vm3294_vm13, %vm3294_vm13 }
 0x1b1   : > { %1607 = vmatpush1.bf16.msra.mxu0 %v10037_v47  ;;  %v10097_v47 = vld [vmem:[#allocation7 + $0x170] ss:$8 sps:$4 sm:$0xff]  }
 0x1b2   : > { %1608 = vmatprep.subr.bf16.mxu0 %v10042_v48  ;;  %v10102_v48 = vld [vmem:[#allocation7 + $0x184] ss:$8 sps:$4 sm:$0xff]  }
 0x1b5   : > { %1609 = vmatpush1.bf16.msra.mxu0 %v10040_v49  ;;  %v8870_v49 = vcombine.low %v1698_v45, %v1699_v46  ;;  %v10160_v45 = vld [vmem:[#allocation7 + $0x4c0] ss:$8 sps:$4 sm:$0xff]   ;;  %v10165_v46 = vld [vmem:[#allocation7 + $0x4d4] ss:$8 sps:$4 sm:$0xff]  }
 0x1b6   : > { %1610 = vmatprep.subr.bf16.mxu0 %v10045_v51  ;;  %v10100_v51 = vld [vmem:[#allocation7 + $0x180] ss:$8 sps:$4 sm:$0xff]  }
 0x1b9   : > { %1611 = vmatpush1.bf16.msra.mxu0 %v10043_v52  ;;  %v10105_v52 = vld [vmem:[#allocation7 + $0x194] ss:$8 sps:$4 sm:$0xff]  }
 0x1ba   : > { %1612 = vmatprep.subr.bf16.mxu0 %v10048_v53  ;;  %v1704_v53 = vshll.u32 %v8870_v49, 16 }
 0x1bd   : > { %1613 = vmatpush1.bf16.msra.mxu0 %v10046_v54  ;;  %v10103_v54 = vld [vmem:[#allocation7 + $0x190] ss:$8 sps:$4 sm:$0xff]  }
 0x1be   : > { %1614 = vmatprep.subr.bf16.mxu0 %v10051_v55  ;;  %v10108_v55 = vld [vmem:[#allocation7 + $0x1a4] ss:$8 sps:$4 sm:$0xff]  }
 0x1c1   : > { %1615 = vmatpush1.bf16.msra.mxu0 %v10049_v56  ;;  %v12246_v56 = vrot.slane %v1704_v53, 1  ;;  %v10168_v53 = vld [vmem:[#allocation7 + $0x4e4] ss:$8 sps:$4 sm:$0xff]  }
 0x1c2   : > { %1616 = vmatprep.subr.bf16.mxu0 %v10054_v31  ;;  %v1707_v31 = vshrl.u32 %v8870_v49, 16  ;;  %v12264_v49 = vld [vmem:[#allocation2 + $0x38] sm:$0xff] }
 0x1c3   : > { %vm1710_vm1 = vcmp.ne.s16.totalorder %v12246_v56, 0 }
 0x1c5   : > { %1617 = vmatpush1.bf16.msra.mxu0 %v10052_v57  ;;  %v10106_v57 = vld [vmem:[#allocation7 + $0x1a0] ss:$8 sps:$4 sm:$0xff]  }
 0x1c6   : > { %1618 = vmatprep.subr.bf16.mxu0 %v10057_v58  ;;  %v10111_v58 = vld [vmem:[#allocation7 + $0x1b4] ss:$8 sps:$4 sm:$0xff]  }
 0x1c9   : > { %1619 = vmatpush1.bf16.msra.mxu0 %v10055_v59  ;;  %v12249_v59 = vor.u32 %v1707_v31, %v12246_v56 }
 0x1ca   : > { %1620 = vmatprep.subr.bf16.mxu0 %v10060_v60  ;;  %v10109_v60 = vld [vmem:[#allocation7 + $0x1b0] ss:$8 sps:$4 sm:$0xff]  }
 0x1cb   : > { %vm1711_vm0 = vcmp.ne.s16.totalorder %v12249_v59, 0 }
 0x1cd   : > { %1621 = vmatpush1.bf16.msra.mxu0 %v10058_v61  ;;  %v10114_v61 = vld [vmem:[#allocation7 + $0x1c4] ss:$8 sps:$4 sm:$0xff]  }
 0x1ce   : > { %1622 = vmatprep.subr.bf16.mxu0 %v10063_v63  ;;  %v1687_v63 = vld [vmem:[#allocation2 + $0x28] sm:$0xff] }
 0x1cf   : > { %v1717_v3 = vsel %vm1711_vm0, %v1687_v63, 0  ;;  %v10171_v63 = vld [vmem:[#allocation7 + $0x4f4] ss:$8 sps:$4 sm:$0xff]  }
 0x1d0   : > { %v1806_v14 = vshll.u32 %v1717_v3, 16 }
 0x1d1   : > { %1623 = vmatpush1.bf16.msra.mxu0 %v10061_v1  ;;  %v10112_v1 = vld [vmem:[#allocation7 + $0x1c0] ss:$8 sps:$4 sm:$0xff]  }
 0x1d2   : > { %1624 = vmatprep.subr.bf16.mxu0 %v10066_v2  ;;  %v10117_v2 = vld [vmem:[#allocation7 + $0x1d4] ss:$8 sps:$4 sm:$0xff]  }
 0x1d5   : > { %1625 = vmatpush1.bf16.msra.mxu0 %v10064_v5  ;;  %v10120_v5 = vld [vmem:[#allocation7 + $0x1e4] ss:$8 sps:$4 sm:$0xff]  }
 0x1d6   : > { %1626 = vmatprep.subr.bf16.mxu0 %v10069_v6  ;;  %v1803_v6 = vshrl.u32 %v1717_v3, 16 }
 0x1d8   : > { %v1805_v13 = vrot.slane %v1803_v6, 7 }
 0x1d9   : > { %1627 = vmatpush1.bf16.msra.mxu0 %v10067_v8  ;;  %v1713_v8 = vsel %vm1710_vm1, %v11326_v7, 0  ;;  %v10169_v7 = vld [vmem:[#allocation7 + $0x4f0] ss:$8 sps:$4 sm:$0xff]  }
 0x1da   : > { %1628 = vmatprep.subr.bf16.mxu0 %v10072_v12  ;;  %v1799_v12 = vshrl.u32 %v1713_v8, 16  ;;  %v1808_v50 = vor.u32 %v1806_v14, %v1805_v13  ;;  %v10174_v8 = vld [vmem:[#allocation7 + $0x504] ss:$8 sps:$4 sm:$0xff]   ;;  %v10172_v14 = vld [vmem:[#allocation7 + $0x500] ss:$8 sps:$4 sm:$0xff]  }
 0x1dd   : > { %1629 = vmatpush1.bf16.msra.mxu0 %v10070_v17  ;;  %v10121_v17 = vld [vmem:[#allocation7 + $0x1f0] ss:$8 sps:$4 sm:$0xff]  }
 0x1de   : > { %1630 = vmatprep.subr.bf16.mxu0 %v10075_v62  ;;  %v1801_v62 = vrot.slane %v1799_v12, 7 }
 0x1e1   : > { %1631 = vmatpush1.bf16.msra.mxu0 %v10073_v21  ;;  %v1809_v21 = vsel %vm1785_vm2, %v1801_v62, %v1808_v50  ;;  %v10175_v50 = vld [vmem:[#allocation7 + $0x510] ss:$8 sps:$4 sm:$0xff]  }
 0x1e2   : > { %1643 = vmatprep.subr.bf16.mxu0 %v10078_v42  ;;  %v10127_v42 = vld [vmem:[#allocation7 + $0x410] ss:$8 sps:$4 sm:$0xff]  }
 0x1e4   : > { %1633 = vmatmul.mubr.bf16.vlgmr.msra.gmra.mrb[0].mxu0 %v1224_v25  ;;  %v10133_v25 = vld [vmem:[#allocation7 + $0x430] ss:$8 sps:$4 sm:$0xff]  }
 0x1e5   : > { %1644 = vmatpush1.bf16.msra.mxu0 %v10076_v24  ;;  %1675 = vmatprep.mubr.bf16.mxu0 %v12220_v39  ;;  %v10096_v39 = vld [vmem:[#allocation7 + $0x164] ss:$8 sps:$4 sm:$0xff]   ;;  %v10135_v24 = vld [vmem:[#allocation7 + $0x434] ss:$8 sps:$4 sm:$0xff]  }
 0x1e6   : > { %1645 = vmatprep.subr.bf16.mxu0 %v10081_v26  ;;  %v10138_v26 = vld [vmem:[#allocation7 + $0x444] ss:$8 sps:$4 sm:$0xff]  }
 0x1e9   : > { %1646 = vmatpush1.bf16.msra.mxu0 %v10079_v27  ;;  %v10136_v27 = vld [vmem:[#allocation7 + $0x440] ss:$8 sps:$4 sm:$0xff]  }
 0x1ea   : > { %1647 = vmatprep.subr.bf16.mxu0 %v10084_v28  ;;  %v10141_v28 = vld [vmem:[#allocation7 + $0x454] ss:$8 sps:$4 sm:$0xff]  }
 0x1ed   : > { %1648 = vmatpush1.bf16.msra.mxu0 %v10082_v30  ;;  %v10139_v30 = vld [vmem:[#allocation7 + $0x450] ss:$8 sps:$4 sm:$0xff]  }
 0x1ee   : > { %1649 = vmatprep.subr.bf16.mxu0 %v10087_v32  ;;  %v10142_v32 = vld [vmem:[#allocation7 + $0x460] ss:$8 sps:$4 sm:$0xff]  }
 0x1f1   : > { %1650 = vmatpush1.bf16.msra.mxu0 %v10085_v33  ;;  %v10147_v33 = vld [vmem:[#allocation7 + $0x474] ss:$8 sps:$4 sm:$0xff]  }
 0x1f2   : > { %1651 = vmatprep.subr.bf16.mxu0 %v10090_v34  ;;  %v10145_v34 = vld [vmem:[#allocation7 + $0x470] ss:$8 sps:$4 sm:$0xff]  }
 0x1f5   : > { %1652 = vmatpush1.bf16.msra.mxu0 %v10088_v36  ;;  %v10148_v36 = vld [vmem:[#allocation7 + $0x480] ss:$8 sps:$4 sm:$0xff]  }
 0x1f6   : > { %1653 = vmatprep.subr.bf16.mxu0 %v10093_v37  ;;  %v10153_v37 = vld [vmem:[#allocation7 + $0x494] ss:$8 sps:$4 sm:$0xff]  }
 0x1f9   : > { %1654 = vmatpush1.bf16.msra.mxu0 %v10091_v38  ;;  %v10156_v38 = vld [vmem:[#allocation7 + $0x4a4] ss:$8 sps:$4 sm:$0xff]  }
 0x1fa   : > { %1655 = vmatprep.subr.bf16.mxu0 %v10096_v39  ;;  %v10154_v39 = vld [vmem:[#allocation7 + $0x4a0] ss:$8 sps:$4 sm:$0xff]  }
 0x1fd   : > { %1656 = vmatpush1.bf16.msra.mxu0 %v10094_v40  ;;  %v10159_v40 = vld [vmem:[#allocation7 + $0x4b4] ss:$8 sps:$4 sm:$0xff]  }
 0x1fe   : > { %1657 = vmatprep.subr.bf16.mxu0 %v10099_v41  ;;  %v10157_v41 = vld [vmem:[#allocation7 + $0x4b0] ss:$8 sps:$4 sm:$0xff]  }
 0x201   : > { %1658 = vmatpush1.bf16.msra.mxu0 %v10097_v47  ;;  %v12259_v47 = vld [vmem:[#allocation2 + $0x20] sm:$0xff] }
 0x202   : > { %1659 = vmatprep.subr.bf16.mxu0 %v10102_v48  ;;  %v1716_v48 = vsel %vm1711_vm0, %v12259_v47, 0 }
 0x203   : > { %v1794_v3 = vshll.u32 %v1716_v48, 16 }
 0x205   : > { %1660 = vmatpush1.bf16.msra.mxu0 %v10100_v51  ;;  %v1719_v51 = vsel %vm1711_vm0, %v12264_v49, 0 }
 0x206   : > { %1661 = vmatprep.subr.bf16.mxu0 %v10105_v52  ;;  %v10163_v52 = vld [vmem:[#allocation7 + $0x4d0] ss:$8 sps:$4 sm:$0xff]   ;;  %v1830_v6 = vshll.u32 %v1719_v51, 16 }
 0x209   : > { %1662 = vmatpush1.bf16.msra.mxu0 %v10103_v54  ;;  %v1791_v54 = vshrl.u32 %v1716_v48, 16 }
 0x20a   : > { %1663 = vmatprep.subr.bf16.mxu0 %v10108_v55  ;;  %v11329_v55 = vld [vmem:[#allocation2] sm:$0x80] }
 0x20b   : > { %v1712_v31 = vsel %vm1710_vm1, %v11329_v55, 0 }
 0x20d   : > { %1664 = vmatpush1.bf16.msra.mxu0 %v10106_v57  ;;  %v1827_v57 = vshrl.u32 %v1719_v51, 16  ;;  %v11332_v51 = vld [vmem:[#allocation2 + $0x10] sm:$0x80] }
 0x20e   : > { %1665 = vmatprep.subr.bf16.mxu0 %v10111_v58  ;;  %v10166_v58 = vld [vmem:[#allocation7 + $0x4e0] ss:$8 sps:$4 sm:$0xff]  }
 0x211   : > { %1666 = vmatpush1.bf16.msra.mxu0 %v10109_v60  ;;  %v11330_v60 = vld [vmem:[#allocation2 + $0x18] sm:$0x80] }
 0x212   : > { %1667 = vmatprep.subr.bf16.mxu0 %v10114_v61  ;;  %v1715_v61 = vsel %vm1710_vm1, %v11330_v60, 0  ;;  %v10222_v60 = vld [vmem:[#allocation7 + $0x604] ss:$8 sps:$4 sm:$0xff]  }
 0x215   : > { %1668 = vmatpush1.bf16.msra.mxu0 %v10112_v1  ;;  %v1787_v1 = vshrl.u32 %v1712_v31, 16 }
 0x216   : > { %1669 = vmatprep.subr.bf16.mxu0 %v10117_v2  ;;  %v1793_v2 = vrot.slane %v1791_v54, 7  ;;  %v10219_v54 = vld [vmem:[#allocation7 + $0x5f4] ss:$8 sps:$4 sm:$0xff]  }
 0x219   : > { %1670 = vmatpush1.bf16.msra.mxu0 %v10115_v4  ;;  %v1823_v4 = vshrl.u32 %v1715_v61, 16 }
 0x21a   : > { %1671 = vmatprep.subr.bf16.mxu0 %v10120_v5  ;;  %v1829_v5 = vrot.slane %v1827_v57, 7 }
 0x21b   : > { %v1825_v12 = vrot.slane %v1823_v4, 7  ;;  %v10223_v4 = vld [vmem:[#allocation7 + $0x610] ss:$8 sps:$4 sm:$0xff]  }
 0x21c   : > { %v1832_v13 = vor.u32 %v1830_v6, %v1829_v5  ;;  %v10228_v5 = vld [vmem:[#allocation7 + $0x624] ss:$8 sps:$4 sm:$0xff]   ;;  %v12283_v6 = vld [vmem:[#allocation2 + $0x28] sm:$0xff] }
 0x21d   : > { %1672 = vmatpush1.bf16.msra.mxu0 %v10118_v10  ;;  %v1789_v10 = vrot.slane %v1787_v1, 7  ;;  %v10220_v1 = vld [vmem:[#allocation7 + $0x600] ss:$8 sps:$4 sm:$0xff]  }
 0x21e   : > { %1673 = vmatprep.subr.bf16.mxu0 %v10123_v11  ;;  %v1796_v11 = vor.u32 %v1794_v3, %v1793_v2  ;;  %v1833_v62 = vsel %vm1785_vm2, %v1825_v12, %v1832_v13  ;;  %v10225_v3 = vld [vmem:[#allocation7 + $0x614] ss:$8 sps:$4 sm:$0xff]   ;;  %v10232_v12 = vld [vmem:[#allocation7 + $0x640] ss:$8 sps:$4 sm:$0xff]  }
 0x21f   : > { %v10237_v13 = vld [vmem:[#allocation7 + $0x654] ss:$8 sps:$4 sm:$0xff]  }
 0x221   : > { %1674 = vmatpush1.bf16.msra.mxu0 %v10121_v17  ;;  %v1797_v17 = vsel %vm1785_vm2, %v1789_v10, %v1796_v11  ;;  %v10229_v10 = vld [vmem:[#allocation7 + $0x630] ss:$8 sps:$4 sm:$0xff]   ;;  %v10234_v11 = vld [vmem:[#allocation7 + $0x644] ss:$8 sps:$4 sm:$0xff]  }
 0x222   : > { %2158 = vmatprep.subr.bf16.mxu0 %v10126_v18  ;;  %v10177_v18 = vld [vmem:[#allocation7 + $0x514] ss:$8 sps:$4 sm:$0xff]  }
 0x224   : > { %1676 = vmatmul.mubr.bf16.vlgmr.msra.gmra.mrb[0].mxu0 %v12223_v44  ;;  %v10144_v44 = vld [vmem:[#allocation7 + $0x464] ss:$8 sps:$4 sm:$0xff]  }
 0x225   : > { %2159 = vmatpush1.bf16.msra.mxu0 %v10124_v19  ;;  %2190 = vmatprep.mubr.bf16.mxu0 %v1809_v21  ;;  %v10180_v19 = vld [vmem:[#allocation7 + $0x524] ss:$8 sps:$4 sm:$0xff]   ;;  %v10183_v21 = vld [vmem:[#allocation7 + $0x534] ss:$8 sps:$4 sm:$0xff]  }
 0x226   : > { %2160 = vmatprep.subr.bf16.mxu0 %v10129_v20  ;;  %v10178_v20 = vld [vmem:[#allocation7 + $0x520] ss:$8 sps:$4 sm:$0xff]  }
 0x229   : > { %2161 = vmatpush1.bf16.msra.mxu0 %v10127_v42  ;;  %v10181_v42 = vld [vmem:[#allocation7 + $0x530] ss:$8 sps:$4 sm:$0xff]  }
 0x22a   : > { %2162 = vmatprep.subr.bf16.mxu0 %v10132_v22  ;;  %v10186_v22 = vld [vmem:[#allocation7 + $0x544] ss:$8 sps:$4 sm:$0xff]  }
 0x22d   : > { %2163 = vmatpush1.bf16.msra.mxu0 %v10130_v23  ;;  %v10184_v23 = vld [vmem:[#allocation7 + $0x540] ss:$8 sps:$4 sm:$0xff]  }
 0x22e   : > { %2164 = vmatprep.subr.bf16.mxu0 %v10135_v24  ;;  %v10189_v24 = vld [vmem:[#allocation7 + $0x554] ss:$8 sps:$4 sm:$0xff]  }
 0x231   : > { %2165 = vmatpush1.bf16.msra.mxu0 %v10133_v25  ;;  %v10187_v25 = vld [vmem:[#allocation7 + $0x550] ss:$8 sps:$4 sm:$0xff]  }
 0x232   : > { %2166 = vmatprep.subr.bf16.mxu0 %v10138_v26  ;;  %v10192_v26 = vld [vmem:[#allocation7 + $0x564] ss:$8 sps:$4 sm:$0xff]  }
 0x235   : > { %2167 = vmatpush1.bf16.msra.mxu0 %v10136_v27  ;;  %v10190_v27 = vld [vmem:[#allocation7 + $0x560] ss:$8 sps:$4 sm:$0xff]  }
 0x236   : > { %2168 = vmatprep.subr.bf16.mxu0 %v10141_v28  ;;  %v10195_v28 = vld [vmem:[#allocation7 + $0x574] ss:$8 sps:$4 sm:$0xff]  }
 0x239   : > { %2169 = vmatpush1.bf16.msra.mxu0 %v10139_v30  ;;  %v10193_v30 = vld [vmem:[#allocation7 + $0x570] ss:$8 sps:$4 sm:$0xff]  }
 0x23a   : > { %2170 = vmatprep.subr.bf16.mxu0 %v10144_v44  ;;  %v10198_v44 = vld [vmem:[#allocation7 + $0x584] ss:$8 sps:$4 sm:$0xff]  }
 0x23d   : > { %2171 = vmatpush1.bf16.msra.mxu0 %v10142_v32  ;;  %v10196_v32 = vld [vmem:[#allocation7 + $0x580] ss:$8 sps:$4 sm:$0xff]  }
 0x23e   : > { %2172 = vmatprep.subr.bf16.mxu0 %v10147_v33  ;;  %v10201_v33 = vld [vmem:[#allocation7 + $0x594] ss:$8 sps:$4 sm:$0xff]  }
 0x241   : > { %2173 = vmatpush1.bf16.msra.mxu0 %v10145_v34  ;;  %v10199_v34 = vld [vmem:[#allocation7 + $0x590] ss:$8 sps:$4 sm:$0xff]  }
 0x242   : > { %2174 = vmatprep.subr.bf16.mxu0 %v10150_v35  ;;  %v10204_v35 = vld [vmem:[#allocation7 + $0x5a4] ss:$8 sps:$4 sm:$0xff]  }
 0x245   : > { %2175 = vmatpush1.bf16.msra.mxu0 %v10148_v36  ;;  %v10202_v36 = vld [vmem:[#allocation7 + $0x5a0] ss:$8 sps:$4 sm:$0xff]  }
 0x246   : > { %2176 = vmatprep.subr.bf16.mxu0 %v10153_v37  ;;  %v10207_v37 = vld [vmem:[#allocation7 + $0x5b4] ss:$8 sps:$4 sm:$0xff]  }
 0x249   : > { %2177 = vmatpush1.bf16.msra.mxu0 %v10151_v0  ;;  %v10205_v0 = vld [vmem:[#allocation7 + $0x5b0] ss:$8 sps:$4 sm:$0xff]  }
 0x24a   : > { %2178 = vmatprep.subr.bf16.mxu0 %v10156_v38  ;;  %v10210_v38 = vld [vmem:[#allocation7 + $0x5c4] ss:$8 sps:$4 sm:$0xff]  }
 0x24d   : > { %2179 = vmatpush1.bf16.msra.mxu0 %v10154_v39  ;;  %v10208_v39 = vld [vmem:[#allocation7 + $0x5c0] ss:$8 sps:$4 sm:$0xff]  }
 0x24e   : > { %2180 = vmatprep.subr.bf16.mxu0 %v10159_v40  ;;  %v10213_v40 = vld [vmem:[#allocation7 + $0x5d4] ss:$8 sps:$4 sm:$0xff]  }
 0x251   : > { %2181 = vmatpush1.bf16.msra.mxu0 %v10157_v41  ;;  %v12275_v41 = vld [vmem:[#allocation2 + $0x30] sm:$0xff] }
 0x252   : > { %2182 = vmatprep.subr.bf16.mxu0 %v10162_v43  ;;  %v1718_v43 = vsel %vm1711_vm0, %v12275_v41, 0 }
 0x253   : > { %v1815_v48 = vshrl.u32 %v1718_v43, 16  ;;  %v1818_v57 = vshll.u32 %v1718_v43, 16  ;;  %v10277_v43 = vld [vmem:[#allocation7 + $0x730] ss:$8 sps:$4 sm:$0xff]  }
 0x255   : > { %2183 = vmatpush1.bf16.msra.mxu0 %v10160_v45  ;;  %v10211_v45 = vld [vmem:[#allocation7 + $0x5d0] ss:$8 sps:$4 sm:$0xff]   ;;  %v1817_v31 = vrot.slane %v1815_v48, 7  ;;  %v10285_v48 = vld [vmem:[#allocation7 + $0x754] ss:$8 sps:$4 sm:$0xff]  }
 0x256   : > { %2184 = vmatprep.subr.bf16.mxu0 %v10165_v46  ;;  %v10216_v46 = vld [vmem:[#allocation7 + $0x5e4] ss:$8 sps:$4 sm:$0xff]  }
 0x259   : > { %2185 = vmatpush1.bf16.msra.mxu0 %v10163_v52  ;;  %v1714_v52 = vsel %vm1710_vm1, %v11332_v51, 0  ;;  %v10288_v51 = vld [vmem:[#allocation7 + $0x764] ss:$8 sps:$4 sm:$0xff]  }
 0x25a   : > { %2186 = vmatprep.subr.bf16.mxu0 %v10168_v53  ;;  %v10214_v53 = vld [vmem:[#allocation7 + $0x5e0] ss:$8 sps:$4 sm:$0xff]   ;;  %v1811_v55 = vshrl.u32 %v1714_v52, 16  ;;  %v10291_v52 = vld [vmem:[#allocation7 + $0x774] ss:$8 sps:$4 sm:$0xff]  }
 0x25c   : > { %v1813_v61 = vrot.slane %v1811_v55, 7 }
 0x25d   : > { %2187 = vmatpush1.bf16.msra.mxu0 %v10166_v58  ;;  %v10217_v58 = vld [vmem:[#allocation7 + $0x5f0] ss:$8 sps:$4 sm:$0xff]  }
 0x25e   : > { %2188 = vmatprep.subr.bf16.mxu0 %v10171_v63  ;;  %v1820_v63 = vor.u32 %v1818_v57, %v1817_v31  ;;  %v10294_v57 = vld [vmem:[#allocation7 + $0x784] ss:$8 sps:$4 sm:$0xff]  }
 0x260   : > { %v1821_v2 = vsel %vm1785_vm2, %v1813_v61, %v1820_v63  ;;  %v10297_v61 = vld [vmem:[#allocation7 + $0x794] ss:$8 sps:$4 sm:$0xff]  }
 0x261   : > { %2189 = vmatpush1.bf16.msra.mxu0 %v10169_v7  ;;  %v10226_v7 = vld [vmem:[#allocation7 + $0x620] ss:$8 sps:$4 sm:$0xff]  }
 0x262   : > { %2201 = vmatprep.subr.bf16.mxu0 %v10174_v8  ;;  %v10231_v8 = vld [vmem:[#allocation7 + $0x634] ss:$8 sps:$4 sm:$0xff]  }
 0x264   : > { %2191 = vmatmul.mubr.bf16.vlgmr.msra.gmra.mrb[0].mxu0 %v1797_v17  ;;  %v10240_v17 = vld [vmem:[#allocation7 + $0x664] ss:$8 sps:$4 sm:$0xff]  }
 0x265   : > { %2202 = vmatpush1.bf16.msra.mxu0 %v10172_v14  ;;  %2233 = vmatprep.mubr.bf16.mxu0 %v1833_v62  ;;  %v10235_v14 = vld [vmem:[#allocation7 + $0x650] ss:$8 sps:$4 sm:$0xff]   ;;  %v10243_v62 = vld [vmem:[#allocation7 + $0x674] ss:$8 sps:$4 sm:$0xff]  }
 0x266   : > { %2203 = vmatprep.subr.bf16.mxu0 %v10177_v18  ;;  %v10238_v18 = vld [vmem:[#allocation7 + $0x660] ss:$8 sps:$4 sm:$0xff]  }
 0x269   : > { %2204 = vmatpush1.bf16.msra.mxu0 %v10175_v50  ;;  %v10241_v50 = vld [vmem:[#allocation7 + $0x670] ss:$8 sps:$4 sm:$0xff]  }
 0x26a   : > { %2205 = vmatprep.subr.bf16.mxu0 %v10180_v19  ;;  %v10246_v19 = vld [vmem:[#allocation7 + $0x684] ss:$8 sps:$4 sm:$0xff]  }
 0x26d   : > { %2206 = vmatpush1.bf16.msra.mxu0 %v10178_v20  ;;  %v10244_v20 = vld [vmem:[#allocation7 + $0x680] ss:$8 sps:$4 sm:$0xff]  }
 0x26e   : > { %2207 = vmatprep.subr.bf16.mxu0 %v10183_v21  ;;  %v10249_v21 = vld [vmem:[#allocation7 + $0x694] ss:$8 sps:$4 sm:$0xff]  }
 0x271   : > { %2208 = vmatpush1.bf16.msra.mxu0 %v10181_v42  ;;  %v10247_v42 = vld [vmem:[#allocation7 + $0x690] ss:$8 sps:$4 sm:$0xff]  }
 0x272   : > { %2209 = vmatprep.subr.bf16.mxu0 %v10186_v22  ;;  %v10252_v22 = vld [vmem:[#allocation7 + $0x6a4] ss:$8 sps:$4 sm:$0xff]  }
 0x275   : > { %2210 = vmatpush1.bf16.msra.mxu0 %v10184_v23  ;;  %v10250_v23 = vld [vmem:[#allocation7 + $0x6a0] ss:$8 sps:$4 sm:$0xff]  }
 0x276   : > { %2211 = vmatprep.subr.bf16.mxu0 %v10189_v24  ;;  %v10255_v24 = vld [vmem:[#allocation7 + $0x6b4] ss:$8 sps:$4 sm:$0xff]  }
 0x279   : > { %2212 = vmatpush1.bf16.msra.mxu0 %v10187_v25  ;;  %v10253_v25 = vld [vmem:[#allocation7 + $0x6b0] ss:$8 sps:$4 sm:$0xff]  }
 0x27a   : > { %2213 = vmatprep.subr.bf16.mxu0 %v10192_v26  ;;  %v10258_v26 = vld [vmem:[#allocation7 + $0x6c4] ss:$8 sps:$4 sm:$0xff]  }
 0x27d   : > { %2214 = vmatpush1.bf16.msra.mxu0 %v10190_v27  ;;  %v10256_v27 = vld [vmem:[#allocation7 + $0x6c0] ss:$8 sps:$4 sm:$0xff]  }
 0x27e   : > { %2215 = vmatprep.subr.bf16.mxu0 %v10195_v28  ;;  %v10261_v28 = vld [vmem:[#allocation7 + $0x6d4] ss:$8 sps:$4 sm:$0xff]  }
 0x281   : > { %2216 = vmatpush1.bf16.msra.mxu0 %v10193_v30  ;;  %v10259_v30 = vld [vmem:[#allocation7 + $0x6d0] ss:$8 sps:$4 sm:$0xff]  }
 0x282   : > { %2217 = vmatprep.subr.bf16.mxu0 %v10198_v44  ;;  %v10264_v44 = vld [vmem:[#allocation7 + $0x6e4] ss:$8 sps:$4 sm:$0xff]  }
 0x285   : > { %2218 = vmatpush1.bf16.msra.mxu0 %v10196_v32  ;;  %v10262_v32 = vld [vmem:[#allocation7 + $0x6e0] ss:$8 sps:$4 sm:$0xff]  }
 0x286   : > { %2219 = vmatprep.subr.bf16.mxu0 %v10201_v33  ;;  %v10267_v33 = vld [vmem:[#allocation7 + $0x6f4] ss:$8 sps:$4 sm:$0xff]  }
 0x289   : > { %2220 = vmatpush1.bf16.msra.mxu0 %v10199_v34  ;;  %v10265_v34 = vld [vmem:[#allocation7 + $0x6f0] ss:$8 sps:$4 sm:$0xff]  }
 0x28a   : > { %2221 = vmatprep.subr.bf16.mxu0 %v10204_v35  ;;  %v10270_v35 = vld [vmem:[#allocation7 + $0x704] ss:$8 sps:$4 sm:$0xff]  }
 0x28d   : > { %2222 = vmatpush1.bf16.msra.mxu0 %v10202_v36  ;;  %v10268_v36 = vld [vmem:[#allocation7 + $0x700] ss:$8 sps:$4 sm:$0xff]  }
 0x28e   : > { %2223 = vmatprep.subr.bf16.mxu0 %v10207_v37  ;;  %v10273_v37 = vld [vmem:[#allocation7 + $0x714] ss:$8 sps:$4 sm:$0xff]  }
 0x291   : > { %2224 = vmatpush1.bf16.msra.mxu0 %v10205_v0  ;;  %v10271_v0 = vld [vmem:[#allocation7 + $0x710] ss:$8 sps:$4 sm:$0xff]  }
 0x292   : > { %2225 = vmatprep.subr.bf16.mxu0 %v10210_v38  ;;  %v10276_v38 = vld [vmem:[#allocation7 + $0x724] ss:$8 sps:$4 sm:$0xff]  }
 0x295   : > { %2226 = vmatpush1.bf16.msra.mxu0 %v10208_v39  ;;  %v10274_v39 = vld [vmem:[#allocation7 + $0x720] ss:$8 sps:$4 sm:$0xff]  }
 0x296   : > { %2227 = vmatprep.subr.bf16.mxu0 %v10213_v40  ;;  %v10279_v40 = vld [vmem:[#allocation7 + $0x734] ss:$8 sps:$4 sm:$0xff]  }
 0x299   : > { %2228 = vmatpush1.bf16.msra.mxu0 %v10211_v45  ;;  %v10282_v45 = vld [vmem:[#allocation7 + $0x744] ss:$8 sps:$4 sm:$0xff]  }
 0x29a   : > { %2229 = vmatprep.subr.bf16.mxu0 %v10216_v46  ;;  %v10280_v46 = vld [vmem:[#allocation7 + $0x740] ss:$8 sps:$4 sm:$0xff]  }
 0x29d   : > { %2230 = vmatpush1.bf16.msra.mxu0 %v10214_v53  ;;  %v10289_v53 = vld [vmem:[#allocation7 + $0x770] ss:$8 sps:$4 sm:$0xff]  }
 0x29e   : > { %2231 = vmatprep.subr.bf16.mxu0 %v10219_v54  ;;  %v12290_v54 = vld [vmem:[#allocation3] sm:$0xff] }
 0x29f   : > { %v2739_v55 = vsel %vm2737_vm7, 65537, %v12290_v54  ;;  %v2740_v31 = vsel %vm2738_vm8, 65537, %v12290_v54  ;;  %vm3820_vm7 = vcmp.lt.s32.totalorder %v12152_v15, 5  ;;  %vm3821_vm8 = vcmp.lt.s32.totalorder %v12154_v16, 5 }
 0x2a0   : > { %vm3826_vm12 = vmpackc.low %vm3820_vm7, %vm3820_vm7 }
 0x2a1   : > { %2232 = vmatpush1.bf16.msra.mxu0 %v10217_v58  ;;  %v8999_v58 = vcombine.low %v2739_v55, %v2740_v31  ;;  %v10354_v55 = vld [vmem:[#allocation7 + $0x8c4] ss:$8 sps:$4 sm:$0xff]   ;;  %v2723_v31 = vld [vmem:[#allocation2 + $0x20] sm:$0xff]  ;;  %vm3827_vm13 = vmpackc.low %vm3821_vm8, %vm3821_vm8 }
 0x2a2   : > { %2633 = vmatprep.subr.bf16.mxu0 %v10222_v60  ;;  %v10292_v60 = vld [vmem:[#allocation7 + $0x780] ss:$8 sps:$4 sm:$0xff]  }
 0x2a3   : > { %v2745_v63 = vshrl.u32 %v8999_v58, 16 }
 0x2a4   : > { %2234 = vmatmul.mubr.bf16.vlgmr.msra.gmra.mrb[0].mxu0 %v1821_v2  ;;  %v10300_v2 = vld [vmem:[#allocation7 + $0x7a4] ss:$8 sps:$4 sm:$0xff]  }
 0x2a5   : > { %2634 = vmatpush1.bf16.msra.mxu0 %v10220_v1  ;;  %2665 = vmatprep.mubr.bf16.mxu0 %v12283_v6  ;;  %v10295_v1 = vld [vmem:[#allocation7 + $0x790] ss:$8 sps:$4 sm:$0xff]  }
 0x2a6   : > { %2635 = vmatprep.subr.bf16.mxu0 %v10225_v3  ;;  %v12294_v3 = vrot.slane %v2745_v63, 7  ;;  %v12313_v63 = vld [vmem:[#allocation2 + $0x40] sm:$0x1] }
 0x2a8   : > { %vm2752_vm10 = vcmp.ne.s16.totalorder %v12294_v3, 0 }
 0x2a9   : > { %2636 = vmatpush1.bf16.msra.mxu0 %v10223_v4  ;;  %v2748_v4 = vshll.u32 %v8999_v58, 16  ;;  %v10352_v58 = vld [vmem:[#allocation7 + $0x8c0] ss:$8 sps:$4 sm:$0xff]  }
 0x2aa   : > { %2637 = vmatprep.subr.bf16.mxu0 %v10228_v5  ;;  %v10298_v5 = vld [vmem:[#allocation7 + $0x7a0] ss:$8 sps:$4 sm:$0xff]  }
 0x2ad   : > { %2638 = vmatpush1.bf16.msra.mxu0 %v10226_v7  ;;  %v10303_v7 = vld [vmem:[#allocation7 + $0x7b4] ss:$8 sps:$4 sm:$0xff]  }
 0x2ae   : > { %2639 = vmatprep.subr.bf16.mxu0 %v10231_v8  ;;  %v12297_v8 = vor.u32 %v2748_v4, %v12294_v3  ;;  %v10355_v4 = vld [vmem:[#allocation7 + $0x8d0] ss:$8 sps:$4 sm:$0xff]   ;;  %v10798_v3 = vld [vmem:[#allocation9 + $0x404] ss:$8 sps:$4 sm:$0xff]  }
 0x2b0   : > { %vm2751_vm9 = vcmp.ne.s16.totalorder %v12297_v8, 0  ;;  %v10793_v8 = vld [vmem:[#allocation9 + $0x3f0] ss:$8 sps:$4 sm:$0xff]  }
 0x2b1   : > { %2640 = vmatpush1.bf16.msra.mxu0 %v10229_v10  ;;  %v10301_v10 = vld [vmem:[#allocation7 + $0x7b0] ss:$8 sps:$4 sm:$0xff]  }
 0x2b2   : > { %2641 = vmatprep.subr.bf16.mxu0 %v10234_v11  ;;  %v10306_v11 = vld [vmem:[#allocation7 + $0x7c4] ss:$8 sps:$4 sm:$0xff]  }
 0x2b5   : > { %2642 = vmatpush1.bf16.msra.mxu0 %v10232_v12  ;;  %v10304_v12 = vld [vmem:[#allocation7 + $0x7c0] ss:$8 sps:$4 sm:$0xff]  }
 0x2b6   : > { %2643 = vmatprep.subr.bf16.mxu0 %v10237_v13  ;;  %v10309_v13 = vld [vmem:[#allocation7 + $0x7d4] ss:$8 sps:$4 sm:$0xff]  }
 0x2b9   : > { %2644 = vmatpush1.bf16.msra.mxu0 %v10235_v14  ;;  %v2754_v14 = vsel %vm2751_vm9, %v12283_v6, 0 }
 0x2ba   : > { %2645 = vmatprep.subr.bf16.mxu0 %v10240_v17  ;;  %v12303_v17 = vld [vmem:[#allocation2 + $0x48] sm:$0x1] }
 0x2bd   : > { %2646 = vmatpush1.bf16.msra.mxu0 %v10238_v18  ;;  %v10307_v18 = vld [vmem:[#allocation7 + $0x7d0] ss:$8 sps:$4 sm:$0xff]  }
 0x2be   : > { %2647 = vmatprep.subr.bf16.mxu0 %v10243_v62  ;;  %v10312_v62 = vld [vmem:[#allocation7 + $0x7e4] ss:$8 sps:$4 sm:$0xff]  }
 0x2c1   : > { %2648 = vmatpush1.bf16.msra.mxu0 %v10241_v50  ;;  %v2842_v50 = vshll.u32 %v2754_v14, 16 }
 0x2c2   : > { %2649 = vmatprep.subr.bf16.mxu0 %v10246_v19  ;;  %v2758_v19 = vsel %vm2752_vm10, %v12303_v17, 0 }
 0x2c3   : > { %v2847_v6 = vshll.u32 %v2758_v19, 16 }
 0x2c5   : > { %2650 = vmatpush1.bf16.msra.mxu0 %v10244_v20  ;;  %v10310_v20 = vld [vmem:[#allocation7 + $0x7e0] ss:$8 sps:$4 sm:$0xff]  }
 0x2c6   : > { %2651 = vmatprep.subr.bf16.mxu0 %v10249_v21  ;;  %v10315_v21 = vld [vmem:[#allocation7 + $0x7f4] ss:$8 sps:$4 sm:$0xff]  }
 0x2c9   : > { %2652 = vmatpush1.bf16.msra.mxu0 %v10247_v42  ;;  %v2840_v42 = vshrl.u32 %v2754_v14, 16 }
 0x2ca   : > { %2653 = vmatprep.subr.bf16.mxu0 %v10252_v22  ;;  %v2844_v22 = vrot.slane %v2842_v50, 1  ;;  %v10363_v50 = vld [vmem:[#allocation7 + $0x8f4] ss:$8 sps:$4 sm:$0xff]  }
 0x2cd   : > { %2654 = vmatpush1.bf16.msra.mxu0 %v10250_v23  ;;  %v10313_v23 = vld [vmem:[#allocation7 + $0x7f0] ss:$8 sps:$4 sm:$0xff]  }
 0x2ce   : > { %2655 = vmatprep.subr.bf16.mxu0 %v10255_v24  ;;  %v10318_v24 = vld [vmem:[#allocation7 + $0x804] ss:$8 sps:$4 sm:$0xff]  }
 0x2d1   : > { %2656 = vmatpush1.bf16.msra.mxu0 %v10253_v25  ;;  %v2845_v25 = vor.u32 %v2844_v22, %v2840_v42  ;;  %v10361_v42 = vld [vmem:[#allocation7 + $0x8f0] ss:$8 sps:$4 sm:$0xff]  }
 0x2d2   : > { %2657 = vmatprep.subr.bf16.mxu0 %v10258_v26  ;;  %v2849_v26 = vrot.slane %v2847_v6, 1 }
 0x2d5   : > { %2658 = vmatpush1.bf16.msra.mxu0 %v10256_v27  ;;  %v10316_v27 = vld [vmem:[#allocation7 + $0x800] ss:$8 sps:$4 sm:$0xff]  }
 0x2d6   : > { %2659 = vmatprep.subr.bf16.mxu0 %v10261_v28  ;;  %v10321_v28 = vld [vmem:[#allocation7 + $0x814] ss:$8 sps:$4 sm:$0xff]  }
 0x2d9   : > { %2660 = vmatpush1.bf16.msra.mxu0 %v10259_v30  ;;  %v2850_v30 = vsel %vm2826_vm11, %v2845_v25, %v2849_v26  ;;  %v10364_v26 = vld [vmem:[#allocation7 + $0x900] ss:$8 sps:$4 sm:$0xff]  }
 0x2da   : > { %2661 = vmatprep.subr.bf16.mxu0 %v10264_v44  ;;  %v10319_v44 = vld [vmem:[#allocation7 + $0x810] ss:$8 sps:$4 sm:$0xff]  }
 0x2dd   : > { %2662 = vmatpush1.bf16.msra.mxu0 %v10262_v32  ;;  %v10324_v32 = vld [vmem:[#allocation7 + $0x824] ss:$8 sps:$4 sm:$0xff]  }
 0x2de   : > { %2663 = vmatprep.subr.bf16.mxu0 %v10267_v33  ;;  %v10322_v33 = vld [vmem:[#allocation7 + $0x820] ss:$8 sps:$4 sm:$0xff]  }
 0x2e1   : > { %2664 = vmatpush1.bf16.msra.mxu0 %v10265_v34  ;;  %v10327_v34 = vld [vmem:[#allocation7 + $0x834] ss:$8 sps:$4 sm:$0xff]  }
 0x2e2   : > { %2676 = vmatprep.subr.bf16.mxu0 %v10270_v35  ;;  %v10325_v35 = vld [vmem:[#allocation7 + $0x830] ss:$8 sps:$4 sm:$0xff]  }
 0x2e4   : > { %2666 = vmatmul.mubr.bf16.vlgmr.msra.gmra.mrb[0].mxu0 %v12259_v47  ;;  %v10283_v47 = vld [vmem:[#allocation7 + $0x750] ss:$8 sps:$4 sm:$0xff]  }
 0x2e5   : > { %2677 = vmatpush1.bf16.msra.mxu0 %v10268_v36  ;;  %2708 = vmatprep.mubr.bf16.mxu0 %v12264_v49  ;;  %v10286_v49 = vld [vmem:[#allocation7 + $0x760] ss:$8 sps:$4 sm:$0xff]   ;;  %v10330_v36 = vld [vmem:[#allocation7 + $0x844] ss:$8 sps:$4 sm:$0xff]  }
 0x2e6   : > { %2678 = vmatprep.subr.bf16.mxu0 %v10273_v37  ;;  %v10328_v37 = vld [vmem:[#allocation7 + $0x840] ss:$8 sps:$4 sm:$0xff]  }
 0x2e9   : > { %2679 = vmatpush1.bf16.msra.mxu0 %v10271_v0  ;;  %v10333_v0 = vld [vmem:[#allocation7 + $0x854] ss:$8 sps:$4 sm:$0xff]  }
 0x2ea   : > { %2680 = vmatprep.subr.bf16.mxu0 %v10276_v38  ;;  %v10331_v38 = vld [vmem:[#allocation7 + $0x850] ss:$8 sps:$4 sm:$0xff]  }
 0x2ed   : > { %2681 = vmatpush1.bf16.msra.mxu0 %v10274_v39  ;;  %v10334_v39 = vld [vmem:[#allocation7 + $0x860] ss:$8 sps:$4 sm:$0xff]  }
 0x2ee   : > { %2682 = vmatprep.subr.bf16.mxu0 %v10279_v40  ;;  %v10339_v40 = vld [vmem:[#allocation7 + $0x874] ss:$8 sps:$4 sm:$0xff]  }
 0x2f1   : > { %2683 = vmatpush1.bf16.msra.mxu0 %v10277_v43  ;;  %v10337_v43 = vld [vmem:[#allocation7 + $0x870] ss:$8 sps:$4 sm:$0xff]  }
 0x2f2   : > { %2684 = vmatprep.subr.bf16.mxu0 %v10282_v45  ;;  %v10342_v45 = vld [vmem:[#allocation7 + $0x884] ss:$8 sps:$4 sm:$0xff]  }
 0x2f5   : > { %2685 = vmatpush1.bf16.msra.mxu0 %v10280_v46  ;;  %v10340_v46 = vld [vmem:[#allocation7 + $0x880] ss:$8 sps:$4 sm:$0xff]  }
 0x2f6   : > { %2686 = vmatprep.subr.bf16.mxu0 %v10285_v48  ;;  %v10345_v48 = vld [vmem:[#allocation7 + $0x894] ss:$8 sps:$4 sm:$0xff]  }
 0x2f9   : > { %2687 = vmatpush1.bf16.msra.mxu0 %v10283_v47  ;;  %v10343_v47 = vld [vmem:[#allocation7 + $0x890] ss:$8 sps:$4 sm:$0xff]  }
 0x2fa   : > { %2688 = vmatprep.subr.bf16.mxu0 %v10288_v51  ;;  %v10348_v51 = vld [vmem:[#allocation7 + $0x8a4] ss:$8 sps:$4 sm:$0xff]  }
 0x2fd   : > { %2689 = vmatpush1.bf16.msra.mxu0 %v10286_v49  ;;  %v10346_v49 = vld [vmem:[#allocation7 + $0x8a0] ss:$8 sps:$4 sm:$0xff]  }
 0x2fe   : > { %2690 = vmatprep.subr.bf16.mxu0 %v10291_v52  ;;  %v10351_v52 = vld [vmem:[#allocation7 + $0x8b4] ss:$8 sps:$4 sm:$0xff]  }
 0x301   : > { %2691 = vmatpush1.bf16.msra.mxu0 %v10289_v53  ;;  %v10349_v53 = vld [vmem:[#allocation7 + $0x8b0] ss:$8 sps:$4 sm:$0xff]  }
 0x302   : > { %2692 = vmatprep.subr.bf16.mxu0 %v10294_v57  ;;  %v2726_v57 = vld [vmem:[#allocation2 + $0x38] sm:$0xff] }
 0x305   : > { %2693 = vmatpush1.bf16.msra.mxu0 %v10292_v60  ;;  %v10357_v60 = vld [vmem:[#allocation7 + $0x8d4] ss:$8 sps:$4 sm:$0xff]  }
 0x306   : > { %2694 = vmatprep.subr.bf16.mxu0 %v10297_v61  ;;  %v2753_v61 = vsel %vm2751_vm9, %v2723_v31, 0  ;;  %v3302_v31 = vsel %vm3300_vm15, 65537, %v12290_v54  ;;  %vm3915_vm15 = vsmask.f32 6400 }
 0x307   : > { %v2828_v14 = vshrl.u32 %v2753_v61, 16 }
 0x309   : > { %2695 = vmatpush1.bf16.msra.mxu0 %v10295_v1  ;;  %v2756_v1 = vsel %vm2751_vm9, %v2726_v57, 0  ;;  %v10402_v57 = vld [vmem:[#allocation7 + $0x9c4] ss:$8 sps:$4 sm:$0xff]  }
 0x30a   : > { %2696 = vmatprep.subr.bf16.mxu0 %v10300_v2  ;;  %v12317_v2 = vld [vmem:[#allocation2 + $0x58] sm:$0x1]  ;;  %v2864_v19 = vshrl.u32 %v2756_v1, 16 }
 0x30d   : > { %2697 = vmatpush1.bf16.msra.mxu0 %v10298_v5  ;;  %v2830_v5 = vshll.u32 %v2753_v61, 16  ;;  %v10400_v61 = vld [vmem:[#allocation7 + $0x9c0] ss:$8 sps:$4 sm:$0xff]  }
 0x30e   : > { %2698 = vmatprep.subr.bf16.mxu0 %v10303_v7  ;;  %v10360_v7 = vld [vmem:[#allocation7 + $0x8e4] ss:$8 sps:$4 sm:$0xff]  }
 0x311   : > { %2699 = vmatpush1.bf16.msra.mxu0 %v10301_v10  ;;  %v2757_v10 = vsel %vm2752_vm10, %v12313_v63, 0 }
 0x312   : > { %2700 = vmatprep.subr.bf16.mxu0 %v10306_v11  ;;  %v2866_v11 = vshll.u32 %v2756_v1, 16  ;;  %v10405_v1 = vld [vmem:[#allocation7 + $0x9d4] ss:$8 sps:$4 sm:$0xff]  }
 0x315   : > { %2701 = vmatpush1.bf16.msra.mxu0 %v10304_v12  ;;  %v2760_v12 = vsel %vm2752_vm10, %v12317_v2, 0 }
 0x316   : > { %2702 = vmatprep.subr.bf16.mxu0 %v10309_v13  ;;  %v10358_v13 = vld [vmem:[#allocation7 + $0x8e0] ss:$8 sps:$4 sm:$0xff]  }
 0x319   : > { %2703 = vmatpush1.bf16.msra.mxu0 %v10307_v18  ;;  %v2832_v18 = vrot.slane %v2830_v5, 1  ;;  %v12333_v5 = vld [vmem:[#allocation2 + $0x50] sm:$0x1] }
 0x31a   : > { %2704 = vmatprep.subr.bf16.mxu0 %v10312_v62  ;;  %v2835_v62 = vshll.u32 %v2757_v10, 16  ;;  %v10403_v10 = vld [vmem:[#allocation7 + $0x9d0] ss:$8 sps:$4 sm:$0xff]  }
 0x31b   : > { %v2833_v22 = vor.u32 %v2832_v18, %v2828_v14  ;;  %v12338_v14 = vld [vmem:[#allocation2 + $0x28] sm:$0xfe] }
 0x31c   : > { %v2837_v6 = vrot.slane %v2835_v62, 1  ;;  %v10406_v62 = vld [vmem:[#allocation7 + $0x9e0] ss:$8 sps:$4 sm:$0xff]   ;;  %v11041_v18 = vld [vmem:[#allocation10 + $0x414] ss:$8 sps:$4 sm:$0xff]  }
 0x31d   : > { %2705 = vmatpush1.bf16.msra.mxu0 %v10310_v20  ;;  %v2868_v20 = vrot.slane %v2866_v11, 1 }
 0x31e   : > { %2706 = vmatprep.subr.bf16.mxu0 %v10315_v21  ;;  %v2871_v21 = vshll.u32 %v2760_v12, 16  ;;  %v10408_v12 = vld [vmem:[#allocation7 + $0x9e4] ss:$8 sps:$4 sm:$0xff]  }
 0x320   : > { %v2873_v25 = vrot.slane %v2871_v21, 1  ;;  %v10411_v21 = vld [vmem:[#allocation7 + $0x9f4] ss:$8 sps:$4 sm:$0xff]  }
 0x321   : > { %2707 = vmatpush1.bf16.msra.mxu0 %v10313_v23  ;;  %v10366_v23 = vld [vmem:[#allocation7 + $0x904] ss:$8 sps:$4 sm:$0xff]  }
 0x322   : > { %3199 = vmatprep.subr.bf16.mxu0 %v10318_v24  ;;  %v2869_v24 = vor.u32 %v2868_v20, %v2864_v19 }
 0x324   : > { %2709 = vmatmul.mubr.bf16.vlgmr.msra.gmra.mrb[0].mxu0 %v12275_v41  ;;  %v10336_v41 = vld [vmem:[#allocation7 + $0x864] ss:$8 sps:$4 sm:$0xff]  }
 0x325   : > { %3200 = vmatpush1.bf16.msra.mxu0 %v10316_v27  ;;  %3231 = vmatprep.mubr.bf16.mxu0 %v2850_v30  ;;  %v2838_v27 = vsel %vm2826_vm11, %v2833_v22, %v2837_v6  ;;  %v2874_v30 = vsel %vm2826_vm11, %v2869_v24, %v2873_v25  ;;  %v10409_v6 = vld [vmem:[#allocation7 + $0x9f0] ss:$8 sps:$4 sm:$0xff]   ;;  %v10414_v25 = vld [vmem:[#allocation7 + $0xa04] ss:$8 sps:$4 sm:$0xff]  }
 0x326   : > { %3201 = vmatprep.subr.bf16.mxu0 %v10321_v28  ;;  %v10369_v28 = vld [vmem:[#allocation7 + $0x914] ss:$8 sps:$4 sm:$0xff]  }
 0x329   : > { %3202 = vmatpush1.bf16.msra.mxu0 %v10319_v44  ;;  %v10367_v44 = vld [vmem:[#allocation7 + $0x910] ss:$8 sps:$4 sm:$0xff]  }
 0x32a   : > { %3203 = vmatprep.subr.bf16.mxu0 %v10324_v32  ;;  %v10372_v32 = vld [vmem:[#allocation7 + $0x924] ss:$8 sps:$4 sm:$0xff]  }
 0x32d   : > { %3204 = vmatpush1.bf16.msra.mxu0 %v10322_v33  ;;  %v10370_v33 = vld [vmem:[#allocation7 + $0x920] ss:$8 sps:$4 sm:$0xff]  }
 0x32e   : > { %3205 = vmatprep.subr.bf16.mxu0 %v10327_v34  ;;  %v10375_v34 = vld [vmem:[#allocation7 + $0x934] ss:$8 sps:$4 sm:$0xff]  }
 0x331   : > { %3206 = vmatpush1.bf16.msra.mxu0 %v10325_v35  ;;  %v10373_v35 = vld [vmem:[#allocation7 + $0x930] ss:$8 sps:$4 sm:$0xff]  }
 0x332   : > { %3207 = vmatprep.subr.bf16.mxu0 %v10330_v36  ;;  %v10378_v36 = vld [vmem:[#allocation7 + $0x944] ss:$8 sps:$4 sm:$0xff]  }
 0x335   : > { %3208 = vmatpush1.bf16.msra.mxu0 %v10328_v37  ;;  %v10376_v37 = vld [vmem:[#allocation7 + $0x940] ss:$8 sps:$4 sm:$0xff]  }
 0x336   : > { %3209 = vmatprep.subr.bf16.mxu0 %v10333_v0  ;;  %v10381_v0 = vld [vmem:[#allocation7 + $0x954] ss:$8 sps:$4 sm:$0xff]  }
 0x339   : > { %3210 = vmatpush1.bf16.msra.mxu0 %v10331_v38  ;;  %v10379_v38 = vld [vmem:[#allocation7 + $0x950] ss:$8 sps:$4 sm:$0xff]  }
 0x33a   : > { %3211 = vmatprep.subr.bf16.mxu0 %v10336_v41  ;;  %v10384_v41 = vld [vmem:[#allocation7 + $0x964] ss:$8 sps:$4 sm:$0xff]  }
 0x33d   : > { %3212 = vmatpush1.bf16.msra.mxu0 %v10334_v39  ;;  %v10382_v39 = vld [vmem:[#allocation7 + $0x960] ss:$8 sps:$4 sm:$0xff]  }
 0x33e   : > { %3213 = vmatprep.subr.bf16.mxu0 %v10339_v40  ;;  %v10387_v40 = vld [vmem:[#allocation7 + $0x974] ss:$8 sps:$4 sm:$0xff]  }
 0x341   : > { %3214 = vmatpush1.bf16.msra.mxu0 %v10337_v43  ;;  %v10385_v43 = vld [vmem:[#allocation7 + $0x970] ss:$8 sps:$4 sm:$0xff]  }
 0x342   : > { %3215 = vmatprep.subr.bf16.mxu0 %v10342_v45  ;;  %v10390_v45 = vld [vmem:[#allocation7 + $0x984] ss:$8 sps:$4 sm:$0xff]  }
 0x345   : > { %3216 = vmatpush1.bf16.msra.mxu0 %v10340_v46  ;;  %v10388_v46 = vld [vmem:[#allocation7 + $0x980] ss:$8 sps:$4 sm:$0xff]  }
 0x346   : > { %3217 = vmatprep.subr.bf16.mxu0 %v10345_v48  ;;  %v10393_v48 = vld [vmem:[#allocation7 + $0x994] ss:$8 sps:$4 sm:$0xff]  }
 0x349   : > { %3218 = vmatpush1.bf16.msra.mxu0 %v10343_v47  ;;  %v10391_v47 = vld [vmem:[#allocation7 + $0x990] ss:$8 sps:$4 sm:$0xff]  }
 0x34a   : > { %3219 = vmatprep.subr.bf16.mxu0 %v10348_v51  ;;  %v10396_v51 = vld [vmem:[#allocation7 + $0x9a4] ss:$8 sps:$4 sm:$0xff]  }
 0x34d   : > { %3220 = vmatpush1.bf16.msra.mxu0 %v10346_v49  ;;  %v10394_v49 = vld [vmem:[#allocation7 + $0x9a0] ss:$8 sps:$4 sm:$0xff]  }
 0x34e   : > { %3221 = vmatprep.subr.bf16.mxu0 %v10351_v52  ;;  %v10399_v52 = vld [vmem:[#allocation7 + $0x9b4] ss:$8 sps:$4 sm:$0xff]  }
 0x351   : > { %3222 = vmatpush1.bf16.msra.mxu0 %v10349_v53  ;;  %v10397_v53 = vld [vmem:[#allocation7 + $0x9b0] ss:$8 sps:$4 sm:$0xff]  }
 0x352   : > { %3223 = vmatprep.subr.bf16.mxu0 %v10354_v55  ;;  %v3301_v55 = vsel %vm3299_vm14, 65537, %v12290_v54 }
 0x355   : > { %3224 = vmatpush1.bf16.msra.mxu0 %v10352_v58  ;;  %v2725_v58 = vld [vmem:[#allocation2 + $0x30] sm:$0xff] }
 0x356   : > { %3225 = vmatprep.subr.bf16.mxu0 %v10357_v60  ;;  %v9064_v60 = vcombine.low %v3301_v55, %v3302_v31  ;;  %v10445_v55 = vld [vmem:[#allocation7 + $0xab0] ss:$8 sps:$4 sm:$0xff]   ;;  %v10450_v31 = vld [vmem:[#allocation7 + $0xac4] ss:$8 sps:$4 sm:$0xff]  }
 0x359   : > { %3226 = vmatpush1.bf16.msra.mxu0 %v10355_v4  ;;  %v2755_v4 = vsel %vm2751_vm9, %v2725_v58, 0  ;;  %v10453_v58 = vld [vmem:[#allocation7 + $0xad4] ss:$8 sps:$4 sm:$0xff]  }
 0x35a   : > { %3227 = vmatprep.subr.bf16.mxu0 %v10360_v7  ;;  %v3306_v7 = vrot.slane %v9064_v60, 7  ;;  %v2854_v11 = vshll.u32 %v2755_v4, 16  ;;  %v10451_v60 = vld [vmem:[#allocation7 + $0xad0] ss:$8 sps:$4 sm:$0xff]  }
 0x35c   : > { %vm12340_vm3 = vcmp.ne.s16.totalorder %v3306_v7, 0  ;;  %v2856_v19 = vrot.slane %v2854_v11, 1  ;;  %v10454_v7 = vld [vmem:[#allocation7 + $0xae0] ss:$8 sps:$4 sm:$0xff]  }
 0x35d   : > { %3228 = vmatpush1.bf16.msra.mxu0 %v10358_v13  ;;  %v2759_v13 = vsel %vm2752_vm10, %v12333_v5, 0  ;;  %v3313_v22 = vsel %vm12340_vm3, %v12303_v17, 0  ;;  %v10415_v17 = vld [vmem:[#allocation7 + $0xa10] ss:$8 sps:$4 sm:$0xff]  }
 0x35e   : > { %3229 = vmatprep.subr.bf16.mxu0 %v10363_v50  ;;  %v2852_v50 = vshrl.u32 %v2755_v4, 16  ;;  %v2859_v20 = vshll.u32 %v2759_v13, 16  ;;  %v12354_v4 = vld [vmem:[#allocation2 + $0x38] sm:$0xfe] }
 0x35f   : > { %v3311_v13 = vsel %vm12340_vm3, %v12354_v4, 0 }
 0x360   : > { %v2861_v24 = vrot.slane %v2859_v20, 1 }
 0x361   : > { %3230 = vmatpush1.bf16.msra.mxu0 %v10361_v42  ;;  %v3309_v42 = vsel %vm12340_vm3, %v12338_v14, 0 }
 0x362   : > { %3242 = vmatprep.subr.bf16.mxu0 %v10366_v23  ;;  %v2857_v23 = vor.u32 %v2856_v19, %v2852_v50  ;;  %v10457_v50 = vld [vmem:[#allocation7 + $0xaf0] ss:$8 sps:$4 sm:$0xff]  }
 0x364   : > { %3232 = vmatmul.mubr.bf16.vlgmr.msra.gmra.mrb[0].mxu0 %v2838_v27  ;;  %v3394_v27 = vrot.slane %v3313_v22, 1 }
 0x365   : > { %3243 = vmatpush1.bf16.msra.mxu0 %v10364_v26  ;;  %3274 = vmatprep.mubr.bf16.mxu0 %v2874_v30  ;;  %v3393_v26 = vrot.slane %v3309_v42, 1  ;;  %v2862_v30 = vsel %vm2826_vm11, %v2857_v23, %v2861_v24  ;;  %v3399_v42 = vrot.slane %v3311_v13, 1  ;;  %v10465_v23 = vld [vmem:[#allocation7 + $0xb14] ss:$8 sps:$4 sm:$0xff]  }
 0x366   : > { %3244 = vmatprep.subr.bf16.mxu0 %v10369_v28  ;;  %v10412_v28 = vld [vmem:[#allocation7 + $0xa00] ss:$8 sps:$4 sm:$0xff]  }
 0x369   : > { %3245 = vmatpush1.bf16.msra.mxu0 %v10367_v44  ;;  %v10417_v44 = vld [vmem:[#allocation7 + $0xa14] ss:$8 sps:$4 sm:$0xff]  }
 0x36a   : > { %3246 = vmatprep.subr.bf16.mxu0 %v10372_v32  ;;  %v3395_v32 = vsel %vm3389_vm6, %v3393_v26, %v3394_v27  ;;  %v10466_v26 = vld [vmem:[#allocation7 + $0xb20] ss:$8 sps:$4 sm:$0xff]   ;;  %v10471_v27 = vld [vmem:[#allocation7 + $0xb34] ss:$8 sps:$4 sm:$0xff]  }
 0x36d   : > { %3247 = vmatpush1.bf16.msra.mxu0 %v10370_v33  ;;  %v10420_v33 = vld [vmem:[#allocation7 + $0xa24] ss:$8 sps:$4 sm:$0xff]  }
 0x36e   : > { %3248 = vmatprep.subr.bf16.mxu0 %v10375_v34  ;;  %v10418_v34 = vld [vmem:[#allocation7 + $0xa20] ss:$8 sps:$4 sm:$0xff]  }
 0x371   : > { %3249 = vmatpush1.bf16.msra.mxu0 %v10373_v35  ;;  %v10423_v35 = vld [vmem:[#allocation7 + $0xa34] ss:$8 sps:$4 sm:$0xff]  }
 0x372   : > { %3250 = vmatprep.subr.bf16.mxu0 %v10378_v36  ;;  %v10421_v36 = vld [vmem:[#allocation7 + $0xa30] ss:$8 sps:$4 sm:$0xff]  }
 0x375   : > { %3251 = vmatpush1.bf16.msra.mxu0 %v10376_v37  ;;  %v10426_v37 = vld [vmem:[#allocation7 + $0xa44] ss:$8 sps:$4 sm:$0xff]  }
 0x376   : > { %3252 = vmatprep.subr.bf16.mxu0 %v10381_v0  ;;  %v10424_v0 = vld [vmem:[#allocation7 + $0xa40] ss:$8 sps:$4 sm:$0xff]  }
 0x379   : > { %3253 = vmatpush1.bf16.msra.mxu0 %v10379_v38  ;;  %v10429_v38 = vld [vmem:[#allocation7 + $0xa54] ss:$8 sps:$4 sm:$0xff]  }
 0x37a   : > { %3254 = vmatprep.subr.bf16.mxu0 %v10384_v41  ;;  %v10427_v41 = vld [vmem:[#allocation7 + $0xa50] ss:$8 sps:$4 sm:$0xff]  }
 0x37d   : > { %3255 = vmatpush1.bf16.msra.mxu0 %v10382_v39  ;;  %v10432_v39 = vld [vmem:[#allocation7 + $0xa64] ss:$8 sps:$4 sm:$0xff]  }
 0x37e   : > { %3256 = vmatprep.subr.bf16.mxu0 %v10387_v40  ;;  %v10430_v40 = vld [vmem:[#allocation7 + $0xa60] ss:$8 sps:$4 sm:$0xff]  }
 0x381   : > { %3257 = vmatpush1.bf16.msra.mxu0 %v10385_v43  ;;  %v10435_v43 = vld [vmem:[#allocation7 + $0xa74] ss:$8 sps:$4 sm:$0xff]  }
 0x382   : > { %3258 = vmatprep.subr.bf16.mxu0 %v10390_v45  ;;  %v10433_v45 = vld [vmem:[#allocation7 + $0xa70] ss:$8 sps:$4 sm:$0xff]  }
 0x385   : > { %3259 = vmatpush1.bf16.msra.mxu0 %v10388_v46  ;;  %v10438_v46 = vld [vmem:[#allocation7 + $0xa84] ss:$8 sps:$4 sm:$0xff]  }
 0x386   : > { %3260 = vmatprep.subr.bf16.mxu0 %v10393_v48  ;;  %v10436_v48 = vld [vmem:[#allocation7 + $0xa80] ss:$8 sps:$4 sm:$0xff]  }
 0x389   : > { %3261 = vmatpush1.bf16.msra.mxu0 %v10391_v47  ;;  %v10441_v47 = vld [vmem:[#allocation7 + $0xa94] ss:$8 sps:$4 sm:$0xff]  }
 0x38a   : > { %3262 = vmatprep.subr.bf16.mxu0 %v10396_v51  ;;  %v10439_v51 = vld [vmem:[#allocation7 + $0xa90] ss:$8 sps:$4 sm:$0xff]  }
 0x38d   : > { %3263 = vmatpush1.bf16.msra.mxu0 %v10394_v49  ;;  %v10444_v49 = vld [vmem:[#allocation7 + $0xaa4] ss:$8 sps:$4 sm:$0xff]  }
 0x38e   : > { %3264 = vmatprep.subr.bf16.mxu0 %v10399_v52  ;;  %v10442_v52 = vld [vmem:[#allocation7 + $0xaa0] ss:$8 sps:$4 sm:$0xff]  }
 0x391   : > { %3265 = vmatpush1.bf16.msra.mxu0 %v10397_v53  ;;  %v10447_v53 = vld [vmem:[#allocation7 + $0xab4] ss:$8 sps:$4 sm:$0xff]  }
 0x392   : > { %3266 = vmatprep.subr.bf16.mxu0 %v10402_v57  ;;  %v10448_v57 = vld [vmem:[#allocation7 + $0xac0] ss:$8 sps:$4 sm:$0xff]  }
 0x395   : > { %3267 = vmatpush1.bf16.msra.mxu0 %v10400_v61  ;;  %v10456_v61 = vld [vmem:[#allocation7 + $0xae4] ss:$8 sps:$4 sm:$0xff]  }
 0x396   : > { %3268 = vmatprep.subr.bf16.mxu0 %v10405_v1  ;;  %v12352_v1 = vld [vmem:[#allocation2 + $0x20] sm:$0xfe] }
 0x397   : > { %v3308_v11 = vsel %vm12340_vm3, %v12352_v1, 0 }
 0x398   : > { %v3390_v19 = vrot.slane %v3308_v11, 1  ;;  %v10504_v11 = vld [vmem:[#allocation7 + $0xbe4] ss:$8 sps:$4 sm:$0xff]  }
 0x399   : > { %3269 = vmatpush1.bf16.msra.mxu0 %v10403_v10  ;;  %v10459_v10 = vld [vmem:[#allocation7 + $0xaf4] ss:$8 sps:$4 sm:$0xff]  }
 0x39a   : > { %3270 = vmatprep.subr.bf16.mxu0 %v10408_v12  ;;  %v3312_v12 = vsel %vm12340_vm3, %v12313_v63, 0 }
 0x39b   : > { %v3391_v20 = vrot.slane %v3312_v12, 1  ;;  %v12383_v12 = vld [vmem:[#allocation2 + $0x30] sm:$0xfe] }
 0x39d   : > { %3271 = vmatpush1.bf16.msra.mxu0 %v10406_v62  ;;  %v3315_v62 = vsel %vm12340_vm3, %v12317_v2, 0  ;;  %v3392_v63 = vsel %vm3389_vm6, %v3390_v19, %v3391_v20  ;;  %v10468_v2 = vld [vmem:[#allocation7 + $0xb24] ss:$8 sps:$4 sm:$0xff]   ;;  %v10502_v20 = vld [vmem:[#allocation7 + $0xbe0] ss:$8 sps:$4 sm:$0xff]  }
 0x39e   : > { %3272 = vmatprep.subr.bf16.mxu0 %v10411_v21  ;;  %v10462_v21 = vld [vmem:[#allocation7 + $0xb04] ss:$8 sps:$4 sm:$0xff]   ;;  %v3400_v22 = vrot.slane %v3315_v62, 1 }
 0x3a0   : > { %v3401_v24 = vsel %vm3389_vm6, %v3399_v42, %v3400_v22  ;;  %v10507_v42 = vld [vmem:[#allocation7 + $0xbf4] ss:$8 sps:$4 sm:$0xff]  }
 0x3a1   : > { %3273 = vmatpush1.bf16.msra.mxu0 %v10409_v6  ;;  %v10460_v6 = vld [vmem:[#allocation7 + $0xb00] ss:$8 sps:$4 sm:$0xff]  }
 0x3a2   : > { %3726 = vmatprep.subr.bf16.mxu0 %v10414_v25  ;;  %v10463_v25 = vld [vmem:[#allocation7 + $0xb10] ss:$8 sps:$4 sm:$0xff]  }
 0x3a4   : > { %3275 = vmatmul.mubr.bf16.vlgmr.msra.gmra.mrb[0].mxu0 %v2862_v30  ;;  %v10474_v30 = vld [vmem:[#allocation7 + $0xb44] ss:$8 sps:$4 sm:$0xff]  }
 0x3a5   : > { %3727 = vmatpush1.bf16.msra.mxu0 %v10412_v28  ;;  %3758 = vmatprep.mubr.bf16.mxu0 %v3395_v32  ;;  %v10469_v28 = vld [vmem:[#allocation7 + $0xb30] ss:$8 sps:$4 sm:$0xff]   ;;  %v10477_v32 = vld [vmem:[#allocation7 + $0xb54] ss:$8 sps:$4 sm:$0xff]  }
 0x3a6   : > { %3728 = vmatprep.subr.bf16.mxu0 %v10417_v44  ;;  %v10472_v44 = vld [vmem:[#allocation7 + $0xb40] ss:$8 sps:$4 sm:$0xff]  }
 0x3a9   : > { %3729 = vmatpush1.bf16.msra.mxu0 %v10415_v17  ;;  %v10475_v17 = vld [vmem:[#allocation7 + $0xb50] ss:$8 sps:$4 sm:$0xff]  }
 0x3aa   : > { %3730 = vmatprep.subr.bf16.mxu0 %v10420_v33  ;;  %v10480_v33 = vld [vmem:[#allocation7 + $0xb64] ss:$8 sps:$4 sm:$0xff]  }
 0x3ad   : > { %3731 = vmatpush1.bf16.msra.mxu0 %v10418_v34  ;;  %v10478_v34 = vld [vmem:[#allocation7 + $0xb60] ss:$8 sps:$4 sm:$0xff]  }
 0x3ae   : > { %3732 = vmatprep.subr.bf16.mxu0 %v10423_v35  ;;  %v10483_v35 = vld [vmem:[#allocation7 + $0xb74] ss:$8 sps:$4 sm:$0xff]  }
 0x3b1   : > { %3733 = vmatpush1.bf16.msra.mxu0 %v10421_v36  ;;  %v3828_v36 = vsel %vm3826_vm12, 65537, %v12290_v54 }
 0x3b2   : > { %3734 = vmatprep.subr.bf16.mxu0 %v10426_v37  ;;  %v3829_v37 = vsel %vm3827_vm13, 65537, %v12290_v54  ;;  %v10495_v54 = vld [vmem:[#allocation7 + $0xbb4] ss:$8 sps:$4 sm:$0xff]   ;;  %vm6864_vm13 = vcmask 1045504  }
 0x3b5   : > { %3735 = vmatpush1.bf16.msra.mxu0 %v10424_v0  ;;  %v10481_v0 = vld [vmem:[#allocation7 + $0xb70] ss:$8 sps:$4 sm:$0xff]  }
 0x3b6   : > { %3736 = vmatprep.subr.bf16.mxu0 %v10429_v38  ;;  %v10486_v38 = vld [vmem:[#allocation7 + $0xb84] ss:$8 sps:$4 sm:$0xff]  }
 0x3b9   : > { %3737 = vmatpush1.bf16.msra.mxu0 %v10427_v41  ;;  %v9129_v41 = vcombine.low %v3828_v36, %v3829_v37  ;;  %v10516_v36 = vld [vmem:[#allocation7 + $0xc24] ss:$8 sps:$4 sm:$0xff]   ;;  %v10609_v37 = vld [vmem:[#allocation9 + $0x110] ss:$8 sps:$4 sm:$0xff]  }
 0x3ba   : > { %3738 = vmatprep.subr.bf16.mxu0 %v10432_v39  ;;  %v10484_v39 = vld [vmem:[#allocation7 + $0xb80] ss:$8 sps:$4 sm:$0xff]  }
 0x3bd   : > { %3739 = vmatpush1.bf16.msra.mxu0 %v10430_v40  ;;  %v10489_v40 = vld [vmem:[#allocation7 + $0xb94] ss:$8 sps:$4 sm:$0xff]  }
 0x3be   : > { %3740 = vmatprep.subr.bf16.mxu0 %v10435_v43  ;;  %v3834_v43 = vshrl.u32 %v9129_v41, 16 }
 0x3c1   : > { %3741 = vmatpush1.bf16.msra.mxu0 %v10433_v45  ;;  %v3837_v45 = vshll.u32 %v9129_v41, 16  ;;  %v10519_v41 = vld [vmem:[#allocation7 + $0xc34] ss:$8 sps:$4 sm:$0xff]  }
 0x3c2   : > { %3742 = vmatprep.subr.bf16.mxu0 %v10438_v46  ;;  %v10487_v46 = vld [vmem:[#allocation7 + $0xb90] ss:$8 sps:$4 sm:$0xff]  }
 0x3c5   : > { %3743 = vmatpush1.bf16.msra.mxu0 %v10436_v48  ;;  %v10492_v48 = vld [vmem:[#allocation7 + $0xba4] ss:$8 sps:$4 sm:$0xff]  }
 0x3c6   : > { %3744 = vmatprep.subr.bf16.mxu0 %v10441_v47  ;;  %v3836_v47 = vrot.slane %v3834_v43, 6  ;;  %v10517_v43 = vld [vmem:[#allocation7 + $0xc30] ss:$8 sps:$4 sm:$0xff]  }
 0x3c9   : > { %3745 = vmatpush1.bf16.msra.mxu0 %v10439_v51  ;;  %v3839_v51 = vrot.slane %v3837_v45, 7  ;;  %v10522_v45 = vld [vmem:[#allocation7 + $0xc44] ss:$8 sps:$4 sm:$0xff]  }
 0x3ca   : > { %3746 = vmatprep.subr.bf16.mxu0 %v10444_v49  ;;  %v10490_v49 = vld [vmem:[#allocation7 + $0xba0] ss:$8 sps:$4 sm:$0xff]  }
 0x3cd   : > { %3747 = vmatpush1.bf16.msra.mxu0 %v10442_v52  ;;  %v3840_v52 = vor.u32 %v3839_v51, %v3836_v47  ;;  %v10520_v47 = vld [vmem:[#allocation7 + $0xc40] ss:$8 sps:$4 sm:$0xff]   ;;  %v10525_v51 = vld [vmem:[#allocation7 + $0xc54] ss:$8 sps:$4 sm:$0xff]  }
 0x3ce   : > { %3748 = vmatprep.subr.bf16.mxu0 %v10447_v53  ;;  %v10493_v53 = vld [vmem:[#allocation7 + $0xbb0] ss:$8 sps:$4 sm:$0xff]  }
 0x3cf   : > { %vm12374_vm14 = vcmp.ne.s16.totalorder %v3840_v52, 0  ;;  %v10523_v52 = vld [vmem:[#allocation7 + $0xc50] ss:$8 sps:$4 sm:$0xff]  }
 0x3d1   : > { %3749 = vmatpush1.bf16.msra.mxu0 %v10445_v55  ;;  %v10498_v55 = vld [vmem:[#allocation7 + $0xbc4] ss:$8 sps:$4 sm:$0xff]  }
 0x3d2   : > { %3750 = vmatprep.subr.bf16.mxu0 %v10450_v31 }
 0x3d5   : > { %3751 = vmatpush1.bf16.msra.mxu0 %v10448_v57  ;;  %v3817_v57 = vld [vmem:[#allocation2 + $0x48] sm:$0x3] }
 0x3d6   : > { %3752 = vmatprep.subr.bf16.mxu0 %v10453_v58  ;;  %v10496_v58 = vld [vmem:[#allocation7 + $0xbc0] ss:$8 sps:$4 sm:$0xff]  }
 0x3d9   : > { %3753 = vmatpush1.bf16.msra.mxu0 %v10451_v60  ;;  %v10501_v60 = vld [vmem:[#allocation7 + $0xbd4] ss:$8 sps:$4 sm:$0xff]  }
 0x3da   : > { %3754 = vmatprep.subr.bf16.mxu0 %v10456_v61  ;;  %v3843_v61 = vsel %vm12374_vm14, %v12338_v14, 0  ;;  %v3314_v14 = vsel %vm12340_vm3, %v12333_v5, 0  ;;  %v10513_v5 = vld [vmem:[#allocation7 + $0xc14] ss:$8 sps:$4 sm:$0xff]  }
 0x3db   : > { %v3934_v13 = vshrl.u32 %v3843_v61, 16  ;;  %v3937_v62 = vshll.u32 %v3843_v61, 16  ;;  %v10624_v61 = vld [vmem:[#allocation9 + $0x160] ss:$8 sps:$4 sm:$0xff]  }
 0x3dd   : > { %3755 = vmatpush1.bf16.msra.mxu0 %v10454_v7  ;;  %v3847_v7 = vsel %vm12374_vm14, %v3817_v57, 0  ;;  %v3936_v22 = vrot.slane %v3934_v13, 1  ;;  %v10622_v57 = vld [vmem:[#allocation9 + $0x164] ss:$8 sps:$4 sm:$0xff]   ;;  %v10627_v13 = vld [vmem:[#allocation9 + $0x170] ss:$8 sps:$4 sm:$0xff]  }
 0x3de   : > { %3756 = vmatprep.subr.bf16.mxu0 %v10459_v10  ;;  %v10499_v10 = vld [vmem:[#allocation7 + $0xbd0] ss:$8 sps:$4 sm:$0xff]   ;;  %v3945_v19 = vshll.u32 %v3847_v7, 16 }
 0x3e1   : > { %3757 = vmatpush1.bf16.msra.mxu0 %v10457_v50  ;;  %v3942_v50 = vshrl.u32 %v3847_v7, 16  ;;  %v10625_v7 = vld [vmem:[#allocation9 + $0x174] ss:$8 sps:$4 sm:$0xff]  }
 0x3e2   : > { %3769 = vmatprep.subr.bf16.mxu0 %v10462_v21  ;;  %v3310_v21 = vsel %vm12340_vm3, %v12383_v12, 0 }
 0x3e4   : > { %3759 = vmatmul.mubr.bf16.vlgmr.msra.gmra.mrb[0].mxu0 %v3392_v63  ;;  %v3944_v63 = vrot.slane %v3942_v50, 1  ;;  %v10532_v50 = vld [vmem:[#allocation7 + $0xc80] ss:$8 sps:$4 sm:$0xff]  }
 0x3e5   : > { %3770 = vmatpush1.bf16.msra.mxu0 %v10460_v6  ;;  %3801 = vmatprep.mubr.bf16.mxu0 %v3401_v24  ;;  %v3939_v6 = vrot.slane %v3937_v62, 2  ;;  %v10505_v24 = vld [vmem:[#allocation7 + $0xbf0] ss:$8 sps:$4 sm:$0xff]   ;;  %v10628_v62 = vld [vmem:[#allocation9 + $0x184] ss:$8 sps:$4 sm:$0xff]  }
 0x3e6   : > { %3771 = vmatprep.subr.bf16.mxu0 %v10465_v23  ;;  %v3947_v23 = vrot.slane %v3945_v19, 2  ;;  %v10537_v19 = vld [vmem:[#allocation7 + $0xc94] ss:$8 sps:$4 sm:$0xff]  }
 0x3e9   : > { %3772 = vmatpush1.bf16.msra.mxu0 %v10463_v25  ;;  %v3396_v25 = vrot.slane %v3310_v21, 1  ;;  %v10535_v21 = vld [vmem:[#allocation7 + $0xc90] ss:$8 sps:$4 sm:$0xff]  }
 0x3ea   : > { %3773 = vmatprep.subr.bf16.mxu0 %v10468_v2  ;;  %v3397_v2 = vrot.slane %v3314_v14, 1  ;;  %v10540_v14 = vld [vmem:[#allocation7 + $0xca4] ss:$8 sps:$4 sm:$0xff]  }
 0x3ed   : > { %3774 = vmatpush1.bf16.msra.mxu0 %v10466_v26  ;;  %v10510_v26 = vld [vmem:[#allocation7 + $0xc04] ss:$8 sps:$4 sm:$0xff]  }
 0x3ee   : > { %3775 = vmatprep.subr.bf16.mxu0 %v10471_v27  ;;  %v3940_v27 = vor.u32 %v3939_v6, %v3936_v22  ;;  %v10543_v22 = vld [vmem:[#allocation7 + $0xcb4] ss:$8 sps:$4 sm:$0xff]   ;;  %v10541_v6 = vld [vmem:[#allocation7 + $0xcb0] ss:$8 sps:$4 sm:$0xff]  }
 0x3f1   : > { %3776 = vmatpush1.bf16.msra.mxu0 %v10469_v28  ;;  %v3948_v28 = vor.u32 %v3947_v23, %v3944_v63  ;;  %v10546_v63 = vld [vmem:[#allocation7 + $0xcc4] ss:$8 sps:$4 sm:$0xff]   ;;  %v3816_v23 = vld [vmem:[#allocation2 + $0x40] sm:$0x3] }
 0x3f2   : > { %3777 = vmatprep.subr.bf16.mxu0 %v10474_v30  ;;  %v10508_v30 = vld [vmem:[#allocation7 + $0xc00] ss:$8 sps:$4 sm:$0xff]  }
 0x3f5   : > { %3778 = vmatpush1.bf16.msra.mxu0 %v10472_v44  ;;  %v3398_v44 = vsel %vm3389_vm6, %v3396_v25, %v3397_v2  ;;  %v10544_v25 = vld [vmem:[#allocation7 + $0xcc0] ss:$8 sps:$4 sm:$0xff]   ;;  %v3842_v2 = vsel %vm12374_vm14, %v12352_v1, 0  ;;  %v10552_v1 = vld [vmem:[#allocation7 + $0xce4] ss:$8 sps:$4 sm:$0xff]  }
 0x3f6   : > { %3779 = vmatprep.subr.bf16.mxu0 %v10477_v32  ;;  %v3949_v32 = vsel %vm3915_vm15, %v3940_v27, %v3948_v28  ;;  %v3846_v27 = vsel %vm12374_vm14, %v3816_v23, 0  ;;  %v3845_v28 = vsel %vm12374_vm14, %v12354_v4, 0  ;;  %v10585_v23 = vld [vmem:[#allocation7 + $0xd94] ss:$8 sps:$4 sm:$0xff]  }
 0x3f9   : > { %3780 = vmatpush1.bf16.msra.mxu0 %v10475_v17  ;;  %v10604_v17 = vld [vmem:[#allocation9 + $0x104] ss:$8 sps:$4 sm:$0xff]  }
 0x3fa   : > { %3781 = vmatprep.subr.bf16.mxu0 %v10480_v33  ;;  %v10606_v33 = vld [vmem:[#allocation9 + $0x100] ss:$8 sps:$4 sm:$0xff]   ;;  %4703 = vmatprep.subr.bf16.mxu1 %v10604_v17  ;;  %v3925_v17 = vshrl.u32 %v3846_v27, 16 }
 0x3fb   : > { %4704 = vmatpush1.bf16.msra.mxu1 %v10606_v33  ;;  %v3928_v33 = vshll.u32 %v3846_v27, 16  ;;  %v10589_v27 = vld [vmem:[#allocation7 + $0xdb0] ss:$8 sps:$4 sm:$0xff]  }
 0x3fc   : > { %v3927_v4 = vrot.slane %v3925_v17, 1 }
 0x3fd   : > { %3782 = vmatpush1.bf16.msra.mxu0 %v10478_v34  ;;  %v10607_v34 = vld [vmem:[#allocation9 + $0x114] ss:$8 sps:$4 sm:$0xff]  }
 0x3fe   : > { %3783 = vmatprep.subr.bf16.mxu0 %v10483_v35  ;;  %v10511_v35 = vld [vmem:[#allocation7 + $0xc10] ss:$8 sps:$4 sm:$0xff]   ;;  %4705 = vmatprep.subr.bf16.mxu1 %v10607_v34  ;;  %v3968_v34 = vshrl.u32 %v3845_v28, 16 }
 0x3ff   : > { %4706 = vmatpush1.bf16.msra.mxu1 %v10609_v37 }
 0x401   : > { %3784 = vmatpush1.bf16.msra.mxu0 %v10481_v0  ;;  %v10610_v0 = vld [vmem:[#allocation9 + $0x124] ss:$8 sps:$4 sm:$0xff]  }
 0x402   : > { %3785 = vmatprep.subr.bf16.mxu0 %v10486_v38  ;;  %v10514_v38 = vld [vmem:[#allocation7 + $0xc20] ss:$8 sps:$4 sm:$0xff]   ;;  %4707 = vmatprep.subr.bf16.mxu1 %v10610_v0 }
 0x403   : > { %v10550_v0 = vld [vmem:[#allocation7 + $0xce0] ss:$8 sps:$4 sm:$0xff]  }
 0x405   : > { %3786 = vmatpush1.bf16.msra.mxu0 %v10484_v39  ;;  %v10612_v39 = vld [vmem:[#allocation9 + $0x120] ss:$8 sps:$4 sm:$0xff]  }
 0x406   : > { %3787 = vmatprep.subr.bf16.mxu0 %v10489_v40  ;;  %v10613_v40 = vld [vmem:[#allocation9 + $0x134] ss:$8 sps:$4 sm:$0xff]   ;;  %4708 = vmatpush1.bf16.msra.mxu1 %v10612_v39  ;;  %v3930_v39 = vrot.slane %v3928_v33, 2  ;;  %v10595_v33 = vld [vmem:[#allocation7 + $0xdd0] ss:$8 sps:$4 sm:$0xff]  }
 0x407   : > { %4709 = vmatprep.subr.bf16.mxu1 %v10613_v40  ;;  %v10555_v40 = vld [vmem:[#allocation7 + $0xcf4] ss:$8 sps:$4 sm:$0xff]  }
 0x409   : > { %3788 = vmatpush1.bf16.msra.mxu0 %v10487_v46  ;;  %v10615_v46 = vld [vmem:[#allocation9 + $0x130] ss:$8 sps:$4 sm:$0xff]  }
 0x40a   : > { %3789 = vmatprep.subr.bf16.mxu0 %v10492_v48  ;;  %v10616_v48 = vld [vmem:[#allocation9 + $0x144] ss:$8 sps:$4 sm:$0xff]   ;;  %4710 = vmatpush1.bf16.msra.mxu1 %v10615_v46 }
 0x40b   : > { %4711 = vmatprep.subr.bf16.mxu1 %v10616_v48 }
 0x40d   : > { %3790 = vmatpush1.bf16.msra.mxu0 %v10490_v49  ;;  %v10618_v49 = vld [vmem:[#allocation9 + $0x140] ss:$8 sps:$4 sm:$0xff]  }
 0x40e   : > { %3791 = vmatprep.subr.bf16.mxu0 %v10495_v54  ;;  %v10619_v54 = vld [vmem:[#allocation9 + $0x154] ss:$8 sps:$4 sm:$0xff]   ;;  %4712 = vmatpush1.bf16.msra.mxu1 %v10618_v49  ;;  %v3931_v49 = vor.u32 %v3930_v39, %v3927_v4 }
 0x40f   : > { %4713 = vmatprep.subr.bf16.mxu1 %v10619_v54  ;;  %v10558_v54 = vld [vmem:[#allocation7 + $0xd04] ss:$8 sps:$4 sm:$0xff]  }
 0x411   : > { %3792 = vmatpush1.bf16.msra.mxu0 %v10493_v53  ;;  %v10528_v53 = vld [vmem:[#allocation7 + $0xc64] ss:$8 sps:$4 sm:$0xff]  }
 0x412   : > { %3793 = vmatprep.subr.bf16.mxu0 %v10498_v55  ;;  %v10621_v55 = vld [vmem:[#allocation9 + $0x150] ss:$8 sps:$4 sm:$0xff]  }
 0x413   : > { %4714 = vmatpush1.bf16.msra.mxu1 %v10621_v55  ;;  %v10556_v55 = vld [vmem:[#allocation7 + $0xd00] ss:$8 sps:$4 sm:$0xff]  }
 0x414   : > { %4715 = vmatprep.subr.bf16.mxu1 %v10622_v57 }
 0x415   : > { %3794 = vmatpush1.bf16.msra.mxu0 %v10496_v58  ;;  %v10526_v58 = vld [vmem:[#allocation7 + $0xc60] ss:$8 sps:$4 sm:$0xff]  }
 0x416   : > { %3795 = vmatprep.subr.bf16.mxu0 %v10501_v60  ;;  %v10531_v60 = vld [vmem:[#allocation7 + $0xc74] ss:$8 sps:$4 sm:$0xff]  }
 0x417   : > { %4716 = vmatpush1.bf16.msra.mxu1 %v10624_v61  ;;  %v10559_v61 = vld [vmem:[#allocation7 + $0xd10] ss:$8 sps:$4 sm:$0xff]  }
 0x418   : > { %4717 = vmatprep.subr.bf16.mxu1 %v10625_v7  ;;  %v10564_v7 = vld [vmem:[#allocation7 + $0xd24] ss:$8 sps:$4 sm:$0xff]  }
 0x419   : > { %3796 = vmatpush1.bf16.msra.mxu0 %v10499_v10  ;;  %v10529_v10 = vld [vmem:[#allocation7 + $0xc70] ss:$8 sps:$4 sm:$0xff]  }
 0x41a   : > { %3797 = vmatprep.subr.bf16.mxu0 %v10504_v11  ;;  %v10534_v11 = vld [vmem:[#allocation7 + $0xc84] ss:$8 sps:$4 sm:$0xff]  }
 0x41b   : > { %4718 = vmatpush1.bf16.msra.mxu1 %v10627_v13  ;;  %v10565_v13 = vld [vmem:[#allocation7 + $0xd30] ss:$8 sps:$4 sm:$0xff]  }
 0x41c   : > { %4719 = vmatprep.subr.bf16.mxu1 %v10628_v62  ;;  %v10570_v62 = vld [vmem:[#allocation7 + $0xd44] ss:$8 sps:$4 sm:$0xff]  }
 0x41d   : > { %3798 = vmatpush1.bf16.msra.mxu0 %v10502_v20  ;;  %v10630_v20 = vld [vmem:[#allocation9 + $0x180] ss:$8 sps:$4 sm:$0xff]  }
 0x41e   : > { %3799 = vmatprep.subr.bf16.mxu0 %v10507_v42  ;;  %v10538_v42 = vld [vmem:[#allocation7 + $0xca0] ss:$8 sps:$4 sm:$0xff]  }
 0x41f   : > { %4720 = vmatpush1.bf16.msra.mxu1 %v10630_v20  ;;  %v10571_v20 = vld [vmem:[#allocation7 + $0xd50] ss:$8 sps:$4 sm:$0xff]  }
 0x421   : > { %3800 = vmatpush1.bf16.msra.mxu0 %v10505_v24  ;;  %v3819_v24 = vld [vmem:[#allocation2 + $0x58] sm:$0x3] }
 0x422   : > { %4308 = vmatprep.subr.bf16.mxu0 %v10510_v26  ;;  %v10549_v26 = vld [vmem:[#allocation7 + $0xcd4] ss:$8 sps:$4 sm:$0xff]  }
 0x424   : > { %3802 = vmatmul.mubr.bf16.vlgmr.msra.gmra.mrb[0].mxu0 %v3398_v44  ;;  %v10547_v44 = vld [vmem:[#allocation7 + $0xcd0] ss:$8 sps:$4 sm:$0xff]  }
 0x425   : > { %4309 = vmatpush1.bf16.msra.mxu0 %v10508_v30  ;;  %4340 = vmatprep.mubr.bf16.mxu0 %v3949_v32  ;;  %v3849_v30 = vsel %vm12374_vm14, %v3819_v24, 0  ;;  %v3920_v32 = vshll.u32 %v3842_v2, 16  ;;  %v10583_v24 = vld [vmem:[#allocation7 + $0xd90] ss:$8 sps:$4 sm:$0xff]  }
 0x426   : > { %4310 = vmatprep.subr.bf16.mxu0 %v10513_v5  ;;  %v3917_v5 = vshrl.u32 %v3842_v2, 16  ;;  %v3979_v37 = vshll.u32 %v3849_v30, 16  ;;  %v10586_v2 = vld [vmem:[#allocation7 + $0xda0] ss:$8 sps:$4 sm:$0xff]  }
 0x428   : > { %v3981_v48 = vrot.slane %v3979_v37, 2  ;;  %v10600_v37 = vld [vmem:[#allocation7 + $0xde4] ss:$8 sps:$4 sm:$0xff]  }
 0x429   : > { %4311 = vmatpush1.bf16.msra.mxu0 %v10511_v35  ;;  %v3971_v35 = vshll.u32 %v3845_v28, 16  ;;  %v10594_v28 = vld [vmem:[#allocation7 + $0xdc4] ss:$8 sps:$4 sm:$0xff]  }
 0x42a   : > { %4312 = vmatprep.subr.bf16.mxu0 %v10516_v36  ;;  %v3976_v36 = vshrl.u32 %v3849_v30, 16  ;;  %v3818_v30 = vld [vmem:[#allocation2 + $0x50] sm:$0x3] }
 0x42b   : > { %v3848_v17 = vsel %vm12374_vm14, %v3818_v30, 0 }
 0x42c   : > { %v3978_v46 = vrot.slane %v3976_v36, 1  ;;  %v3962_v36 = vshll.u32 %v3848_v17, 16 }
 0x42d   : > { %4313 = vmatpush1.bf16.msra.mxu0 %v10514_v38  ;;  %v3919_v38 = vrot.slane %v3917_v5, 1  ;;  %v3844_v5 = vsel %vm12374_vm14, %v12383_v12, 0  ;;  %v10603_v12 = vld [vmem:[#allocation7 + $0xdf4] ss:$8 sps:$4 sm:$0xff]  }
 0x42e   : > { %4314 = vmatprep.subr.bf16.mxu0 %v10519_v41  ;;  %v3922_v41 = vrot.slane %v3920_v32, 2  ;;  %v10597_v32 = vld [vmem:[#allocation7 + $0xdd4] ss:$8 sps:$4 sm:$0xff]   ;;  %v3964_v39 = vrot.slane %v3962_v36, 2 }
 0x431   : > { %4315 = vmatpush1.bf16.msra.mxu0 %v10517_v43  ;;  %v3970_v43 = vrot.slane %v3968_v34, 1  ;;  %v3954_v34 = vshll.u32 %v3844_v5, 16 }
 0x432   : > { %4316 = vmatprep.subr.bf16.mxu0 %v10522_v45  ;;  %v3973_v45 = vrot.slane %v3971_v35, 2  ;;  %v3959_v35 = vshrl.u32 %v3848_v17, 16 }
 0x434   : > { %v3961_v4 = vrot.slane %v3959_v35, 1 }
 0x435   : > { %4317 = vmatpush1.bf16.msra.mxu0 %v10520_v47  ;;  %v10553_v47 = vld [vmem:[#allocation7 + $0xcf0] ss:$8 sps:$4 sm:$0xff]  }
 0x436   : > { %4318 = vmatprep.subr.bf16.mxu0 %v10525_v51  ;;  %v3923_v51 = vor.u32 %v3922_v41, %v3919_v38  ;;  %v3956_v41 = vrot.slane %v3954_v34, 2 }
 0x438   : > { %v3932_v57 = vsel %vm3915_vm15, %v3923_v51, %v3931_v49  ;;  %v10636_v51 = vld [vmem:[#allocation9 + $0x1a0] ss:$8 sps:$4 sm:$0xff]   ;;  %v10637_v49 = vld [vmem:[#allocation9 + $0x1b4] ss:$8 sps:$4 sm:$0xff]  }
 0x439   : > { %4319 = vmatpush1.bf16.msra.mxu0 %v10523_v52  ;;  %v3974_v52 = vor.u32 %v3973_v45, %v3970_v43  ;;  %v3965_v43 = vor.u32 %v3964_v39, %v3961_v4 }
 0x43a   : > { %4320 = vmatprep.subr.bf16.mxu0 %v10528_v53  ;;  %v3982_v53 = vor.u32 %v3981_v48, %v3978_v46  ;;  %v10631_v46 = vld [vmem:[#allocation9 + $0x194] ss:$8 sps:$4 sm:$0xff]   ;;  %v10633_v48 = vld [vmem:[#allocation9 + $0x190] ss:$8 sps:$4 sm:$0xff]  }
 0x43b   : > { %4721 = vmatprep.subr.bf16.mxu1 %v10631_v46 }
 0x43c   : > { %4722 = vmatpush1.bf16.msra.mxu1 %v10633_v48 }
 0x43d   : > { %4321 = vmatpush1.bf16.msra.mxu0 %v10526_v58  ;;  %v10561_v58 = vld [vmem:[#allocation7 + $0xd14] ss:$8 sps:$4 sm:$0xff]  }
 0x43e   : > { %4322 = vmatprep.subr.bf16.mxu0 %v10531_v60  ;;  %v3983_v60 = vsel %vm3915_vm15, %v3974_v52, %v3982_v53  ;;  %v10640_v52 = vld [vmem:[#allocation9 + $0x1c4] ss:$8 sps:$4 sm:$0xff]   ;;  %v10642_v53 = vld [vmem:[#allocation9 + $0x1c0] ss:$8 sps:$4 sm:$0xff]  }
 0x441   : > { %4323 = vmatpush1.bf16.msra.mxu0 %v10529_v10  ;;  %v10562_v10 = vld [vmem:[#allocation7 + $0xd20] ss:$8 sps:$4 sm:$0xff]  }
 0x442   : > { %4324 = vmatprep.subr.bf16.mxu0 %v10534_v11  ;;  %v10567_v11 = vld [vmem:[#allocation7 + $0xd34] ss:$8 sps:$4 sm:$0xff]  }
 0x445   : > { %4325 = vmatpush1.bf16.msra.mxu0 %v10532_v50  ;;  %v10568_v50 = vld [vmem:[#allocation7 + $0xd40] ss:$8 sps:$4 sm:$0xff]  }
 0x446   : > { %4326 = vmatprep.subr.bf16.mxu0 %v10537_v19  ;;  %v10573_v19 = vld [vmem:[#allocation7 + $0xd54] ss:$8 sps:$4 sm:$0xff]  }
 0x449   : > { %4327 = vmatpush1.bf16.msra.mxu0 %v10535_v21  ;;  %v10576_v21 = vld [vmem:[#allocation7 + $0xd64] ss:$8 sps:$4 sm:$0xff]  }
 0x44a   : > { %4328 = vmatprep.subr.bf16.mxu0 %v10540_v14  ;;  %v10574_v14 = vld [vmem:[#allocation7 + $0xd60] ss:$8 sps:$4 sm:$0xff]  }
 0x44d   : > { %4329 = vmatpush1.bf16.msra.mxu0 %v10538_v42  ;;  %v10579_v42 = vld [vmem:[#allocation7 + $0xd74] ss:$8 sps:$4 sm:$0xff]  }
 0x44e   : > { %4330 = vmatprep.subr.bf16.mxu0 %v10543_v22  ;;  %v10577_v22 = vld [vmem:[#allocation7 + $0xd70] ss:$8 sps:$4 sm:$0xff]  }
 0x451   : > { %4331 = vmatpush1.bf16.msra.mxu0 %v10541_v6  ;;  %v10582_v6 = vld [vmem:[#allocation7 + $0xd84] ss:$8 sps:$4 sm:$0xff]  }
 0x452   : > { %4332 = vmatprep.subr.bf16.mxu0 %v10546_v63  ;;  %v10580_v63 = vld [vmem:[#allocation7 + $0xd80] ss:$8 sps:$4 sm:$0xff]  }
 0x455   : > { %4333 = vmatpush1.bf16.msra.mxu0 %v10544_v25  ;;  %v10588_v25 = vld [vmem:[#allocation7 + $0xda4] ss:$8 sps:$4 sm:$0xff]  }
 0x456   : > { %4334 = vmatprep.subr.bf16.mxu0 %v10549_v26  ;;  %v10591_v26 = vld [vmem:[#allocation7 + $0xdb4] ss:$8 sps:$4 sm:$0xff]  }
 0x459   : > { %4335 = vmatpush1.bf16.msra.mxu0 %v10547_v44  ;;  %v10592_v44 = vld [vmem:[#allocation7 + $0xdc0] ss:$8 sps:$4 sm:$0xff]  }
 0x45a   : > { %4336 = vmatprep.subr.bf16.mxu0 %v10552_v1  ;;  %v3951_v1 = vshrl.u32 %v3844_v5, 16 }
 0x45c   : > { %v3953_v38 = vrot.slane %v3951_v1, 1 }
 0x45d   : > { %4337 = vmatpush1.bf16.msra.mxu0 %v10550_v0  ;;  %v10598_v0 = vld [vmem:[#allocation7 + $0xde0] ss:$8 sps:$4 sm:$0xff]  }
 0x45e   : > { %4338 = vmatprep.subr.bf16.mxu0 %v10555_v40  ;;  %v10601_v40 = vld [vmem:[#allocation7 + $0xdf0] ss:$8 sps:$4 sm:$0xff]   ;;  %v3957_v31 = vor.u32 %v3956_v41, %v3953_v38 }
 0x460   : > { %v3966_v45 = vsel %vm3915_vm15, %v3957_v31, %v3965_v43 }
 0x461   : > { %4339 = vmatpush1.bf16.msra.mxu0 %v10553_v47  ;;  %v10634_v47 = vld [vmem:[#allocation9 + $0x1a4] ss:$8 sps:$4 sm:$0xff]  }
 0x462   : > { %4351 = vmatprep.subr.bf16.mxu0 %v10558_v54  ;;  %4723 = vmatprep.subr.bf16.mxu1 %v10634_v47  ;;  %v10639_v54 = vld [vmem:[#allocation9 + $0x1b0] ss:$8 sps:$4 sm:$0xff]  }
 0x463   : > { %4724 = vmatpush1.bf16.msra.mxu1 %v10636_v51  ;;  %v10652_v51 = vld [vmem:[#allocation9] ss:$8 sps:$4 sm:$0xff]  }
 0x464   : > { %4341 = vmatmul.mubr.bf16.vlgmr.msra.gmra.mrb[0].mxu0 %v3932_v57  ;;  %4725 = vmatprep.subr.bf16.mxu1 %v10637_v49  ;;  %v10645_v57 = vld [vmem:[#allocation9 + $0x1d0] ss:$8 sps:$4 sm:$0xff]  }
 0x465   : > { %4352 = vmatpush1.bf16.msra.mxu0 %v10556_v55  ;;  %4383 = vmatprep.mubr.bf16.mxu0 %v3983_v60  ;;  %v10643_v55 = vld [vmem:[#allocation9 + $0x1d4] ss:$8 sps:$4 sm:$0xff]   ;;  %v10648_v60 = vld [vmem:[#allocation9 + $0x1e0] ss:$8 sps:$4 sm:$0xff]  }
 0x466   : > { %4353 = vmatprep.subr.bf16.mxu0 %v10561_v58  ;;  %v10646_v58 = vld [vmem:[#allocation9 + $0x1e4] ss:$8 sps:$4 sm:$0xff]  }
 0x467   : > { %4726 = vmatpush1.bf16.msra.mxu1 %v10639_v54 }
 0x468   : > { %4727 = vmatprep.subr.bf16.mxu1 %v10640_v52  ;;  %v10657_v52 = vld [vmem:[#allocation9 + $0x14] ss:$8 sps:$4 sm:$0xff]  }
 0x469   : > { %4354 = vmatpush1.bf16.msra.mxu0 %v10559_v61  ;;  %v10649_v61 = vld [vmem:[#allocation9 + $0x1f4] ss:$8 sps:$4 sm:$0xff]  }
 0x46a   : > { %4355 = vmatprep.subr.bf16.mxu0 %v10564_v7  ;;  %v10651_v7 = vld [vmem:[#allocation9 + $0x1f0] ss:$8 sps:$4 sm:$0xff]  }
 0x46b   : > { %4728 = vmatpush1.bf16.msra.mxu1 %v10642_v53 }
 0x46c   : > { %4729 = vmatprep.subr.bf16.mxu1 %v10643_v55 }
 0x46d   : > { %4356 = vmatpush1.bf16.msra.mxu0 %v10562_v10  ;;  %v10654_v10 = vld [vmem:[#allocation9 + $0x4] ss:$8 sps:$4 sm:$0xff]  }
 0x46e   : > { %4357 = vmatprep.subr.bf16.mxu0 %v10567_v11  ;;  %v12412_v11 = vsub.s32 0, %v12148_v9 }
 0x46f   : > { %4730 = vmatpush1.bf16.msra.mxu1 %v10645_v57 }
 0x470   : > { %4731 = vmatprep.subr.bf16.mxu1 %v10646_v58  ;;  %v10655_v58 = vld [vmem:[#allocation9 + $0x10] ss:$8 sps:$4 sm:$0xff]  }
 0x471   : > { %4358 = vmatpush1.bf16.msra.mxu0 %v10565_v13  ;;  %v12415_v13 = vsub.s32 1, %v12148_v9 }
 0x472   : > { %4359 = vmatprep.subr.bf16.mxu0 %v10570_v62  ;;  %v4398_v62 = vld [vmem:[#allocation16] ss:$8 sm:$0x3] }
 0x473   : > { %4732 = vmatpush1.bf16.msra.mxu1 %v10648_v60 }
 0x474   : > { %4733 = vmatprep.subr.bf16.mxu1 %v10649_v61  ;;  %v10660_v61 = vld [vmem:[#allocation9 + $0x24] ss:$8 sps:$4 sm:$0xff]  }
 0x475   : > { %4360 = vmatpush1.bf16.msra.mxu0 %v10568_v50  ;;  %v4414_v50 = vld [vmem:[#allocation18] ss:$8 sm:$0x3] }
 0x476   : > { %4361 = vmatprep.subr.bf16.mxu0 %v10573_v19  ;;  %v4403_v19 = vrot.slane %v4398_v62, %v12412_v11 }
 0x477   : > { %4734 = vmatpush1.bf16.msra.mxu1 %v10651_v7  ;;  %v10658_v7 = vld [vmem:[#allocation9 + $0x20] ss:$8 sps:$4 sm:$0xff]  }
 0x478   : > { %4918 = vmatprep.subr.bf16.mxu1 %v10654_v10  ;;  %v10663_v10 = vld [vmem:[#allocation9 + $0x34] ss:$8 sps:$4 sm:$0xff]  }
 0x479   : > { %4362 = vmatpush1.bf16.msra.mxu0 %v10571_v20  ;;  %v4407_v20 = vrot.slane %v4398_v62, %v12415_v13  ;;  %v10661_v62 = vld [vmem:[#allocation9 + $0x30] ss:$8 sps:$4 sm:$0xff]  }
 0x47a   : > { %4363 = vmatprep.subr.bf16.mxu0 %v10576_v21  ;;  %v4419_v21 = vrot.slane %v4414_v50, %v12412_v11 }
 0x47d   : > { %4364 = vmatpush1.bf16.msra.mxu0 %v10574_v14 }
 0x47e   : > { %4365 = vmatprep.subr.bf16.mxu0 %v10579_v42  ;;  %v4423_v42 = vrot.slane %v4414_v50, %v12415_v13  ;;  %v10666_v50 = vld [vmem:[#allocation9 + $0x44] ss:$8 sps:$4 sm:$0xff]  }
 0x481   : > { %4366 = vmatpush1.bf16.msra.mxu0 %v10577_v22 }
 0x482   : > { %4367 = vmatprep.subr.bf16.mxu0 %v10582_v6 }
 0x485   : > { %4368 = vmatpush1.bf16.msra.mxu0 %v10580_v63 }
 0x486   : > { %4369 = vmatprep.subr.bf16.mxu0 %v10585_v23 }
 0x489   : > { %4370 = vmatpush1.bf16.msra.mxu0 %v10583_v24 }
 0x48a   : > { %4371 = vmatprep.subr.bf16.mxu0 %v10588_v25 }
 0x48d   : > { %4372 = vmatpush1.bf16.msra.mxu0 %v10586_v2 }
 0x48e   : > { %4373 = vmatprep.subr.bf16.mxu0 %v10591_v26 }
 0x491   : > { %4374 = vmatpush1.bf16.msra.mxu0 %v10589_v27 }
 0x492   : > { %4375 = vmatprep.subr.bf16.mxu0 %v10594_v28  ;;  %v4439_v28 = vld [vmem:[#allocation3 + $0x18] sm:$0x80] }
 0x493   : > { %v4481_v1 = vsel %vm1710_vm1, %v4439_v28, 0  ;;  %v4443_v48 = vsel %vm702_vm4, %v4439_v28, 0  ;;  %v10690_v28 = vld [vmem:[#allocation9 + $0xc4] ss:$8 sps:$4 sm:$0xff]  }
 0x494   : > { %v4753_v59 = vrot.slane %v4443_v48, 7  ;;  %v10714_v48 = vld [vmem:[#allocation9 + $0x244] ss:$8 sps:$4 sm:$0xff]  }
 0x495   : > { %4376 = vmatpush1.bf16.msra.mxu0 %v10592_v44  ;;  %v12421_v44 = vld [vmem:[#allocation3 + $0x10] sm:$0x80] }
 0x496   : > { %4377 = vmatprep.subr.bf16.mxu0 %v10597_v32  ;;  %v4480_v35 = vsel %vm1710_vm1, %v12421_v44, 0  ;;  %vm5780_vm1 = vcmp.ge.s32.totalorder %v12154_v16, 4 }
 0x497   : > { %v4518_v41 = vshrl.u32 %v4480_v35, 16  ;;  %v10699_v35 = vld [vmem:[#allocation9 + $0xf4] ss:$8 sps:$4 sm:$0xff]  }
 0x499   : > { %4378 = vmatpush1.bf16.msra.mxu0 %v10595_v33 }
 0x49a   : > { %4379 = vmatprep.subr.bf16.mxu0 %v10600_v37  ;;  %v4530_v37 = vshrl.u32 %v4481_v1, 16 }
 0x49d   : > { %4380 = vmatpush1.bf16.msra.mxu0 %v10598_v0 }
 0x49e   : > { %4381 = vmatprep.subr.bf16.mxu0 %v10603_v12 }
 0x4a1   : > { %4382 = vmatpush1.bf16.msra.mxu0 %v10601_v40  ;;  %v4532_v40 = vrot.slane %v4530_v37, 7  ;;  %v4442_v37 = vsel %vm702_vm4, %v12421_v44, 0  ;;  %v10703_v44 = vld [vmem:[#allocation9 + $0x210] ss:$8 sps:$4 sm:$0xff]  }
 0x4a4   : > { %4384 = vmatmul.mubr.bf16.vlgmr.msra.gmra.mrb[0].mxu0 %v3966_v45  ;;  %v4520_v45 = vrot.slane %v4518_v41, 7  ;;  %v10702_v41 = vld [vmem:[#allocation9 + $0x204] ss:$8 sps:$4 sm:$0xff]  }
 0x577   : > { %v4385_v14 = vpop.f32.mrb[0].mxu0 }
 0x578   : > { %v4410_v22 = vmul.f32 %v4403_v19, %v4385_v14  ;;  %v4387_v6 = vpop.f32.mrb[1].mxu0  ;;  %v10672_v14 = vld [vmem:[#allocation9 + $0x64] ss:$8 sps:$4 sm:$0xff]  }
 0x579   : > { %v4411_v63 = vmul.f32 %v4407_v20, %v4387_v6  ;;  %v4389_v23 = vpop.f32.mrb[2].mxu0  ;;  %v10673_v6 = vld [vmem:[#allocation9 + $0x70] ss:$8 sps:$4 sm:$0xff]  }
 0x57a   : > { %v4426_v24 = vadd.f32 %v4419_v21, %v4410_v22  ;;  %v4412_v25 = vmul.f32 %v4403_v19, %v4389_v23  ;;  %v4391_v2 = vpop.f32.mrb[3].mxu0  ;;  %v10664_v19 = vld [vmem:[#allocation9 + $0x40] ss:$8 sps:$4 sm:$0xff]   ;;  %v10675_v22 = vld [vmem:[#allocation9 + $0x74] ss:$8 sps:$4 sm:$0xff]  }
 0x57b   : > { %v4427_v9 = vadd.f32 %v4423_v42, %v4411_v63  ;;  %v4413_v26 = vmul.f32 %v4407_v20, %v4391_v2  ;;  %v10669_v20 = vld [vmem:[#allocation9 + $0x54] ss:$8 sps:$4 sm:$0xff]   ;;  %v10678_v63 = vld [vmem:[#allocation9 + $0x84] ss:$8 sps:$4 sm:$0xff]   ;;  %v10676_v23 = vld [vmem:[#allocation9 + $0x80] ss:$8 sps:$4 sm:$0xff]  }
 0x57c   : > { %v4428_v27 = vadd.f32 %v4419_v21, %v4412_v25  ;;  %v4430_v5 = vmax.f32 %v4426_v24, 0.0  ;;  %v10667_v21 = vld [vmem:[#allocation9 + $0x50] ss:$8 sps:$4 sm:$0xff]   ;;  %v10681_v24 = vld [vmem:[#allocation9 + $0x94] ss:$8 sps:$4 sm:$0xff]  }
 0x57d   : > { %v4429_v30 = vadd.f32 %v4423_v42, %v4413_v26  ;;  %v4431_v17 = vmax.f32 %v4427_v9, 0.0  ;;  %v10670_v42 = vld [vmem:[#allocation9 + $0x60] ss:$8 sps:$4 sm:$0xff]   ;;  %v10679_v25 = vld [vmem:[#allocation9 + $0x90] ss:$8 sps:$4 sm:$0xff]  }
 0x57e   : > { %v4432_v32 = vmax.f32 %v4428_v27, 0.0  ;;  %v10684_v2 = vld [vmem:[#allocation9 + $0xa4] ss:$8 sps:$4 sm:$0xff]   ;;  %v10682_v9 = vld [vmem:[#allocation9 + $0xa0] ss:$8 sps:$4 sm:$0xff]  }
 0x57f   : > { %v4433_v33 = vmax.f32 %v4429_v30, 0.0  ;;  %v10687_v26 = vld [vmem:[#allocation9 + $0xb4] ss:$8 sps:$4 sm:$0xff]   ;;  %v10685_v27 = vld [vmem:[#allocation9 + $0xb0] ss:$8 sps:$4 sm:$0xff]  }
 0x580   : > { %v12425_v34 = vpack.c.bf16 %v4432_v32, %v4430_v5  ;;  %v10688_v30 = vld [vmem:[#allocation9 + $0xc0] ss:$8 sps:$4 sm:$0xff]   ;;  %v10693_v5 = vld [vmem:[#allocation9 + $0xd4] ss:$8 sps:$4 sm:$0xff]   ;;  %v10691_v32 = vld [vmem:[#allocation9 + $0xd0] ss:$8 sps:$4 sm:$0xff]  }
 0x581   : > { %v12430_v36 = vpack.c.bf16 %v4433_v33, %v4431_v17  ;;  %v10696_v17 = vld [vmem:[#allocation9 + $0xe4] ss:$8 sps:$4 sm:$0xff]   ;;  %v10694_v33 = vld [vmem:[#allocation9 + $0xe0] ss:$8 sps:$4 sm:$0xff]  }
 0x582   : > { %4436 = vst [vmem:[#allocation3 + $0x20] sm:$0xff] %v12425_v34  ;;  %v4482_v0 = vsel %vm1711_vm0, %v12425_v34, 0 }
 0x583   : > { %4437 = vst [vmem:[#allocation3 + $0x28] sm:$0xff] %v12430_v36  ;;  %v4483_v38 = vsel %vm1711_vm0, %v12430_v36, 0  ;;  %v4522_v4 = vshrl.u32 %v4482_v0, 16  ;;  %v4525_v12 = vshll.u32 %v4482_v0, 16  ;;  %vm5779_vm0 = vcmp.ge.s32.totalorder %v12152_v15, 4 }
 0x584   : > { %v4534_v39 = vshrl.u32 %v4483_v38, 16  ;;  %v4537_v43 = vshll.u32 %v4483_v38, 16  ;;  %v10697_v38 = vld [vmem:[#allocation9 + $0xf0] ss:$8 sps:$4 sm:$0xff]  }
 0x585   : > { %v4524_v56 = vrot.slane %v4522_v4, 7  ;;  %v4750_v4 = vrot.slane %v4442_v37, 7  ;;  %v10757_v37 = vld [vmem:[#allocation9 + $0x330] ss:$8 sps:$4 sm:$0xff]  }
 0x586   : > { %v4536_v31 = vrot.slane %v4534_v39, 7 }
 0x587   : > { %v4527_v46 = vor.u32 %v4525_v12, %v4524_v56  ;;  %v10700_v56 = vld [vmem:[#allocation9 + $0x200] ss:$8 sps:$4 sm:$0xff]   ;;  %v10705_v12 = vld [vmem:[#allocation9 + $0x214] ss:$8 sps:$4 sm:$0xff]  }
 0x588   : > { %v4539_v47 = vor.u32 %v4537_v43, %v4536_v31  ;;  %v10708_v31 = vld [vmem:[#allocation9 + $0x224] ss:$8 sps:$4 sm:$0xff]   ;;  %v10706_v43 = vld [vmem:[#allocation9 + $0x220] ss:$8 sps:$4 sm:$0xff]  }
 0x589   : > { %v4528_v53 = vsel %vm1785_vm2, %v4520_v45, %v4527_v46  ;;  %v4440_v1 = vld [vmem:[#allocation3 + $0x20] sm:$0x7f] }
 0x58a   : > { %v4540_v49 = vsel %vm1785_vm2, %v4532_v40, %v4539_v47  ;;  %v4441_v54 = vld [vmem:[#allocation3 + $0x28] sm:$0x7f]  ;;  %v4444_v0 = vsel %vm702_vm4, %v4440_v1, 0  ;;  %v10712_v47 = vld [vmem:[#allocation9 + $0x240] ss:$8 sps:$4 sm:$0xff]   ;;  %vm12491_vm2 = vmpackc.low %vm5779_vm0, %vm5779_vm0 }
 0x58b   : > { %4735 = vmatprep.mubr.bf16.mxu1 %v4540_v49  ;;  %v4445_v55 = vsel %vm702_vm4, %v4441_v54, 0  ;;  %v4751_v39 = vrot.slane %v4444_v0, 7  ;;  %v10711_v45 = vld [vmem:[#allocation9 + $0x234] ss:$8 sps:$4 sm:$0xff]   ;;  %v10709_v46 = vld [vmem:[#allocation9 + $0x230] ss:$8 sps:$4 sm:$0xff]  }
 0x58c   : > { %4736 = vmatmul.mubr.bf16.vlgmr.msra.gmra.mrb[0].mxu1 %v4528_v53  ;;  %v4754_v57 = vrot.slane %v4445_v55, 7  ;;  %v10715_v49 = vld [vmem:[#allocation9 + $0x250] ss:$8 sps:$4 sm:$0xff]   ;;  %v10720_v54 = vld [vmem:[#allocation9 + $0x264] ss:$8 sps:$4 sm:$0xff]  }
 0x58d   : > { %4919 = vmatpush1.bf16.msra.mxu1 %v10652_v51  ;;  %v4752_v40 = vsel %vm784_vm5, %v4750_v4, %v4751_v39  ;;  %v10717_v51 = vld [vmem:[#allocation9 + $0x254] ss:$8 sps:$4 sm:$0xff]   ;;  %v10721_v53 = vld [vmem:[#allocation9 + $0x270] ss:$8 sps:$4 sm:$0xff]   ;;  %v10726_v55 = vld [vmem:[#allocation9 + $0x284] ss:$8 sps:$4 sm:$0xff]  }
 0x58e   : > { %v4755_v60 = vsel %vm784_vm5, %v4753_v59, %v4754_v57  ;;  %4920 = vmatprep.subr.bf16.mxu1 %v10657_v52  ;;  %v10718_v59 = vld [vmem:[#allocation9 + $0x260] ss:$8 sps:$4 sm:$0xff]   ;;  %v10723_v52 = vld [vmem:[#allocation9 + $0x274] ss:$8 sps:$4 sm:$0xff]   ;;  %v10762_v0 = vld [vmem:[#allocation9 + $0x344] ss:$8 sps:$4 sm:$0xff]  }
 0x58f   : > { %4950 = vmatprep.mubr.bf16.mxu1 %v4755_v60  ;;  %v10724_v57 = vld [vmem:[#allocation9 + $0x280] ss:$8 sps:$4 sm:$0xff]   ;;  %v10727_v60 = vld [vmem:[#allocation9 + $0x290] ss:$8 sps:$4 sm:$0xff]   ;;  %v10768_v39 = vld [vmem:[#allocation9 + $0x364] ss:$8 sps:$4 sm:$0xff]  }
 0x590   : > { %v10754_v1 = vld [vmem:[#allocation9 + $0x320] ss:$8 sps:$4 sm:$0xff]   ;;  %v10763_v4 = vld [vmem:[#allocation9 + $0x350] ss:$8 sps:$4 sm:$0xff]  }
 0x591   : > { %4921 = vmatpush1.bf16.msra.mxu1 %v10655_v58  ;;  %v10729_v58 = vld [vmem:[#allocation9 + $0x294] ss:$8 sps:$4 sm:$0xff]  }
 0x592   : > { %4922 = vmatprep.subr.bf16.mxu1 %v10660_v61  ;;  %v10732_v61 = vld [vmem:[#allocation9 + $0x2a4] ss:$8 sps:$4 sm:$0xff]  }
 0x595   : > { %4923 = vmatpush1.bf16.msra.mxu1 %v10658_v7  ;;  %v10730_v7 = vld [vmem:[#allocation9 + $0x2a0] ss:$8 sps:$4 sm:$0xff]  }
 0x596   : > { %4924 = vmatprep.subr.bf16.mxu1 %v10663_v10  ;;  %v10735_v10 = vld [vmem:[#allocation9 + $0x2b4] ss:$8 sps:$4 sm:$0xff]  }
 0x599   : > { %4925 = vmatpush1.bf16.msra.mxu1 %v10661_v62  ;;  %v10733_v62 = vld [vmem:[#allocation9 + $0x2b0] ss:$8 sps:$4 sm:$0xff]  }
 0x59a   : > { %4926 = vmatprep.subr.bf16.mxu1 %v10666_v50  ;;  %v10738_v50 = vld [vmem:[#allocation9 + $0x2c4] ss:$8 sps:$4 sm:$0xff]  }
 0x59d   : > { %4927 = vmatpush1.bf16.msra.mxu1 %v10664_v19  ;;  %v10736_v19 = vld [vmem:[#allocation9 + $0x2c0] ss:$8 sps:$4 sm:$0xff]  }
 0x59e   : > { %4928 = vmatprep.subr.bf16.mxu1 %v10669_v20  ;;  %v10741_v20 = vld [vmem:[#allocation9 + $0x2d4] ss:$8 sps:$4 sm:$0xff]  }
 0x5a1   : > { %4929 = vmatpush1.bf16.msra.mxu1 %v10667_v21  ;;  %v10739_v21 = vld [vmem:[#allocation9 + $0x2d0] ss:$8 sps:$4 sm:$0xff]  }
 0x5a2   : > { %4930 = vmatprep.subr.bf16.mxu1 %v10672_v14  ;;  %v5206_v14 = vsel %vm2751_vm9, %v12430_v36, 0 }
 0x5a5   : > { %4931 = vmatpush1.bf16.msra.mxu1 %v10670_v42  ;;  %v10744_v42 = vld [vmem:[#allocation9 + $0x2e4] ss:$8 sps:$4 sm:$0xff]  }
 0x5a6   : > { %4932 = vmatprep.subr.bf16.mxu1 %v10675_v22  ;;  %v12457_v22 = vld [vmem:[#allocation3 + $0x38] sm:$0x1] }
 0x5a9   : > { %4933 = vmatpush1.bf16.msra.mxu1 %v10673_v6  ;;  %v5257_v6 = vshll.u32 %v5206_v14, 16 }
 0x5aa   : > { %4934 = vmatprep.subr.bf16.mxu1 %v10678_v63  ;;  %v10742_v63 = vld [vmem:[#allocation9 + $0x2e0] ss:$8 sps:$4 sm:$0xff]  }
 0x5ad   : > { %4935 = vmatpush1.bf16.msra.mxu1 %v10676_v23  ;;  %v5208_v23 = vsel %vm2752_vm10, %v12457_v22, 0 }
 0x5ae   : > { %4936 = vmatprep.subr.bf16.mxu1 %v10681_v24  ;;  %v10747_v24 = vld [vmem:[#allocation9 + $0x2f4] ss:$8 sps:$4 sm:$0xff]  }
 0x5b1   : > { %4937 = vmatpush1.bf16.msra.mxu1 %v10679_v25  ;;  %v5259_v25 = vrot.slane %v5257_v6, 1 }
 0x5b2   : > { %4938 = vmatprep.subr.bf16.mxu1 %v10684_v2  ;;  %v5262_v2 = vshll.u32 %v5208_v23, 16  ;;  %v10801_v23 = vld [vmem:[#allocation9 + $0x414] ss:$8 sps:$4 sm:$0xff]  }
 0x5b5   : > { %4939 = vmatpush1.bf16.msra.mxu1 %v10682_v9  ;;  %v10745_v9 = vld [vmem:[#allocation9 + $0x2f0] ss:$8 sps:$4 sm:$0xff]  }
 0x5b6   : > { %4940 = vmatprep.subr.bf16.mxu1 %v10687_v26  ;;  %v10750_v26 = vld [vmem:[#allocation9 + $0x304] ss:$8 sps:$4 sm:$0xff]  }
 0x5b9   : > { %4941 = vmatpush1.bf16.msra.mxu1 %v10685_v27 }
 0x5ba   : > { %4942 = vmatprep.subr.bf16.mxu1 %v10690_v28  ;;  %v5264_v28 = vrot.slane %v5262_v2, 1  ;;  %v10799_v2 = vld [vmem:[#allocation9 + $0x410] ss:$8 sps:$4 sm:$0xff]  }
 0x5bd   : > { %4943 = vmatpush1.bf16.msra.mxu1 %v10688_v30  ;;  %v10748_v30 = vld [vmem:[#allocation9 + $0x300] ss:$8 sps:$4 sm:$0xff]  }
 0x5be   : > { %4944 = vmatprep.subr.bf16.mxu1 %v10693_v5  ;;  %v10753_v5 = vld [vmem:[#allocation9 + $0x314] ss:$8 sps:$4 sm:$0xff]  }
 0x5c1   : > { %4945 = vmatpush1.bf16.msra.mxu1 %v10691_v32 }
 0x5c2   : > { %4946 = vmatprep.subr.bf16.mxu1 %v10696_v17  ;;  %v10751_v17 = vld [vmem:[#allocation9 + $0x310] ss:$8 sps:$4 sm:$0xff]  }
 0x5c5   : > { %4947 = vmatpush1.bf16.msra.mxu1 %v10694_v33  ;;  %v10756_v33 = vld [vmem:[#allocation9 + $0x324] ss:$8 sps:$4 sm:$0xff]  }
 0x5c6   : > { %4948 = vmatprep.subr.bf16.mxu1 %v10699_v35  ;;  %v10759_v35 = vld [vmem:[#allocation9 + $0x334] ss:$8 sps:$4 sm:$0xff]  }
 0x5c9   : > { %4949 = vmatpush1.bf16.msra.mxu1 %v10697_v38  ;;  %v10760_v38 = vld [vmem:[#allocation9 + $0x340] ss:$8 sps:$4 sm:$0xff]  }
 0x5ca   : > { %5154 = vmatprep.subr.bf16.mxu1 %v10702_v41  ;;  %v10765_v41 = vld [vmem:[#allocation9 + $0x354] ss:$8 sps:$4 sm:$0xff]  }
 0x5cc   : > { %4951 = vmatmul.mubr.bf16.vlgmr.msra.gmra.mrb[0].mxu1 %v4752_v40  ;;  %v10769_v40 = vld [vmem:[#allocation9 + $0x370] ss:$8 sps:$4 sm:$0xff]  }
 0x5cd   : > { %5155 = vmatpush1.bf16.msra.mxu1 %v10700_v56  ;;  %5186 = vmatprep.mubr.bf16.mxu1 %v12430_v36  ;;  %v5255_v36 = vshrl.u32 %v5206_v14, 16  ;;  %v10766_v56 = vld [vmem:[#allocation9 + $0x360] ss:$8 sps:$4 sm:$0xff]  }
 0x5ce   : > { %5156 = vmatprep.subr.bf16.mxu1 %v10705_v12  ;;  %v10771_v12 = vld [vmem:[#allocation9 + $0x374] ss:$8 sps:$4 sm:$0xff]  }
 0x5cf   : > { %v5260_v27 = vor.u32 %v5259_v25, %v5255_v36  ;;  %v10805_v36 = vld [vmem:[#allocation9 + $0x430] ss:$8 sps:$4 sm:$0xff]  }
 0x5d1   : > { %5157 = vmatpush1.bf16.msra.mxu1 %v10703_v44  ;;  %v5265_v32 = vsel %vm2826_vm11, %v5260_v27, %v5264_v28  ;;  %v10774_v44 = vld [vmem:[#allocation9 + $0x384] ss:$8 sps:$4 sm:$0xff]   ;;  %v10808_v28 = vld [vmem:[#allocation9 + $0x440] ss:$8 sps:$4 sm:$0xff]  }
 0x5d2   : > { %5158 = vmatprep.subr.bf16.mxu1 %v10708_v31  ;;  %v10772_v31 = vld [vmem:[#allocation9 + $0x380] ss:$8 sps:$4 sm:$0xff]   ;;  %v10810_v27 = vld [vmem:[#allocation9 + $0x444] ss:$8 sps:$4 sm:$0xff]  }
 0x5d5   : > { %5159 = vmatpush1.bf16.msra.mxu1 %v10706_v43  ;;  %v10777_v43 = vld [vmem:[#allocation9 + $0x394] ss:$8 sps:$4 sm:$0xff]  }
 0x5d6   : > { %5160 = vmatprep.subr.bf16.mxu1 %v10711_v45  ;;  %v10775_v45 = vld [vmem:[#allocation9 + $0x390] ss:$8 sps:$4 sm:$0xff]  }
 0x5d9   : > { %5161 = vmatpush1.bf16.msra.mxu1 %v10709_v46  ;;  %v10780_v46 = vld [vmem:[#allocation9 + $0x3a4] ss:$8 sps:$4 sm:$0xff]  }
 0x5da   : > { %5162 = vmatprep.subr.bf16.mxu1 %v10714_v48  ;;  %v10778_v48 = vld [vmem:[#allocation9 + $0x3a0] ss:$8 sps:$4 sm:$0xff]  }
 0x5dd   : > { %5163 = vmatpush1.bf16.msra.mxu1 %v10712_v47  ;;  %v10783_v47 = vld [vmem:[#allocation9 + $0x3b4] ss:$8 sps:$4 sm:$0xff]  }
 0x5de   : > { %5164 = vmatprep.subr.bf16.mxu1 %v10717_v51  ;;  %v10781_v51 = vld [vmem:[#allocation9 + $0x3b0] ss:$8 sps:$4 sm:$0xff]  }
 0x5e1   : > { %5165 = vmatpush1.bf16.msra.mxu1 %v10715_v49  ;;  %v10786_v49 = vld [vmem:[#allocation9 + $0x3c4] ss:$8 sps:$4 sm:$0xff]  }
 0x5e2   : > { %5166 = vmatprep.subr.bf16.mxu1 %v10720_v54  ;;  %v10784_v54 = vld [vmem:[#allocation9 + $0x3c0] ss:$8 sps:$4 sm:$0xff]  }
 0x5e5   : > { %5167 = vmatpush1.bf16.msra.mxu1 %v10718_v59  ;;  %v10789_v59 = vld [vmem:[#allocation9 + $0x3d4] ss:$8 sps:$4 sm:$0xff]  }
 0x5e6   : > { %5168 = vmatprep.subr.bf16.mxu1 %v10723_v52  ;;  %v5205_v52 = vsel %vm2751_vm9, %v12425_v34, 0  ;;  %vm5786_vm9 = vmpackc.low %vm5780_vm1, %vm5780_vm1 }
 0x5e9   : > { %5169 = vmatpush1.bf16.msra.mxu1 %v10721_v53  ;;  %v10787_v53 = vld [vmem:[#allocation9 + $0x3d0] ss:$8 sps:$4 sm:$0xff]  }
 0x5ea   : > { %5170 = vmatprep.subr.bf16.mxu1 %v10726_v55  ;;  %v12467_v55 = vld [vmem:[#allocation3 + $0x30] sm:$0x1] }
 0x5ed   : > { %5171 = vmatpush1.bf16.msra.mxu1 %v10724_v57  ;;  %v10792_v57 = vld [vmem:[#allocation9 + $0x3e4] ss:$8 sps:$4 sm:$0xff]  }
 0x5ee   : > { %5172 = vmatprep.subr.bf16.mxu1 %v10729_v58  ;;  %v5245_v58 = vshll.u32 %v5205_v52, 16 }
 0x5f1   : > { %5173 = vmatpush1.bf16.msra.mxu1 %v10727_v60  ;;  %v5207_v60 = vsel %vm2752_vm10, %v12467_v55, 0 }
 0x5f2   : > { %5174 = vmatprep.subr.bf16.mxu1 %v10732_v61  ;;  %v10790_v61 = vld [vmem:[#allocation9 + $0x3e0] ss:$8 sps:$4 sm:$0xff]  }
 0x5f5   : > { %5175 = vmatpush1.bf16.msra.mxu1 %v10730_v7  ;;  %v10795_v7 = vld [vmem:[#allocation9 + $0x3f4] ss:$8 sps:$4 sm:$0xff]  }
 0x5f6   : > { %5176 = vmatprep.subr.bf16.mxu1 %v10735_v10  ;;  %v5476_v10 = vld [vmem:[#allocation3 + $0x28] sm:$0xfe] }
 0x5f9   : > { %5177 = vmatpush1.bf16.msra.mxu1 %v10733_v62  ;;  %v5247_v62 = vrot.slane %v5245_v58, 1 }
 0x5fa   : > { %5178 = vmatprep.subr.bf16.mxu1 %v10738_v50  ;;  %v5250_v50 = vshll.u32 %v5207_v60, 16  ;;  %v10847_v60 = vld [vmem:[#allocation10 + $0x110] ss:$8 sps:$4 sm:$0xff]  }
 0x5fc   : > { %v5252_v14 = vrot.slane %v5250_v50, 1  ;;  %v10856_v50 = vld [vmem:[#allocation10 + $0x140] ss:$8 sps:$4 sm:$0xff]  }
 0x5fd   : > { %5179 = vmatpush1.bf16.msra.mxu1 %v10736_v19  ;;  %v5478_v19 = vsel %vm12340_vm3, %v5476_v10, 0  ;;  %v10853_v10 = vld [vmem:[#allocation10 + $0x130] ss:$8 sps:$4 sm:$0xff]  }
 0x5fe   : > { %5180 = vmatprep.subr.bf16.mxu1 %v10741_v20  ;;  %v5480_v20 = vsel %vm12340_vm3, %v12457_v22, 0  ;;  %v10804_v22 = vld [vmem:[#allocation9 + $0x424] ss:$8 sps:$4 sm:$0xff]  }
 0x5ff   : > { %v5522_v6 = vrot.slane %v5480_v20, 1  ;;  %v10862_v20 = vld [vmem:[#allocation10 + $0x160] ss:$8 sps:$4 sm:$0xff]  }
 0x601   : > { %5181 = vmatpush1.bf16.msra.mxu1 %v10739_v21 }
 0x602   : > { %5182 = vmatprep.subr.bf16.mxu1 %v10744_v42  ;;  %v5521_v42 = vrot.slane %v5478_v19, 1  ;;  %v10864_v19 = vld [vmem:[#allocation10 + $0x164] ss:$8 sps:$4 sm:$0xff]  }
 0x604   : > { %v5523_v25 = vsel %vm3389_vm6, %v5521_v42, %v5522_v6  ;;  %v10868_v42 = vld [vmem:[#allocation10 + $0x180] ss:$8 sps:$4 sm:$0xff]   ;;  %v10873_v6 = vld [vmem:[#allocation10 + $0x194] ss:$8 sps:$4 sm:$0xff]  }
 0x605   : > { %5183 = vmatpush1.bf16.msra.mxu1 %v10742_v63  ;;  %v10796_v63 = vld [vmem:[#allocation9 + $0x400] ss:$8 sps:$4 sm:$0xff]  }
 0x606   : > { %5184 = vmatprep.subr.bf16.mxu1 %v10747_v24 }
 0x609   : > { %5185 = vmatpush1.bf16.msra.mxu1 %v10745_v9  ;;  %v10802_v9 = vld [vmem:[#allocation9 + $0x420] ss:$8 sps:$4 sm:$0xff]  }
 0x60a   : > { %5428 = vmatprep.subr.bf16.mxu1 %v10750_v26  ;;  %v10807_v26 = vld [vmem:[#allocation9 + $0x434] ss:$8 sps:$4 sm:$0xff]  }
 0x60c   : > { %5187 = vmatmul.mubr.bf16.vlgmr.msra.gmra.mrb[0].mxu1 %v12425_v34  ;;  %v5243_v34 = vshrl.u32 %v5205_v52, 16 }
 0x60d   : > { %5429 = vmatpush1.bf16.msra.mxu1 %v10748_v30  ;;  %5460 = vmatprep.mubr.bf16.mxu1 %v5265_v32  ;;  %v10813_v30 = vld [vmem:[#allocation9 + $0x454] ss:$8 sps:$4 sm:$0xff]   ;;  %v10816_v32 = vld [vmem:[#allocation9 + $0x464] ss:$8 sps:$4 sm:$0xff]  }
 0x60e   : > { %5430 = vmatprep.subr.bf16.mxu1 %v10753_v5  ;;  %v5248_v21 = vor.u32 %v5247_v62, %v5243_v34  ;;  %v10811_v5 = vld [vmem:[#allocation9 + $0x450] ss:$8 sps:$4 sm:$0xff]   ;;  %v10858_v62 = vld [vmem:[#allocation10 + $0x144] ss:$8 sps:$4 sm:$0xff]  }
 0x60f   : > { %v10859_v34 = vld [vmem:[#allocation10 + $0x150] ss:$8 sps:$4 sm:$0xff]  }
 0x610   : > { %v5253_v24 = vsel %vm2826_vm11, %v5248_v21, %v5252_v14  ;;  %v10865_v21 = vld [vmem:[#allocation10 + $0x170] ss:$8 sps:$4 sm:$0xff]   ;;  %v10870_v14 = vld [vmem:[#allocation10 + $0x184] ss:$8 sps:$4 sm:$0xff]   ;;  %vm6090_vm11 = vcmask 1041408  }
 0x611   : > { %5431 = vmatpush1.bf16.msra.mxu1 %v10751_v17  ;;  %v10814_v17 = vld [vmem:[#allocation9 + $0x460] ss:$8 sps:$4 sm:$0xff]  }
 0x612   : > { %5432 = vmatprep.subr.bf16.mxu1 %v10756_v33  ;;  %v10819_v33 = vld [vmem:[#allocation9 + $0x474] ss:$8 sps:$4 sm:$0xff]  }
 0x615   : > { %5433 = vmatpush1.bf16.msra.mxu1 %v10754_v1  ;;  %v10817_v1 = vld [vmem:[#allocation9 + $0x470] ss:$8 sps:$4 sm:$0xff]  }
 0x616   : > { %5434 = vmatprep.subr.bf16.mxu1 %v10759_v35  ;;  %v10822_v35 = vld [vmem:[#allocation9 + $0x484] ss:$8 sps:$4 sm:$0xff]  }
 0x619   : > { %5435 = vmatpush1.bf16.msra.mxu1 %v10757_v37  ;;  %v10820_v37 = vld [vmem:[#allocation9 + $0x480] ss:$8 sps:$4 sm:$0xff]  }
 0x61a   : > { %5436 = vmatprep.subr.bf16.mxu1 %v10762_v0  ;;  %v10825_v0 = vld [vmem:[#allocation9 + $0x494] ss:$8 sps:$4 sm:$0xff]  }
 0x61d   : > { %5437 = vmatpush1.bf16.msra.mxu1 %v10760_v38  ;;  %v10823_v38 = vld [vmem:[#allocation9 + $0x490] ss:$8 sps:$4 sm:$0xff]  }
 0x61e   : > { %5438 = vmatprep.subr.bf16.mxu1 %v10765_v41  ;;  %v10828_v41 = vld [vmem:[#allocation9 + $0x4a4] ss:$8 sps:$4 sm:$0xff]  }
 0x621   : > { %5439 = vmatpush1.bf16.msra.mxu1 %v10763_v4  ;;  %v10826_v4 = vld [vmem:[#allocation9 + $0x4a0] ss:$8 sps:$4 sm:$0xff]  }
 0x622   : > { %5440 = vmatprep.subr.bf16.mxu1 %v10768_v39  ;;  %v10831_v39 = vld [vmem:[#allocation9 + $0x4b4] ss:$8 sps:$4 sm:$0xff]  }
 0x625   : > { %5441 = vmatpush1.bf16.msra.mxu1 %v10766_v56  ;;  %v10829_v56 = vld [vmem:[#allocation9 + $0x4b0] ss:$8 sps:$4 sm:$0xff]  }
 0x626   : > { %5442 = vmatprep.subr.bf16.mxu1 %v10771_v12  ;;  %v10834_v12 = vld [vmem:[#allocation9 + $0x4c4] ss:$8 sps:$4 sm:$0xff]  }
 0x629   : > { %5443 = vmatpush1.bf16.msra.mxu1 %v10769_v40  ;;  %v10832_v40 = vld [vmem:[#allocation9 + $0x4c0] ss:$8 sps:$4 sm:$0xff]  }
 0x62a   : > { %5444 = vmatprep.subr.bf16.mxu1 %v10774_v44  ;;  %v10837_v44 = vld [vmem:[#allocation9 + $0x4d4] ss:$8 sps:$4 sm:$0xff]  }
 0x62d   : > { %5445 = vmatpush1.bf16.msra.mxu1 %v10772_v31  ;;  %v10835_v31 = vld [vmem:[#allocation9 + $0x4d0] ss:$8 sps:$4 sm:$0xff]  }
 0x62e   : > { %5446 = vmatprep.subr.bf16.mxu1 %v10777_v43  ;;  %v10840_v43 = vld [vmem:[#allocation9 + $0x4e4] ss:$8 sps:$4 sm:$0xff]  }
 0x631   : > { %5447 = vmatpush1.bf16.msra.mxu1 %v10775_v45  ;;  %v10838_v45 = vld [vmem:[#allocation9 + $0x4e0] ss:$8 sps:$4 sm:$0xff]  }
 0x632   : > { %5448 = vmatprep.subr.bf16.mxu1 %v10780_v46  ;;  %v5475_v46 = vld [vmem:[#allocation3 + $0x20] sm:$0xfe] }
 0x635   : > { %5449 = vmatpush1.bf16.msra.mxu1 %v10778_v48  ;;  %v10843_v48 = vld [vmem:[#allocation9 + $0x4f4] ss:$8 sps:$4 sm:$0xff]  }
 0x636   : > { %5450 = vmatprep.subr.bf16.mxu1 %v10783_v47  ;;  %v5477_v47 = vsel %vm12340_vm3, %v5475_v46, 0  ;;  %v12495_v46 = vld [vmem:[#allocation3] sm:$0xff] }
 0x639   : > { %5451 = vmatpush1.bf16.msra.mxu1 %v10781_v51  ;;  %v5479_v51 = vsel %vm12340_vm3, %v12467_v55, 0  ;;  %v10855_v55 = vld [vmem:[#allocation10 + $0x134] ss:$8 sps:$4 sm:$0xff]  }
 0x63a   : > { %5452 = vmatprep.subr.bf16.mxu1 %v10786_v49  ;;  %v10841_v49 = vld [vmem:[#allocation9 + $0x4f0] ss:$8 sps:$4 sm:$0xff]   ;;  %v5519_v52 = vrot.slane %v5479_v51, 1 }
 0x63d   : > { %5453 = vmatpush1.bf16.msra.mxu1 %v10784_v54  ;;  %v10846_v54 = vld [vmem:[#allocation10 + $0x104] ss:$8 sps:$4 sm:$0xff]  }
 0x63e   : > { %5454 = vmatprep.subr.bf16.mxu1 %v10789_v59  ;;  %v5518_v59 = vrot.slane %v5477_v47, 1  ;;  %v5788_v47 = vsel %vm5786_vm9, 65537, %v12495_v46 }
 0x640   : > { %v5520_v58 = vsel %vm3389_vm6, %v5518_v59, %v5519_v52 }
 0x641   : > { %5455 = vmatpush1.bf16.msra.mxu1 %v10787_v53  ;;  %v10844_v53 = vld [vmem:[#allocation10 + $0x100] ss:$8 sps:$4 sm:$0xff]  }
 0x642   : > { %5456 = vmatprep.subr.bf16.mxu1 %v10792_v57  ;;  %v10849_v57 = vld [vmem:[#allocation10 + $0x114] ss:$8 sps:$4 sm:$0xff]  }
 0x645   : > { %5457 = vmatpush1.bf16.msra.mxu1 %v10790_v61  ;;  %v10852_v61 = vld [vmem:[#allocation10 + $0x124] ss:$8 sps:$4 sm:$0xff]  }
 0x646   : > { %5458 = vmatprep.subr.bf16.mxu1 %v10795_v7  ;;  %v10850_v7 = vld [vmem:[#allocation10 + $0x120] ss:$8 sps:$4 sm:$0xff]  }
 0x649   : > { %5459 = vmatpush1.bf16.msra.mxu1 %v10793_v8  ;;  %v10861_v8 = vld [vmem:[#allocation10 + $0x154] ss:$8 sps:$4 sm:$0xff]  }
 0x64a   : > { %5686 = vmatprep.subr.bf16.mxu1 %v10798_v3  ;;  %v10867_v3 = vld [vmem:[#allocation10 + $0x174] ss:$8 sps:$4 sm:$0xff]  }
 0x64c   : > { %5461 = vmatmul.mubr.bf16.vlgmr.msra.gmra.mrb[0].mxu1 %v5253_v24  ;;  %v10874_v24 = vld [vmem:[#allocation10 + $0x1a0] ss:$8 sps:$4 sm:$0xff]  }
 0x64d   : > { %5687 = vmatpush1.bf16.msra.mxu1 %v10796_v63  ;;  %5718 = vmatprep.mubr.bf16.mxu1 %v5523_v25  ;;  %v10871_v63 = vld [vmem:[#allocation10 + $0x190] ss:$8 sps:$4 sm:$0xff]   ;;  %v10879_v25 = vld [vmem:[#allocation10 + $0x1b4] ss:$8 sps:$4 sm:$0xff]  }
 0x64e   : > { %5688 = vmatprep.subr.bf16.mxu1 %v10801_v23  ;;  %v10876_v23 = vld [vmem:[#allocation10 + $0x1a4] ss:$8 sps:$4 sm:$0xff]  }
 0x651   : > { %5689 = vmatpush1.bf16.msra.mxu1 %v10799_v2  ;;  %v10877_v2 = vld [vmem:[#allocation10 + $0x1b0] ss:$8 sps:$4 sm:$0xff]  }
 0x652   : > { %5690 = vmatprep.subr.bf16.mxu1 %v10804_v22  ;;  %v10882_v22 = vld [vmem:[#allocation10 + $0x1c4] ss:$8 sps:$4 sm:$0xff]  }
 0x655   : > { %5691 = vmatpush1.bf16.msra.mxu1 %v10802_v9  ;;  %v10880_v9 = vld [vmem:[#allocation10 + $0x1c0] ss:$8 sps:$4 sm:$0xff]  }
 0x656   : > { %5692 = vmatprep.subr.bf16.mxu1 %v10807_v26  ;;  %v10883_v26 = vld [vmem:[#allocation10 + $0x1d0] ss:$8 sps:$4 sm:$0xff]  }
 0x659   : > { %5693 = vmatpush1.bf16.msra.mxu1 %v10805_v36  ;;  %v10885_v36 = vld [vmem:[#allocation10 + $0x1d4] ss:$8 sps:$4 sm:$0xff]  }
 0x65a   : > { %5694 = vmatprep.subr.bf16.mxu1 %v10810_v27  ;;  %v10888_v27 = vld [vmem:[#allocation10 + $0x1e4] ss:$8 sps:$4 sm:$0xff]  }
 0x65d   : > { %5695 = vmatpush1.bf16.msra.mxu1 %v10808_v28  ;;  %v10886_v28 = vld [vmem:[#allocation10 + $0x1e0] ss:$8 sps:$4 sm:$0xff]  }
 0x65e   : > { %5696 = vmatprep.subr.bf16.mxu1 %v10813_v30  ;;  %v10891_v30 = vld [vmem:[#allocation10 + $0x1f4] ss:$8 sps:$4 sm:$0xff]  }
 0x661   : > { %5697 = vmatpush1.bf16.msra.mxu1 %v10811_v5  ;;  %v10889_v5 = vld [vmem:[#allocation10 + $0x1f0] ss:$8 sps:$4 sm:$0xff]  }
 0x662   : > { %5698 = vmatprep.subr.bf16.mxu1 %v10816_v32  ;;  %v10894_v32 = vld [vmem:[#allocation10 + $0x4] ss:$8 sps:$4 sm:$0xff]  }
 0x665   : > { %5699 = vmatpush1.bf16.msra.mxu1 %v10814_v17  ;;  %v5734_v17 = vld [vmem:[#allocation16 + $0x1] ss:$8 sm:$0x3] }
 0x666   : > { %5700 = vmatprep.subr.bf16.mxu1 %v10819_v33  ;;  %v5751_v33 = vld [vmem:[#allocation18 + $0x1] ss:$8 sm:$0x3] }
 0x669   : > { %5701 = vmatpush1.bf16.msra.mxu1 %v10817_v1  ;;  %v5739_v1 = vrot.slane %v5734_v17, %v12412_v11 }
 0x66a   : > { %5702 = vmatprep.subr.bf16.mxu1 %v10822_v35  ;;  %v5743_v35 = vrot.slane %v5734_v17, %v12415_v13  ;;  %v10906_v17 = vld [vmem:[#allocation10 + $0x44] ss:$8 sps:$4 sm:$0xff]  }
 0x66d   : > { %5703 = vmatpush1.bf16.msra.mxu1 %v10820_v37  ;;  %v5756_v37 = vrot.slane %v5751_v33, %v12412_v11 }
 0x66e   : > { %5704 = vmatprep.subr.bf16.mxu1 %v10825_v0 }
 0x671   : > { %5705 = vmatpush1.bf16.msra.mxu1 %v10823_v38  ;;  %v5760_v38 = vrot.slane %v5751_v33, %v12415_v13  ;;  %v10904_v33 = vld [vmem:[#allocation10 + $0x40] ss:$8 sps:$4 sm:$0xff]  }
 0x672   : > { %5706 = vmatprep.subr.bf16.mxu1 %v10828_v41  ;;  %v10913_v41 = vld [vmem:[#allocation10 + $0x70] ss:$8 sps:$4 sm:$0xff]  }
 0x675   : > { %5707 = vmatpush1.bf16.msra.mxu1 %v10826_v4 }
 0x676   : > { %5708 = vmatprep.subr.bf16.mxu1 %v10831_v39 }
 0x679   : > { %5709 = vmatpush1.bf16.msra.mxu1 %v10829_v56 }
 0x67a   : > { %5710 = vmatprep.subr.bf16.mxu1 %v10834_v12 }
 0x67d   : > { %5711 = vmatpush1.bf16.msra.mxu1 %v10832_v40 }
 0x67e   : > { %5712 = vmatprep.subr.bf16.mxu1 %v10837_v44 }
 0x681   : > { %5713 = vmatpush1.bf16.msra.mxu1 %v10835_v31 }
 0x682   : > { %5714 = vmatprep.subr.bf16.mxu1 %v10840_v43 }
 0x685   : > { %5715 = vmatpush1.bf16.msra.mxu1 %v10838_v45 }
 0x686   : > { %5716 = vmatprep.subr.bf16.mxu1 %v10843_v48  ;;  %v5787_v48 = vsel %vm12491_vm2, 65537, %v12495_v46 }
 0x687   : > { %v9354_v52 = vcombine.low %v5787_v48, %v5788_v47  ;;  %v10928_v48 = vld [vmem:[#allocation10 + $0xc0] ss:$8 sps:$4 sm:$0xff]   ;;  %v10933_v47 = vld [vmem:[#allocation10 + $0xd4] ss:$8 sps:$4 sm:$0xff]  }
 0x689   : > { %5717 = vmatpush1.bf16.msra.mxu1 %v10841_v49 }
 0x68a   : > { %6043 = vmatprep.subr.bf16.mxu1 %v10846_v54 }
 0x68c   : > { %5719 = vmatmul.mubr.bf16.vlgmr.msra.gmra.mrb[0].mxu1 %v5520_v58 }
 0x68d   : > { %6044 = vmatpush1.bf16.msra.mxu1 %v10844_v53 }
 0x68e   : > { %6045 = vmatprep.subr.bf16.mxu1 %v10849_v57 }
 0x691   : > { %6046 = vmatpush1.bf16.msra.mxu1 %v10847_v60 }
 0x692   : > { %6047 = vmatprep.subr.bf16.mxu1 %v10852_v61  ;;  %v5792_v61 = vrot.slane %v9354_v52, 2 }
 0x694   : > { %vm12507_vm10 = vcmp.ne.s16.totalorder %v5792_v61, 0 }
 0x695   : > { %6048 = vmatpush1.bf16.msra.mxu1 %v10850_v7  ;;  %v5831_v7 = vld [vmem:[#allocation3 + $0x18] sm:$0x80] }
 0x696   : > { %6049 = vmatprep.subr.bf16.mxu1 %v10855_v55  ;;  %v5830_v55 = vld [vmem:[#allocation3 + $0x10] sm:$0x80] }
 0x699   : > { %6050 = vmatpush1.bf16.msra.mxu1 %v10853_v10  ;;  %v5776_v10 = vld [vmem:[#allocation3 + $0x18] sm:$0xc0] }
 0x69a   : > { %6051 = vmatprep.subr.bf16.mxu1 %v10858_v62 }
 0x69d   : > { %6052 = vmatpush1.bf16.msra.mxu1 %v10856_v50  ;;  %v5835_v50 = vsel %vm702_vm4, %v5831_v7, 0  ;;  %v10937_v7 = vld [vmem:[#allocation10 + $0xf0] ss:$8 sps:$4 sm:$0xff]  }
 0x69e   : > { %6053 = vmatprep.subr.bf16.mxu1 %v10861_v8  ;;  %v5834_v8 = vsel %vm702_vm4, %v5830_v55, 0  ;;  %v10942_v55 = vld [vmem:[#allocation10 + $0x204] ss:$8 sps:$4 sm:$0xff]  }
 0x6a1   : > { %6054 = vmatpush1.bf16.msra.mxu1 %v10859_v34 }
 0x6a2   : > { %6055 = vmatprep.subr.bf16.mxu1 %v10864_v19  ;;  %v5795_v19 = vsel %vm12507_vm10, %v5776_v10, 0 }
 0x6a5   : > { %6056 = vmatpush1.bf16.msra.mxu1 %v10862_v20 }
 0x6a6   : > { %6057 = vmatprep.subr.bf16.mxu1 %v10867_v3  ;;  %v5878_v3 = vrot.slane %v5835_v50, 7 }
 0x6a9   : > { %6058 = vmatpush1.bf16.msra.mxu1 %v10865_v21 }
 0x6aa   : > { %6059 = vmatprep.subr.bf16.mxu1 %v10870_v14 }
 0x6ad   : > { %6060 = vmatpush1.bf16.msra.mxu1 %v10868_v42 }
 0x6ae   : > { %6061 = vmatprep.subr.bf16.mxu1 %v10873_v6  ;;  %v5875_v6 = vrot.slane %v5834_v8, 7  ;;  %v10940_v8 = vld [vmem:[#allocation10 + $0x200] ss:$8 sps:$4 sm:$0xff]  }
 0x6b1   : > { %6062 = vmatpush1.bf16.msra.mxu1 %v10871_v63 }
 0x6b2   : > { %6063 = vmatprep.subr.bf16.mxu1 %v10876_v23 }
 0x6b5   : > { %6064 = vmatpush1.bf16.msra.mxu1 %v10874_v24 }
 0x6b6   : > { %6065 = vmatprep.subr.bf16.mxu1 %v10879_v25  ;;  %v6094_v25 = vrot.slane %v5795_v19, 6 }
 0x6b9   : > { %6066 = vmatpush1.bf16.msra.mxu1 %v10877_v2 }
 0x6ba   : > { %6067 = vmatprep.subr.bf16.mxu1 %v10882_v22  ;;  %v10892_v22 = vld [vmem:[#allocation10] ss:$8 sps:$4 sm:$0xff]  }
 0x6bd   : > { %6068 = vmatpush1.bf16.msra.mxu1 %v10880_v9 }
 0x6be   : > { %6069 = vmatprep.subr.bf16.mxu1 %v10885_v36 }
 0x6c1   : > { %6070 = vmatpush1.bf16.msra.mxu1 %v10883_v26  ;;  %v10897_v26 = vld [vmem:[#allocation10 + $0x14] ss:$8 sps:$4 sm:$0xff]  }
 0x6c2   : > { %6071 = vmatprep.subr.bf16.mxu1 %v10888_v27  ;;  %v10895_v27 = vld [vmem:[#allocation10 + $0x10] ss:$8 sps:$4 sm:$0xff]  }
 0x6c5   : > { %6072 = vmatpush1.bf16.msra.mxu1 %v10886_v28  ;;  %v10900_v28 = vld [vmem:[#allocation10 + $0x24] ss:$8 sps:$4 sm:$0xff]  }
 0x6c6   : > { %6073 = vmatprep.subr.bf16.mxu1 %v10891_v30  ;;  %v10898_v30 = vld [vmem:[#allocation10 + $0x20] ss:$8 sps:$4 sm:$0xff]  }
 0x6c9   : > { %6074 = vmatpush1.bf16.msra.mxu1 %v10889_v5  ;;  %v10903_v5 = vld [vmem:[#allocation10 + $0x34] ss:$8 sps:$4 sm:$0xff]  }
 0x6ca   : > { %6259 = vmatprep.subr.bf16.mxu1 %v10894_v32  ;;  %v10901_v32 = vld [vmem:[#allocation10 + $0x30] ss:$8 sps:$4 sm:$0xff]  }
 0x75f   : > { %v5720_v0 = vpop.f32.mrb[0].mxu1 }
 0x760   : > { %v5746_v4 = vmul.f32 %v5739_v1, %v5720_v0  ;;  %v5722_v39 = vpop.f32.mrb[1].mxu1  ;;  %v10910_v0 = vld [vmem:[#allocation10 + $0x60] ss:$8 sps:$4 sm:$0xff]  }
 0x761   : > { %v5747_v56 = vmul.f32 %v5743_v35, %v5722_v39  ;;  %v5724_v12 = vpop.f32.mrb[2].mxu1  ;;  %v10916_v39 = vld [vmem:[#allocation10 + $0x80] ss:$8 sps:$4 sm:$0xff]  }
 0x762   : > { %v5763_v40 = vadd.f32 %v5756_v37, %v5746_v4  ;;  %v5748_v44 = vmul.f32 %v5739_v1, %v5724_v12  ;;  %v5726_v31 = vpop.f32.mrb[3].mxu1  ;;  %v10909_v1 = vld [vmem:[#allocation10 + $0x54] ss:$8 sps:$4 sm:$0xff]   ;;  %v10918_v4 = vld [vmem:[#allocation10 + $0x84] ss:$8 sps:$4 sm:$0xff]  }
 0x763   : > { %v5764_v43 = vadd.f32 %v5760_v38, %v5747_v56  ;;  %v5749_v45 = vmul.f32 %v5743_v35, %v5726_v31  ;;  %v10907_v35 = vld [vmem:[#allocation10 + $0x50] ss:$8 sps:$4 sm:$0xff]   ;;  %v10921_v56 = vld [vmem:[#allocation10 + $0x94] ss:$8 sps:$4 sm:$0xff]  }
 0x764   : > { %v5765_v51 = vadd.f32 %v5756_v37, %v5748_v44  ;;  %v5767_v54 = vmax.f32 %v5763_v40, 0.0  ;;  %v10912_v37 = vld [vmem:[#allocation10 + $0x64] ss:$8 sps:$4 sm:$0xff]   ;;  %v10919_v12 = vld [vmem:[#allocation10 + $0x90] ss:$8 sps:$4 sm:$0xff]  }
 0x765   : > { %v5766_v49 = vadd.f32 %v5760_v38, %v5749_v45  ;;  %v5768_v53 = vmax.f32 %v5764_v43, 0.0  ;;  %v10915_v38 = vld [vmem:[#allocation10 + $0x74] ss:$8 sps:$4 sm:$0xff]   ;;  %v10924_v40 = vld [vmem:[#allocation10 + $0xa4] ss:$8 sps:$4 sm:$0xff]  }
 0x766   : > { %v5769_v59 = vmax.f32 %v5765_v51, 0.0  ;;  %v10922_v44 = vld [vmem:[#allocation10 + $0xa0] ss:$8 sps:$4 sm:$0xff]   ;;  %v10927_v31 = vld [vmem:[#allocation10 + $0xb4] ss:$8 sps:$4 sm:$0xff]  }
 0x767   : > { %v5770_v57 = vmax.f32 %v5766_v49, 0.0  ;;  %v10925_v43 = vld [vmem:[#allocation10 + $0xb0] ss:$8 sps:$4 sm:$0xff]   ;;  %v10930_v45 = vld [vmem:[#allocation10 + $0xc4] ss:$8 sps:$4 sm:$0xff]  }
 0x768   : > { %v12501_v58 = vpack.c.bf16 %v5769_v59, %v5767_v54  ;;  %v10931_v51 = vld [vmem:[#allocation10 + $0xd0] ss:$8 sps:$4 sm:$0xff]   ;;  %v10936_v49 = vld [vmem:[#allocation10 + $0xe4] ss:$8 sps:$4 sm:$0xff]   ;;  %v10934_v54 = vld [vmem:[#allocation10 + $0xe0] ss:$8 sps:$4 sm:$0xff]  }
 0x769   : > { %v12503_v60 = vpack.c.bf16 %v5770_v57, %v5768_v53  ;;  %v5775_v59 = vld [vmem:[#allocation3 + $0x10] sm:$0xc0]  ;;  %v10939_v53 = vld [vmem:[#allocation10 + $0xf4] ss:$8 sps:$4 sm:$0xff]  }
 0x76a   : > { %5773 = vst [vmem:[#allocation3 + $0x20] sm:$0xff] %v12501_v58  ;;  %v5794_v57 = vsel %vm12507_vm10, %v5775_v59, 0  ;;  %v11002_v59 = vld [vmem:[#allocation10 + $0x344] ss:$8 sps:$4 sm:$0xff]  }
 0x76b   : > { %5774 = vst [vmem:[#allocation3 + $0x28] sm:$0xff] %v12503_v60  ;;  %v6091_v10 = vrot.slane %v5794_v57, 6  ;;  %v11008_v57 = vld [vmem:[#allocation10 + $0x364] ss:$8 sps:$4 sm:$0xff]  }
 0x771   : > { %v5832_v34 = vld [vmem:[#allocation3 + $0x20] sm:$0x7f] }
 0x772   : > { %v5833_v20 = vld [vmem:[#allocation3 + $0x28] sm:$0x7f]  ;;  %v5836_v21 = vsel %vm702_vm4, %v5832_v34, 0  ;;  %v5777_v52 = vld [vmem:[#allocation3 + $0x20] sm:$0x3f] }
 0x773   : > { %v5778_v14 = vld [vmem:[#allocation3 + $0x28] sm:$0x3f]  ;;  %v5837_v42 = vsel %vm702_vm4, %v5833_v20, 0  ;;  %v5876_v63 = vrot.slane %v5836_v21, 7  ;;  %v5796_v61 = vsel %vm12507_vm10, %v5777_v52, 0  ;;  %vm6808_vm4 = vcmp.lt.s32.totalorder %v12152_v15, 4 }
 0x774   : > { %v5797_v23 = vsel %vm12507_vm10, %v5778_v14, 0  ;;  %v5879_v24 = vrot.slane %v5837_v42, 7  ;;  %v6092_v50 = vrot.slane %v5796_v61, 6  ;;  %v10945_v34 = vld [vmem:[#allocation10 + $0x214] ss:$8 sps:$4 sm:$0xff]   ;;  %vm6814_vm7 = vmpackc.low %vm6808_vm4, %vm6808_vm4 }
 0x775   : > { %v6095_v2 = vrot.slane %v5797_v23, 6  ;;  %v5877_v36 = vsel %vm784_vm5, %v5875_v6, %v5876_v63  ;;  %v10943_v20 = vld [vmem:[#allocation10 + $0x210] ss:$8 sps:$4 sm:$0xff]   ;;  %v10946_v21 = vld [vmem:[#allocation10 + $0x220] ss:$8 sps:$4 sm:$0xff]  }
 0x776   : > { %v5880_v9 = vsel %vm784_vm5, %v5878_v3, %v5879_v24  ;;  %v6093_v19 = vsel %vm6090_vm11, %v6091_v10, %v6092_v50  ;;  %v10948_v3 = vld [vmem:[#allocation10 + $0x224] ss:$8 sps:$4 sm:$0xff]   ;;  %v10951_v14 = vld [vmem:[#allocation10 + $0x234] ss:$8 sps:$4 sm:$0xff]   ;;  %v10949_v42 = vld [vmem:[#allocation10 + $0x230] ss:$8 sps:$4 sm:$0xff]  }
 0x777   : > { %6075 = vmatprep.mubr.bf16.mxu1 %v5880_v9  ;;  %v6096_v29 = vsel %vm6090_vm11, %v6094_v25, %v6095_v2  ;;  %v10954_v6 = vld [vmem:[#allocation10 + $0x244] ss:$8 sps:$4 sm:$0xff]   ;;  %v10952_v63 = vld [vmem:[#allocation10 + $0x240] ss:$8 sps:$4 sm:$0xff]   ;;  %v10957_v23 = vld [vmem:[#allocation10 + $0x254] ss:$8 sps:$4 sm:$0xff]  }
 0x778   : > { %6076 = vmatmul.mubr.bf16.vlgmr.msra.gmra.mrb[4].mxu1 %v5877_v36  ;;  %v10955_v24 = vld [vmem:[#allocation10 + $0x250] ss:$8 sps:$4 sm:$0xff]   ;;  %v10960_v25 = vld [vmem:[#allocation10 + $0x264] ss:$8 sps:$4 sm:$0xff]   ;;  %v10963_v2 = vld [vmem:[#allocation10 + $0x274] ss:$8 sps:$4 sm:$0xff]  }
 0x779   : > { %6260 = vmatpush1.bf16.msra.mxu1 %v10892_v22  ;;  %6291 = vmatprep.mubr.bf16.mxu1 %v6096_v29  ;;  %v10961_v22 = vld [vmem:[#allocation10 + $0x270] ss:$8 sps:$4 sm:$0xff]   ;;  %v10966_v9 = vld [vmem:[#allocation10 + $0x284] ss:$8 sps:$4 sm:$0xff]   ;;  %v10969_v36 = vld [vmem:[#allocation10 + $0x294] ss:$8 sps:$4 sm:$0xff]  }
 0x77a   : > { %6261 = vmatprep.subr.bf16.mxu1 %v10897_v26  ;;  %v10964_v26 = vld [vmem:[#allocation10 + $0x280] ss:$8 sps:$4 sm:$0xff]   ;;  %v10967_v29 = vld [vmem:[#allocation10 + $0x290] ss:$8 sps:$4 sm:$0xff]   ;;  %v11014_v10 = vld [vmem:[#allocation10 + $0x384] ss:$8 sps:$4 sm:$0xff]  }
 0x77b   : > { %v11000_v52 = vld [vmem:[#allocation10 + $0x340] ss:$8 sps:$4 sm:$0xff]   ;;  %vm6809_vm5 = vcmp.lt.s32.totalorder %v12154_v16, 4  ;;  %v11029_v15 = vld [vmem:[#allocation10 + $0x3d4] ss:$8 sps:$4 sm:$0xff]  }
 0x77c   : > { %v11006_v61 = vld [vmem:[#allocation10 + $0x360] ss:$8 sps:$4 sm:$0xff]   ;;  %vm6815_vm8 = vmpackc.low %vm6809_vm5, %vm6809_vm5  ;;  %v11032_v16 = vld [vmem:[#allocation10 + $0x3e4] ss:$8 sps:$4 sm:$0xff]  }
 0x77d   : > { %6262 = vmatpush1.bf16.msra.mxu1 %v10895_v27  ;;  %v10972_v27 = vld [vmem:[#allocation10 + $0x2a4] ss:$8 sps:$4 sm:$0xff]   ;;  %v11012_v50 = vld [vmem:[#allocation10 + $0x380] ss:$8 sps:$4 sm:$0xff]  }
 0x77e   : > { %6263 = vmatprep.subr.bf16.mxu1 %v10900_v28  ;;  %v10970_v28 = vld [vmem:[#allocation10 + $0x2a0] ss:$8 sps:$4 sm:$0xff]  }
 0x781   : > { %6264 = vmatpush1.bf16.msra.mxu1 %v10898_v30  ;;  %v10975_v30 = vld [vmem:[#allocation10 + $0x2b4] ss:$8 sps:$4 sm:$0xff]  }
 0x782   : > { %6265 = vmatprep.subr.bf16.mxu1 %v10903_v5  ;;  %v10973_v5 = vld [vmem:[#allocation10 + $0x2b0] ss:$8 sps:$4 sm:$0xff]  }
 0x785   : > { %6266 = vmatpush1.bf16.msra.mxu1 %v10901_v32  ;;  %v10978_v32 = vld [vmem:[#allocation10 + $0x2c4] ss:$8 sps:$4 sm:$0xff]  }
 0x786   : > { %6267 = vmatprep.subr.bf16.mxu1 %v10906_v17  ;;  %v10976_v17 = vld [vmem:[#allocation10 + $0x2c0] ss:$8 sps:$4 sm:$0xff]  }
 0x789   : > { %6268 = vmatpush1.bf16.msra.mxu1 %v10904_v33  ;;  %v10981_v33 = vld [vmem:[#allocation10 + $0x2d4] ss:$8 sps:$4 sm:$0xff]  }
 0x78a   : > { %6269 = vmatprep.subr.bf16.mxu1 %v10909_v1  ;;  %v10979_v1 = vld [vmem:[#allocation10 + $0x2d0] ss:$8 sps:$4 sm:$0xff]  }
 0x78d   : > { %6270 = vmatpush1.bf16.msra.mxu1 %v10907_v35  ;;  %v10984_v35 = vld [vmem:[#allocation10 + $0x2e4] ss:$8 sps:$4 sm:$0xff]  }
 0x78e   : > { %6271 = vmatprep.subr.bf16.mxu1 %v10912_v37  ;;  %v10982_v37 = vld [vmem:[#allocation10 + $0x2e0] ss:$8 sps:$4 sm:$0xff]  }
 0x791   : > { %6272 = vmatpush1.bf16.msra.mxu1 %v10910_v0  ;;  %v10987_v0 = vld [vmem:[#allocation10 + $0x2f4] ss:$8 sps:$4 sm:$0xff]  }
 0x792   : > { %6273 = vmatprep.subr.bf16.mxu1 %v10915_v38  ;;  %v6545_v38 = vld [vmem:[#allocation3 + $0x28] sm:$0xfe] }
 0x795   : > { %6274 = vmatpush1.bf16.msra.mxu1 %v10913_v41  ;;  %v6547_v41 = vld [vmem:[#allocation3 + $0x38] sm:$0x1] }
 0x796   : > { %6275 = vmatprep.subr.bf16.mxu1 %v10918_v4  ;;  %v10985_v4 = vld [vmem:[#allocation10 + $0x2f0] ss:$8 sps:$4 sm:$0xff]  }
 0x799   : > { %6276 = vmatpush1.bf16.msra.mxu1 %v10916_v39  ;;  %v6549_v39 = vsel %vm12340_vm3, %v6545_v38, 0 }
 0x79a   : > { %6277 = vmatprep.subr.bf16.mxu1 %v10921_v56  ;;  %v6551_v56 = vsel %vm12340_vm3, %v6547_v41, 0  ;;  %v11039_v41 = vld [vmem:[#allocation10 + $0x410] ss:$8 sps:$4 sm:$0xff]  }
 0x79d   : > { %6278 = vmatpush1.bf16.msra.mxu1 %v10919_v12  ;;  %v10990_v12 = vld [vmem:[#allocation10 + $0x304] ss:$8 sps:$4 sm:$0xff]  }
 0x79e   : > { %6279 = vmatprep.subr.bf16.mxu1 %v10924_v40  ;;  %v6592_v40 = vrot.slane %v6549_v39, 1  ;;  %v11042_v39 = vld [vmem:[#allocation10 + $0x420] ss:$8 sps:$4 sm:$0xff]  }
 0x7a1   : > { %6280 = vmatpush1.bf16.msra.mxu1 %v10922_v44  ;;  %v6593_v44 = vrot.slane %v6551_v56, 1  ;;  %v11047_v56 = vld [vmem:[#allocation10 + $0x434] ss:$8 sps:$4 sm:$0xff]  }
 0x7a2   : > { %6281 = vmatprep.subr.bf16.mxu1 %v10927_v31  ;;  %v10988_v31 = vld [vmem:[#allocation10 + $0x300] ss:$8 sps:$4 sm:$0xff]  }
 0x7a5   : > { %6282 = vmatpush1.bf16.msra.mxu1 %v10925_v43  ;;  %v10993_v43 = vld [vmem:[#allocation10 + $0x314] ss:$8 sps:$4 sm:$0xff]  }
 0x7a6   : > { %6283 = vmatprep.subr.bf16.mxu1 %v10930_v45  ;;  %v6594_v45 = vsel %vm3389_vm6, %v6592_v40, %v6593_v44  ;;  %v11050_v40 = vld [vmem:[#allocation10 + $0x444] ss:$8 sps:$4 sm:$0xff]   ;;  %v11048_v44 = vld [vmem:[#allocation10 + $0x440] ss:$8 sps:$4 sm:$0xff]  }
 0x7a9   : > { %6284 = vmatpush1.bf16.msra.mxu1 %v10928_v48  ;;  %v10991_v48 = vld [vmem:[#allocation10 + $0x310] ss:$8 sps:$4 sm:$0xff]  }
 0x7aa   : > { %6285 = vmatprep.subr.bf16.mxu1 %v10933_v47  ;;  %v10996_v47 = vld [vmem:[#allocation10 + $0x324] ss:$8 sps:$4 sm:$0xff]  }
 0x7ad   : > { %6286 = vmatpush1.bf16.msra.mxu1 %v10931_v51  ;;  %v10994_v51 = vld [vmem:[#allocation10 + $0x320] ss:$8 sps:$4 sm:$0xff]  }
 0x7ae   : > { %6287 = vmatprep.subr.bf16.mxu1 %v10936_v49  ;;  %v10999_v49 = vld [vmem:[#allocation10 + $0x334] ss:$8 sps:$4 sm:$0xff]  }
 0x7b1   : > { %6288 = vmatpush1.bf16.msra.mxu1 %v10934_v54  ;;  %v10997_v54 = vld [vmem:[#allocation10 + $0x330] ss:$8 sps:$4 sm:$0xff]  }
 0x7b2   : > { %6289 = vmatprep.subr.bf16.mxu1 %v10939_v53  ;;  %v11005_v53 = vld [vmem:[#allocation10 + $0x354] ss:$8 sps:$4 sm:$0xff]  }
 0x7b5   : > { %6290 = vmatpush1.bf16.msra.mxu1 %v10937_v7  ;;  %v11011_v7 = vld [vmem:[#allocation10 + $0x374] ss:$8 sps:$4 sm:$0xff]  }
 0x7b6   : > { %6497 = vmatprep.subr.bf16.mxu1 %v10942_v55  ;;  %v11009_v55 = vld [vmem:[#allocation10 + $0x370] ss:$8 sps:$4 sm:$0xff]  }
 0x7b8   : > { %6292 = vmatmul.mubr.bf16.vlgmr.msra.gmra.mrb[4].mxu1 %v6093_v19  ;;  %v11020_v19 = vld [vmem:[#allocation10 + $0x3a4] ss:$8 sps:$4 sm:$0xff]  }
 0x7b9   : > { %6498 = vmatpush1.bf16.msra.mxu1 %v10940_v8  ;;  %6529 = vmatprep.mubr.bf16.mxu1 %v12503_v60  ;;  %v10958_v60 = vld [vmem:[#allocation10 + $0x260] ss:$8 sps:$4 sm:$0xff]   ;;  %v11017_v8 = vld [vmem:[#allocation10 + $0x394] ss:$8 sps:$4 sm:$0xff]  }
 0x7ba   : > { %6499 = vmatprep.subr.bf16.mxu1 %v10945_v34  ;;  %v11015_v34 = vld [vmem:[#allocation10 + $0x390] ss:$8 sps:$4 sm:$0xff]  }
 0x7bd   : > { %6500 = vmatpush1.bf16.msra.mxu1 %v10943_v20  ;;  %v11018_v20 = vld [vmem:[#allocation10 + $0x3a0] ss:$8 sps:$4 sm:$0xff]  }
 0x7be   : > { %6501 = vmatprep.subr.bf16.mxu1 %v10948_v3  ;;  %v11023_v3 = vld [vmem:[#allocation10 + $0x3b4] ss:$8 sps:$4 sm:$0xff]  }
 0x7c1   : > { %6502 = vmatpush1.bf16.msra.mxu1 %v10946_v21  ;;  %v11021_v21 = vld [vmem:[#allocation10 + $0x3b0] ss:$8 sps:$4 sm:$0xff]  }
 0x7c2   : > { %6503 = vmatprep.subr.bf16.mxu1 %v10951_v14  ;;  %v11026_v14 = vld [vmem:[#allocation10 + $0x3c4] ss:$8 sps:$4 sm:$0xff]  }
 0x7c5   : > { %6504 = vmatpush1.bf16.msra.mxu1 %v10949_v42  ;;  %v6816_v42 = vsel %vm6814_vm7, 65537, %v12495_v46 }
 0x7c6   : > { %6505 = vmatprep.subr.bf16.mxu1 %v10954_v6  ;;  %v6817_v6 = vsel %vm6815_vm8, 65537, %v12495_v46  ;;  %v11234_v46 = vld [vmem:[#allocation13 + $0x220] ss:$8 sps:$4 sm:$0xff]  }
 0x7c9   : > { %6506 = vmatpush1.bf16.msra.mxu1 %v10952_v63  ;;  %v11024_v63 = vld [vmem:[#allocation10 + $0x3c0] ss:$8 sps:$4 sm:$0xff]  }
 0x7ca   : > { %6507 = vmatprep.subr.bf16.mxu1 %v10957_v23  ;;  %v9483_v23 = vcombine.low %v6816_v42, %v6817_v6  ;;  %v11081_v42 = vld [vmem:[#allocation10 + $0x4f0] ss:$8 sps:$4 sm:$0xff]   ;;  %v11086_v6 = vld [vmem:[#allocation12 + $0x204] ss:$8 sps:$4 sm:$0xff]  }
 0x7cd   : > { %6508 = vmatpush1.bf16.msra.mxu1 %v10955_v24  ;;  %v11027_v24 = vld [vmem:[#allocation10 + $0x3d0] ss:$8 sps:$4 sm:$0xff]  }
 0x7ce   : > { %6509 = vmatprep.subr.bf16.mxu1 %v10960_v25  ;;  %v6821_v25 = vrot.slane %v9483_v23, 6  ;;  %v11084_v23 = vld [vmem:[#allocation12 + $0x200] ss:$8 sps:$4 sm:$0xff]  }
 0x7d0   : > { %vm12542_vm12 = vcmp.ne.s16.totalorder %v6821_v25, 0  ;;  %v11087_v25 = vld [vmem:[#allocation12 + $0x210] ss:$8 sps:$4 sm:$0xff]  }
 0x7d1   : > { %6510 = vmatpush1.bf16.msra.mxu1 %v10958_v60  ;;  %v6546_v60 = vld [vmem:[#allocation3 + $0x30] sm:$0x1] }
 0x7d2   : > { %6511 = vmatprep.subr.bf16.mxu1 %v10963_v2  ;;  %v11030_v2 = vld [vmem:[#allocation10 + $0x3e0] ss:$8 sps:$4 sm:$0xff]  }
 0x7d5   : > { %6512 = vmatpush1.bf16.msra.mxu1 %v10961_v22  ;;  %v6544_v22 = vld [vmem:[#allocation3 + $0x20] sm:$0xfe] }
 0x7d6   : > { %6513 = vmatprep.subr.bf16.mxu1 %v10966_v9  ;;  %v6807_v9 = vld [vmem:[#allocation3 + $0x38] sm:$0x3] }
 0x7d9   : > { %6514 = vmatpush1.bf16.msra.mxu1 %v10964_v26  ;;  %v11035_v26 = vld [vmem:[#allocation10 + $0x3f4] ss:$8 sps:$4 sm:$0xff]  }
 0x7da   : > { %6515 = vmatprep.subr.bf16.mxu1 %v10969_v36  ;;  %v6805_v36 = vld [vmem:[#allocation3 + $0x28] sm:$0xfc] }
 0x7dd   : > { %6516 = vmatpush1.bf16.msra.mxu1 %v10967_v29  ;;  %v6548_v29 = vsel %vm12340_vm3, %v6544_v22, 0  ;;  %v11095_v22 = vld [vmem:[#allocation12 + $0x234] ss:$8 sps:$4 sm:$0xff]  }
 0x7de   : > { %6517 = vmatprep.subr.bf16.mxu1 %v10972_v27  ;;  %v6550_v27 = vsel %vm12340_vm3, %v6546_v60, 0  ;;  %v11092_v60 = vld [vmem:[#allocation12 + $0x224] ss:$8 sps:$4 sm:$0xff]   ;;  %vm8483_vm3 = vcmask 130048  }
 0x7e1   : > { %6518 = vmatpush1.bf16.msra.mxu1 %v10970_v28  ;;  %v11033_v28 = vld [vmem:[#allocation10 + $0x3f0] ss:$8 sps:$4 sm:$0xff]  }
 0x7e2   : > { %6519 = vmatprep.subr.bf16.mxu1 %v10975_v30  ;;  %v6824_v30 = vsel %vm12542_vm12, %v6805_v36, 0  ;;  %v11096_v36 = vld [vmem:[#allocation12 + $0x240] ss:$8 sps:$4 sm:$0xff]  }
 0x7e5   : > { %6520 = vmatpush1.bf16.msra.mxu1 %v10973_v5  ;;  %v6826_v5 = vsel %vm12542_vm12, %v6807_v9, 0  ;;  %v11093_v9 = vld [vmem:[#allocation12 + $0x230] ss:$8 sps:$4 sm:$0xff]  }
 0x7e6   : > { %6521 = vmatprep.subr.bf16.mxu1 %v10978_v32  ;;  %v11038_v32 = vld [vmem:[#allocation10 + $0x404] ss:$8 sps:$4 sm:$0xff]  }
 0x7e9   : > { %6522 = vmatpush1.bf16.msra.mxu1 %v10976_v17  ;;  %v6589_v17 = vrot.slane %v6548_v29, 1  ;;  %v11101_v29 = vld [vmem:[#allocation12 + $0x254] ss:$8 sps:$4 sm:$0xff]  }
 0x7ea   : > { %6523 = vmatprep.subr.bf16.mxu1 %v10981_v33  ;;  %v6590_v33 = vrot.slane %v6550_v27, 1  ;;  %v11099_v27 = vld [vmem:[#allocation12 + $0x250] ss:$8 sps:$4 sm:$0xff]  }
 0x7ed   : > { %6524 = vmatpush1.bf16.msra.mxu1 %v10979_v1  ;;  %v6868_v1 = vrot.slane %v6824_v30, 2  ;;  %v11102_v30 = vld [vmem:[#allocation12 + $0x260] ss:$8 sps:$4 sm:$0xff]  }
 0x7ee   : > { %6525 = vmatprep.subr.bf16.mxu1 %v10984_v35  ;;  %v6869_v35 = vrot.slane %v6826_v5, 2  ;;  %v11107_v5 = vld [vmem:[#allocation12 + $0x274] ss:$8 sps:$4 sm:$0xff]  }
 0x7f0   : > { %v6870_v38 = vsel %vm6864_vm13, %v6868_v1, %v6869_v35  ;;  %v11113_v1 = vld [vmem:[#allocation12 + $0x294] ss:$8 sps:$4 sm:$0xff]   ;;  %v11111_v35 = vld [vmem:[#allocation12 + $0x290] ss:$8 sps:$4 sm:$0xff]  }
 0x7f1   : > { %6526 = vmatpush1.bf16.msra.mxu1 %v10982_v37  ;;  %v11036_v37 = vld [vmem:[#allocation10 + $0x400] ss:$8 sps:$4 sm:$0xff]  }
 0x7f2   : > { %6527 = vmatprep.subr.bf16.mxu1 %v10987_v0  ;;  %v6591_v0 = vsel %vm3389_vm6, %v6589_v17, %v6590_v33  ;;  %v11110_v17 = vld [vmem:[#allocation12 + $0x284] ss:$8 sps:$4 sm:$0xff]   ;;  %v11108_v33 = vld [vmem:[#allocation12 + $0x280] ss:$8 sps:$4 sm:$0xff]  }
 0x7f5   : > { %6528 = vmatpush1.bf16.msra.mxu1 %v10985_v4  ;;  %v11044_v4 = vld [vmem:[#allocation10 + $0x424] ss:$8 sps:$4 sm:$0xff]  }
 0x7f6   : > { %6757 = vmatprep.subr.bf16.mxu1 %v10990_v12  ;;  %v11045_v12 = vld [vmem:[#allocation10 + $0x430] ss:$8 sps:$4 sm:$0xff]  }
 0x7f8   : > { %6530 = vmatmul.mubr.bf16.vlgmr.msra.gmra.mrb[4].mxu1 %v12501_v58  ;;  %v11003_v58 = vld [vmem:[#allocation10 + $0x350] ss:$8 sps:$4 sm:$0xff]  }
 0x7f9   : > { %6758 = vmatpush1.bf16.msra.mxu1 %v10988_v31  ;;  %6789 = vmatprep.mubr.bf16.mxu1 %v6594_v45  ;;  %v11053_v31 = vld [vmem:[#allocation10 + $0x454] ss:$8 sps:$4 sm:$0xff]   ;;  %v11056_v45 = vld [vmem:[#allocation10 + $0x464] ss:$8 sps:$4 sm:$0xff]  }
 0x7fa   : > { %6759 = vmatprep.subr.bf16.mxu1 %v10993_v43  ;;  %v11051_v43 = vld [vmem:[#allocation10 + $0x450] ss:$8 sps:$4 sm:$0xff]  }
 0x7fd   : > { %6760 = vmatpush1.bf16.msra.mxu1 %v10991_v48  ;;  %v11054_v48 = vld [vmem:[#allocation10 + $0x460] ss:$8 sps:$4 sm:$0xff]  }
 0x7fe   : > { %6761 = vmatprep.subr.bf16.mxu1 %v10996_v47  ;;  %v11059_v47 = vld [vmem:[#allocation10 + $0x474] ss:$8 sps:$4 sm:$0xff]  }
 0x801   : > { %6762 = vmatpush1.bf16.msra.mxu1 %v10994_v51  ;;  %v11057_v51 = vld [vmem:[#allocation10 + $0x470] ss:$8 sps:$4 sm:$0xff]  }
 0x802   : > { %6763 = vmatprep.subr.bf16.mxu1 %v10999_v49  ;;  %v11062_v49 = vld [vmem:[#allocation10 + $0x484] ss:$8 sps:$4 sm:$0xff]  }
 0x805   : > { %6764 = vmatpush1.bf16.msra.mxu1 %v10997_v54  ;;  %v11060_v54 = vld [vmem:[#allocation10 + $0x480] ss:$8 sps:$4 sm:$0xff]  }
 0x806   : > { %6765 = vmatprep.subr.bf16.mxu1 %v11002_v59  ;;  %v11065_v59 = vld [vmem:[#allocation10 + $0x494] ss:$8 sps:$4 sm:$0xff]  }
 0x809   : > { %6766 = vmatpush1.bf16.msra.mxu1 %v11000_v52  ;;  %v11063_v52 = vld [vmem:[#allocation10 + $0x490] ss:$8 sps:$4 sm:$0xff]  }
 0x80a   : > { %6767 = vmatprep.subr.bf16.mxu1 %v11005_v53  ;;  %v11068_v53 = vld [vmem:[#allocation10 + $0x4a4] ss:$8 sps:$4 sm:$0xff]  }
 0x80d   : > { %6768 = vmatpush1.bf16.msra.mxu1 %v11003_v58  ;;  %v11066_v58 = vld [vmem:[#allocation10 + $0x4a0] ss:$8 sps:$4 sm:$0xff]  }
 0x80e   : > { %6769 = vmatprep.subr.bf16.mxu1 %v11008_v57  ;;  %v11071_v57 = vld [vmem:[#allocation10 + $0x4b4] ss:$8 sps:$4 sm:$0xff]  }
 0x811   : > { %6770 = vmatpush1.bf16.msra.mxu1 %v11006_v61  ;;  %v11069_v61 = vld [vmem:[#allocation10 + $0x4b0] ss:$8 sps:$4 sm:$0xff]  }
 0x812   : > { %6771 = vmatprep.subr.bf16.mxu1 %v11011_v7  ;;  %v11074_v7 = vld [vmem:[#allocation10 + $0x4c4] ss:$8 sps:$4 sm:$0xff]  }
 0x815   : > { %6772 = vmatpush1.bf16.msra.mxu1 %v11009_v55  ;;  %v11072_v55 = vld [vmem:[#allocation10 + $0x4c0] ss:$8 sps:$4 sm:$0xff]  }
 0x816   : > { %6773 = vmatprep.subr.bf16.mxu1 %v11014_v10  ;;  %v11077_v10 = vld [vmem:[#allocation10 + $0x4d4] ss:$8 sps:$4 sm:$0xff]  }
 0x819   : > { %6774 = vmatpush1.bf16.msra.mxu1 %v11012_v50  ;;  %v11075_v50 = vld [vmem:[#allocation10 + $0x4d0] ss:$8 sps:$4 sm:$0xff]  }
 0x81a   : > { %6775 = vmatprep.subr.bf16.mxu1 %v11017_v8  ;;  %v11080_v8 = vld [vmem:[#allocation10 + $0x4e4] ss:$8 sps:$4 sm:$0xff]  }
 0x81d   : > { %6776 = vmatpush1.bf16.msra.mxu1 %v11015_v34  ;;  %v11078_v34 = vld [vmem:[#allocation10 + $0x4e0] ss:$8 sps:$4 sm:$0xff]  }
 0x81e   : > { %6777 = vmatprep.subr.bf16.mxu1 %v11020_v19  ;;  %v6804_v19 = vld [vmem:[#allocation3 + $0x20] sm:$0xfc] }
 0x821   : > { %6778 = vmatpush1.bf16.msra.mxu1 %v11018_v20  ;;  %v6806_v20 = vld [vmem:[#allocation3 + $0x30] sm:$0x3] }
 0x822   : > { %6779 = vmatprep.subr.bf16.mxu1 %v11023_v3  ;;  %v11083_v3 = vld [vmem:[#allocation10 + $0x4f4] ss:$8 sps:$4 sm:$0xff]  }
 0x825   : > { %6780 = vmatpush1.bf16.msra.mxu1 %v11021_v21  ;;  %v6823_v21 = vsel %vm12542_vm12, %v6804_v19, 0 }
 0x826   : > { %6781 = vmatprep.subr.bf16.mxu1 %v11026_v14  ;;  %v6825_v14 = vsel %vm12542_vm12, %v6806_v20, 0 }
 0x829   : > { %6782 = vmatpush1.bf16.msra.mxu1 %v11024_v63  ;;  %v6865_v63 = vrot.slane %v6823_v21, 2 }
 0x82a   : > { %6783 = vmatprep.subr.bf16.mxu1 %v11029_v15  ;;  %v6866_v15 = vrot.slane %v6825_v14, 2 }
 0x82d   : > { %6784 = vmatpush1.bf16.msra.mxu1 %v11027_v24  ;;  %v11089_v24 = vld [vmem:[#allocation12 + $0x214] ss:$8 sps:$4 sm:$0xff]  }
 0x82e   : > { %6785 = vmatprep.subr.bf16.mxu1 %v11032_v16  ;;  %v6867_v16 = vsel %vm6864_vm13, %v6865_v63, %v6866_v15  ;;  %v11137_v63 = vld [vmem:[#allocation12 + $0x114] ss:$8 sps:$4 sm:$0xff]   ;;  %v7123_v15 = vld [vmem:[#allocation3 + $0x18] sm:$0xc0] }
 0x831   : > { %6786 = vmatpush1.bf16.msra.mxu1 %v11030_v2  ;;  %v11090_v2 = vld [vmem:[#allocation12 + $0x220] ss:$8 sps:$4 sm:$0xff]  }
 0x832   : > { %6787 = vmatprep.subr.bf16.mxu1 %v11035_v26  ;;  %v11098_v26 = vld [vmem:[#allocation12 + $0x244] ss:$8 sps:$4 sm:$0xff]  }
 0x835   : > { %6788 = vmatpush1.bf16.msra.mxu1 %v11033_v28  ;;  %v11104_v28 = vld [vmem:[#allocation12 + $0x264] ss:$8 sps:$4 sm:$0xff]  }
 0x836   : > { %7033 = vmatprep.subr.bf16.mxu1 %v11038_v32  ;;  %v11105_v32 = vld [vmem:[#allocation12 + $0x270] ss:$8 sps:$4 sm:$0xff]  }
 0x838   : > { %6790 = vmatmul.mubr.bf16.vlgmr.msra.gmra.mrb[4].mxu1 %v6591_v0  ;;  %v11119_v0 = vld [vmem:[#allocation12 + $0x2b4] ss:$8 sps:$4 sm:$0xff]  }
 0x839   : > { %7034 = vmatpush1.bf16.msra.mxu1 %v11036_v37  ;;  %7065 = vmatprep.mubr.bf16.mxu1 %v6870_v38  ;;  %v11116_v37 = vld [vmem:[#allocation12 + $0x2a4] ss:$8 sps:$4 sm:$0xff]   ;;  %v11117_v38 = vld [vmem:[#allocation12 + $0x2b0] ss:$8 sps:$4 sm:$0xff]  }
 0x83a   : > { %7035 = vmatprep.subr.bf16.mxu1 %v11041_v18  ;;  %v11114_v18 = vld [vmem:[#allocation12 + $0x2a0] ss:$8 sps:$4 sm:$0xff]  }
 0x83d   : > { %7036 = vmatpush1.bf16.msra.mxu1 %v11039_v41  ;;  %v11122_v41 = vld [vmem:[#allocation12 + $0x2c4] ss:$8 sps:$4 sm:$0xff]  }
 0x83e   : > { %7037 = vmatprep.subr.bf16.mxu1 %v11044_v4  ;;  %v11120_v4 = vld [vmem:[#allocation12 + $0x2c0] ss:$8 sps:$4 sm:$0xff]  }
 0x841   : > { %7038 = vmatpush1.bf16.msra.mxu1 %v11042_v39  ;;  %v11125_v39 = vld [vmem:[#allocation12 + $0x2d4] ss:$8 sps:$4 sm:$0xff]  }
 0x842   : > { %7039 = vmatprep.subr.bf16.mxu1 %v11047_v56  ;;  %v11123_v56 = vld [vmem:[#allocation12 + $0x2d0] ss:$8 sps:$4 sm:$0xff]  }
 0x845   : > { %7040 = vmatpush1.bf16.msra.mxu1 %v11045_v12  ;;  %v11128_v12 = vld [vmem:[#allocation12 + $0x2e4] ss:$8 sps:$4 sm:$0xff]  }
 0x846   : > { %7041 = vmatprep.subr.bf16.mxu1 %v11050_v40  ;;  %v11126_v40 = vld [vmem:[#allocation12 + $0x2e0] ss:$8 sps:$4 sm:$0xff]  }
 0x849   : > { %7042 = vmatpush1.bf16.msra.mxu1 %v11048_v44  ;;  %v11131_v44 = vld [vmem:[#allocation12 + $0x2f4] ss:$8 sps:$4 sm:$0xff]  }
 0x84a   : > { %7043 = vmatprep.subr.bf16.mxu1 %v11053_v31  ;;  %v11129_v31 = vld [vmem:[#allocation12 + $0x2f0] ss:$8 sps:$4 sm:$0xff]  }
 0x84d   : > { %7044 = vmatpush1.bf16.msra.mxu1 %v11051_v43  ;;  %v11134_v43 = vld [vmem:[#allocation12 + $0x104] ss:$8 sps:$4 sm:$0xff]  }
 0x84e   : > { %7045 = vmatprep.subr.bf16.mxu1 %v11056_v45  ;;  %v7081_v45 = vld [vmem:[#allocation16 + $0x2] ss:$8 sm:$0x3] }
 0x851   : > { %7046 = vmatpush1.bf16.msra.mxu1 %v11054_v48  ;;  %v7098_v48 = vld [vmem:[#allocation18 + $0x2] ss:$8 sm:$0x3] }
 0x852   : > { %7047 = vmatprep.subr.bf16.mxu1 %v11059_v47  ;;  %v7086_v47 = vrot.slane %v7081_v45, %v12412_v11 }
 0x855   : > { %7048 = vmatpush1.bf16.msra.mxu1 %v11057_v51  ;;  %v7090_v51 = vrot.slane %v7081_v45, %v12415_v13  ;;  %v7122_v45 = vld [vmem:[#allocation3 + $0x10] sm:$0xc0] }
 0x856   : > { %7049 = vmatprep.subr.bf16.mxu1 %v11062_v49  ;;  %v7103_v49 = vrot.slane %v7098_v48, %v12412_v11 }
 0x859   : > { %7050 = vmatpush1.bf16.msra.mxu1 %v11060_v54 }
 0x85a   : > { %7051 = vmatprep.subr.bf16.mxu1 %v11065_v59  ;;  %v7107_v59 = vrot.slane %v7098_v48, %v12415_v13 }
 0x85d   : > { %7052 = vmatpush1.bf16.msra.mxu1 %v11063_v52 }
 0x85e   : > { %7053 = vmatprep.subr.bf16.mxu1 %v11068_v53 }
 0x861   : > { %7054 = vmatpush1.bf16.msra.mxu1 %v11066_v58 }
 0x862   : > { %7055 = vmatprep.subr.bf16.mxu1 %v11071_v57 }
 0x865   : > { %7056 = vmatpush1.bf16.msra.mxu1 %v11069_v61 }
 0x866   : > { %7057 = vmatprep.subr.bf16.mxu1 %v11074_v7 }
 0x869   : > { %7058 = vmatpush1.bf16.msra.mxu1 %v11072_v55 }
 0x86a   : > { %7059 = vmatprep.subr.bf16.mxu1 %v11077_v10 }
 0x86d   : > { %7060 = vmatpush1.bf16.msra.mxu1 %v11075_v50 }
 0x86e   : > { %7061 = vmatprep.subr.bf16.mxu1 %v11080_v8 }
 0x871   : > { %7062 = vmatpush1.bf16.msra.mxu1 %v11078_v34 }
 0x872   : > { %7063 = vmatprep.subr.bf16.mxu1 %v11083_v3 }
 0x875   : > { %7064 = vmatpush1.bf16.msra.mxu1 %v11081_v42 }
 0x876   : > { %7358 = vmatprep.subr.bf16.mxu1 %v11086_v6  ;;  %v11132_v6 = vld [vmem:[#allocation12 + $0x100] ss:$8 sps:$4 sm:$0xff]  }
 0x878   : > { %7066 = vmatmul.mubr.bf16.vlgmr.msra.gmra.mrb[4].mxu1 %v6867_v16  ;;  %v7127_v16 = vsel %vm12507_vm10, %v7123_v15, 0  ;;  %v11195_v15 = vld [vmem:[#allocation12 + $0x350] ss:$8 sps:$4 sm:$0xff]  }
 0x879   : > { %7359 = vmatpush1.bf16.msra.mxu1 %v11084_v23  ;;  %v11135_v23 = vld [vmem:[#allocation12 + $0x110] ss:$8 sps:$4 sm:$0xff]  }
 0x87a   : > { %7360 = vmatprep.subr.bf16.mxu1 %v11089_v24  ;;  %v11140_v24 = vld [vmem:[#allocation12 + $0x124] ss:$8 sps:$4 sm:$0xff]  }
 0x87d   : > { %7361 = vmatpush1.bf16.msra.mxu1 %v11087_v25  ;;  %v11138_v25 = vld [vmem:[#allocation12 + $0x120] ss:$8 sps:$4 sm:$0xff]  }
 0x87e   : > { %7362 = vmatprep.subr.bf16.mxu1 %v11092_v60 }
 0x881   : > { %7363 = vmatpush1.bf16.msra.mxu1 %v11090_v2  ;;  %v7408_v2 = vrot.slane %v7127_v16, 6  ;;  %v11203_v16 = vld [vmem:[#allocation12 + $0x374] ss:$8 sps:$4 sm:$0xff]  }
 0x882   : > { %7364 = vmatprep.subr.bf16.mxu1 %v11095_v22  ;;  %v11143_v22 = vld [vmem:[#allocation12 + $0x134] ss:$8 sps:$4 sm:$0xff]  }
 0x885   : > { %7365 = vmatpush1.bf16.msra.mxu1 %v11093_v9 }
 0x886   : > { %7366 = vmatprep.subr.bf16.mxu1 %v11098_v26 }
 0x889   : > { %7367 = vmatpush1.bf16.msra.mxu1 %v11096_v36  ;;  %v11141_v36 = vld [vmem:[#allocation12 + $0x130] ss:$8 sps:$4 sm:$0xff]  }
 0x88a   : > { %7368 = vmatprep.subr.bf16.mxu1 %v11101_v29 }
 0x88d   : > { %7369 = vmatpush1.bf16.msra.mxu1 %v11099_v27  ;;  %v11146_v27 = vld [vmem:[#allocation12 + $0x144] ss:$8 sps:$4 sm:$0xff]  }
 0x88e   : > { %7370 = vmatprep.subr.bf16.mxu1 %v11104_v28  ;;  %v11144_v28 = vld [vmem:[#allocation12 + $0x140] ss:$8 sps:$4 sm:$0xff]  }
 0x891   : > { %7371 = vmatpush1.bf16.msra.mxu1 %v11102_v30  ;;  %v11149_v30 = vld [vmem:[#allocation12 + $0x154] ss:$8 sps:$4 sm:$0xff]  }
 0x892   : > { %7372 = vmatprep.subr.bf16.mxu1 %v11107_v5  ;;  %v11147_v5 = vld [vmem:[#allocation12 + $0x150] ss:$8 sps:$4 sm:$0xff]  }
 0x895   : > { %7373 = vmatpush1.bf16.msra.mxu1 %v11105_v32  ;;  %v11152_v32 = vld [vmem:[#allocation12 + $0x164] ss:$8 sps:$4 sm:$0xff]  }
 0x896   : > { %7374 = vmatprep.subr.bf16.mxu1 %v11110_v17  ;;  %v11150_v17 = vld [vmem:[#allocation12 + $0x160] ss:$8 sps:$4 sm:$0xff]  }
 0x899   : > { %7375 = vmatpush1.bf16.msra.mxu1 %v11108_v33  ;;  %v11155_v33 = vld [vmem:[#allocation12 + $0x174] ss:$8 sps:$4 sm:$0xff]  }
 0x89a   : > { %7376 = vmatprep.subr.bf16.mxu1 %v11113_v1  ;;  %v11153_v1 = vld [vmem:[#allocation12 + $0x170] ss:$8 sps:$4 sm:$0xff]  }
 0x89d   : > { %7377 = vmatpush1.bf16.msra.mxu1 %v11111_v35  ;;  %v11158_v35 = vld [vmem:[#allocation12 + $0x184] ss:$8 sps:$4 sm:$0xff]  }
 0x89e   : > { %7378 = vmatprep.subr.bf16.mxu1 %v11116_v37  ;;  %v11156_v37 = vld [vmem:[#allocation12 + $0x180] ss:$8 sps:$4 sm:$0xff]  }
 0x8a1   : > { %7379 = vmatpush1.bf16.msra.mxu1 %v11114_v18  ;;  %v11161_v18 = vld [vmem:[#allocation12 + $0x194] ss:$8 sps:$4 sm:$0xff]  }
 0x8a2   : > { %7380 = vmatprep.subr.bf16.mxu1 %v11119_v0  ;;  %v11159_v0 = vld [vmem:[#allocation12 + $0x190] ss:$8 sps:$4 sm:$0xff]  }
 0x8a5   : > { %7381 = vmatpush1.bf16.msra.mxu1 %v11117_v38  ;;  %v11164_v38 = vld [vmem:[#allocation12 + $0x1a4] ss:$8 sps:$4 sm:$0xff]  }
 0x8a6   : > { %7382 = vmatprep.subr.bf16.mxu1 %v11122_v41  ;;  %v11162_v41 = vld [vmem:[#allocation12 + $0x1a0] ss:$8 sps:$4 sm:$0xff]  }
 0x8a9   : > { %7383 = vmatpush1.bf16.msra.mxu1 %v11120_v4  ;;  %v11167_v4 = vld [vmem:[#allocation12 + $0x1b4] ss:$8 sps:$4 sm:$0xff]  }
 0x8aa   : > { %7384 = vmatprep.subr.bf16.mxu1 %v11125_v39  ;;  %v11165_v39 = vld [vmem:[#allocation12 + $0x1b0] ss:$8 sps:$4 sm:$0xff]  }
 0x8ad   : > { %7385 = vmatpush1.bf16.msra.mxu1 %v11123_v56  ;;  %v11170_v56 = vld [vmem:[#allocation12 + $0x1c4] ss:$8 sps:$4 sm:$0xff]  }
 0x8ae   : > { %7386 = vmatprep.subr.bf16.mxu1 %v11128_v12  ;;  %v11168_v12 = vld [vmem:[#allocation12 + $0x1c0] ss:$8 sps:$4 sm:$0xff]  }
 0x8b1   : > { %7387 = vmatpush1.bf16.msra.mxu1 %v11126_v40  ;;  %v11173_v40 = vld [vmem:[#allocation12 + $0x1d4] ss:$8 sps:$4 sm:$0xff]  }
 0x8b2   : > { %7388 = vmatprep.subr.bf16.mxu1 %v11131_v44  ;;  %v11171_v44 = vld [vmem:[#allocation12 + $0x1d0] ss:$8 sps:$4 sm:$0xff]  }
 0x8b5   : > { %7389 = vmatpush1.bf16.msra.mxu1 %v11129_v31  ;;  %v11176_v31 = vld [vmem:[#allocation12 + $0x1e4] ss:$8 sps:$4 sm:$0xff]  }
 0x8b6   : > { %7573 = vmatprep.subr.bf16.mxu1 %v11134_v43  ;;  %v11174_v43 = vld [vmem:[#allocation12 + $0x1e0] ss:$8 sps:$4 sm:$0xff]  }
 0x94b   : > { %v7067_v54 = vpop.f32.mrb[4].mxu1 }
 0x94c   : > { %v7093_v52 = vmul.f32 %v7086_v47, %v7067_v54  ;;  %v7069_v53 = vpop.f32.mrb[5].mxu1  ;;  %v7126_v54 = vsel %vm12507_vm10, %v7122_v45, 0  ;;  %v11237_v45 = vld [vmem:[#allocation13 + $0x230] ss:$8 sps:$4 sm:$0xff]  }
 0x94d   : > { %v7094_v58 = vmul.f32 %v7090_v51, %v7069_v53  ;;  %v7071_v57 = vpop.f32.mrb[6].mxu1 }
 0x94e   : > { %v7110_v61 = vadd.f32 %v7103_v49, %v7093_v52  ;;  %v7095_v7 = vmul.f32 %v7086_v47, %v7071_v57  ;;  %v7073_v55 = vpop.f32.mrb[7].mxu1  ;;  %v11179_v47 = vld [vmem:[#allocation12 + $0x1f4] ss:$8 sps:$4 sm:$0xff]   ;;  %v11177_v52 = vld [vmem:[#allocation12 + $0x1f0] ss:$8 sps:$4 sm:$0xff]  }
 0x94f   : > { %v7111_v10 = vadd.f32 %v7107_v59, %v7094_v58  ;;  %v7096_v50 = vmul.f32 %v7090_v51, %v7073_v55  ;;  %v11182_v57 = vld [vmem:[#allocation12 + $0x304] ss:$8 sps:$4 sm:$0xff]  }
 0x950   : > { %v7112_v8 = vadd.f32 %v7103_v49, %v7095_v7  ;;  %v7114_v19 = vmax.f32 %v7110_v61, 0.0  ;;  %v7619_v49 = vld [vmem:[#allocation3 + $0x38] sm:$0x3]  ;;  %v7405_v61 = vrot.slane %v7126_v54, 6  ;;  %v11248_v54 = vld [vmem:[#allocation13 + $0x264] ss:$8 sps:$4 sm:$0xff]  }
 0x951   : > { %v7113_v34 = vadd.f32 %v7107_v59, %v7096_v50  ;;  %v7115_v3 = vmax.f32 %v7111_v10, 0.0  ;;  %v7623_v58 = vsel %vm12542_vm12, %v7619_v49, 0  ;;  %v11180_v50 = vld [vmem:[#allocation12 + $0x300] ss:$8 sps:$4 sm:$0xff]   ;;  %v11243_v49 = vld [vmem:[#allocation13 + $0x250] ss:$8 sps:$4 sm:$0xff]  }
 0x952   : > { %v7116_v20 = vmax.f32 %v7112_v8, 0.0  ;;  %v7665_v10 = vrot.slane %v7623_v58, 2  ;;  %v11185_v8 = vld [vmem:[#allocation12 + $0x314] ss:$8 sps:$4 sm:$0xff]   ;;  %v11254_v58 = vld [vmem:[#allocation13 + $0x284] ss:$8 sps:$4 sm:$0xff]  }
 0x953   : > { %v7117_v21 = vmax.f32 %v7113_v34, 0.0 }
 0x954   : > { %v7118_v14 = vpack.c.bf16 %v7116_v20, %v7114_v19  ;;  %v11183_v19 = vld [vmem:[#allocation12 + $0x310] ss:$8 sps:$4 sm:$0xff]   ;;  %v11188_v20 = vld [vmem:[#allocation12 + $0x324] ss:$8 sps:$4 sm:$0xff]  }
 0x955   : > { %v7119_v42 = vpack.c.bf16 %v7117_v21, %v7115_v3  ;;  %v11186_v3 = vld [vmem:[#allocation12 + $0x320] ss:$8 sps:$4 sm:$0xff]   ;;  %v11191_v21 = vld [vmem:[#allocation12 + $0x334] ss:$8 sps:$4 sm:$0xff]  }
 0x956   : > { %7120 = vst [vmem:[#allocation3 + $0x20] sm:$0xff] %v7118_v14 }
 0x957   : > { %7121 = vst [vmem:[#allocation3 + $0x28] sm:$0xff] %v7119_v42  ;;  %7390 = vmatprep.mubr.bf16.mxu1 %v7119_v42  ;;  %v11194_v42 = vld [vmem:[#allocation12 + $0x344] ss:$8 sps:$4 sm:$0xff]  }
 0x958   : > { %7391 = vmatmul.mubr.bf16.vlgmr.msra.gmra.mrb[8].mxu1 %v7118_v14  ;;  %v11189_v14 = vld [vmem:[#allocation12 + $0x330] ss:$8 sps:$4 sm:$0xff]  }
 0x959   : > { %7574 = vmatpush1.bf16.msra.mxu1 %v11132_v6  ;;  %v11192_v6 = vld [vmem:[#allocation12 + $0x340] ss:$8 sps:$4 sm:$0xff]  }
 0x95a   : > { %7575 = vmatprep.subr.bf16.mxu1 %v11137_v63  ;;  %v11197_v63 = vld [vmem:[#allocation12 + $0x354] ss:$8 sps:$4 sm:$0xff]  }
 0x95d   : > { %7576 = vmatpush1.bf16.msra.mxu1 %v11135_v23  ;;  %v7124_v48 = vld [vmem:[#allocation3 + $0x20] sm:$0x3f]  ;;  %v11200_v23 = vld [vmem:[#allocation12 + $0x364] ss:$8 sps:$4 sm:$0xff]  }
 0x95e   : > { %v7125_v60 = vld [vmem:[#allocation3 + $0x28] sm:$0x3f]  ;;  %7577 = vmatprep.subr.bf16.mxu1 %v11140_v24  ;;  %v7128_v59 = vsel %vm12507_vm10, %v7124_v48, 0  ;;  %v11198_v24 = vld [vmem:[#allocation12 + $0x360] ss:$8 sps:$4 sm:$0xff]  }
 0x95f   : > { %v7129_v9 = vsel %vm12507_vm10, %v7125_v60, 0  ;;  %v7617_v51 = vld [vmem:[#allocation3 + $0x28] sm:$0xfc]  ;;  %v7406_v7 = vrot.slane %v7128_v59, 6  ;;  %v11206_v60 = vld [vmem:[#allocation12 + $0x384] ss:$8 sps:$4 sm:$0xff]  }
 0x960   : > { %v7409_v26 = vrot.slane %v7129_v9, 6  ;;  %v7621_v53 = vsel %vm12542_vm12, %v7617_v51, 0  ;;  %v11207_v9 = vld [vmem:[#allocation12 + $0x390] ss:$8 sps:$4 sm:$0xff]   ;;  %v11242_v48 = vld [vmem:[#allocation13 + $0x244] ss:$8 sps:$4 sm:$0xff]  }
 0x961   : > { %7578 = vmatpush1.bf16.msra.mxu1 %v11138_v25  ;;  %v7664_v55 = vrot.slane %v7621_v53, 2  ;;  %v7407_v62 = vsel %vm6090_vm11, %v7405_v61, %v7406_v7  ;;  %v11201_v25 = vld [vmem:[#allocation12 + $0x370] ss:$8 sps:$4 sm:$0xff]   ;;  %v11245_v51 = vld [vmem:[#allocation13 + $0x254] ss:$8 sps:$4 sm:$0xff]  }
 0x962   : > { %v7410_v29 = vsel %vm6090_vm11, %v7408_v2, %v7409_v26  ;;  %7579 = vmatprep.subr.bf16.mxu1 %v11143_v22  ;;  %v11204_v2 = vld [vmem:[#allocation12 + $0x380] ss:$8 sps:$4 sm:$0xff]   ;;  %v11209_v22 = vld [vmem:[#allocation12 + $0x394] ss:$8 sps:$4 sm:$0xff]   ;;  %v11212_v26 = vld [vmem:[#allocation12 + $0x3a4] ss:$8 sps:$4 sm:$0xff]  }
 0x963   : > { %7605 = vmatprep.mubr.bf16.mxu1 %v7410_v29  ;;  %v7666_v34 = vsel %vm6864_vm13, %v7664_v55, %v7665_v10  ;;  %v11215_v29 = vld [vmem:[#allocation12 + $0x3b4] ss:$8 sps:$4 sm:$0xff]   ;;  %v11246_v59 = vld [vmem:[#allocation13 + $0x260] ss:$8 sps:$4 sm:$0xff]   ;;  %v11249_v53 = vld [vmem:[#allocation13 + $0x270] ss:$8 sps:$4 sm:$0xff]  }
 0x964   : > { %v11257_v61 = vld [vmem:[#allocation13 + $0x294] ss:$8 sps:$4 sm:$0xff]   ;;  %v11255_v7 = vld [vmem:[#allocation13 + $0x290] ss:$8 sps:$4 sm:$0xff]   ;;  %v11260_v55 = vld [vmem:[#allocation13 + $0x2a4] ss:$8 sps:$4 sm:$0xff]  }
 0x965   : > { %7580 = vmatpush1.bf16.msra.mxu1 %v11141_v36  ;;  %v11210_v36 = vld [vmem:[#allocation12 + $0x3a0] ss:$8 sps:$4 sm:$0xff]  }
 0x966   : > { %7581 = vmatprep.subr.bf16.mxu1 %v11146_v27  ;;  %v11213_v27 = vld [vmem:[#allocation12 + $0x3b0] ss:$8 sps:$4 sm:$0xff]   ;;  %v11258_v10 = vld [vmem:[#allocation13 + $0x2a0] ss:$8 sps:$4 sm:$0xff]  }
 0x969   : > { %7582 = vmatpush1.bf16.msra.mxu1 %v11144_v28  ;;  %v11218_v28 = vld [vmem:[#allocation12 + $0x3c4] ss:$8 sps:$4 sm:$0xff]  }
 0x96a   : > { %7583 = vmatprep.subr.bf16.mxu1 %v11149_v30  ;;  %v11216_v30 = vld [vmem:[#allocation12 + $0x3c0] ss:$8 sps:$4 sm:$0xff]  }
 0x96d   : > { %7584 = vmatpush1.bf16.msra.mxu1 %v11147_v5  ;;  %v11221_v5 = vld [vmem:[#allocation12 + $0x3d4] ss:$8 sps:$4 sm:$0xff]  }
 0x96e   : > { %7585 = vmatprep.subr.bf16.mxu1 %v11152_v32  ;;  %v11219_v32 = vld [vmem:[#allocation12 + $0x3d0] ss:$8 sps:$4 sm:$0xff]  }
 0x971   : > { %7586 = vmatpush1.bf16.msra.mxu1 %v11150_v17  ;;  %v11224_v17 = vld [vmem:[#allocation12 + $0x3e4] ss:$8 sps:$4 sm:$0xff]  }
 0x972   : > { %7587 = vmatprep.subr.bf16.mxu1 %v11155_v33  ;;  %v11222_v33 = vld [vmem:[#allocation12 + $0x3e0] ss:$8 sps:$4 sm:$0xff]  }
 0x975   : > { %7588 = vmatpush1.bf16.msra.mxu1 %v11153_v1  ;;  %v7616_v1 = vld [vmem:[#allocation3 + $0x20] sm:$0xfc] }
 0x976   : > { %7589 = vmatprep.subr.bf16.mxu1 %v11158_v35  ;;  %v7618_v35 = vld [vmem:[#allocation3 + $0x30] sm:$0x3] }
 0x979   : > { %7590 = vmatpush1.bf16.msra.mxu1 %v11156_v37  ;;  %v11227_v37 = vld [vmem:[#allocation12 + $0x3f4] ss:$8 sps:$4 sm:$0xff]  }
 0x97a   : > { %7591 = vmatprep.subr.bf16.mxu1 %v11161_v18  ;;  %v7620_v18 = vsel %vm12542_vm12, %v7616_v1, 0  ;;  %v11306_v1 = vld [vmem:[#allocation15 + $0x2a0] ss:$8 sps:$4 sm:$0xff]  }
 0x97d   : > { %7592 = vmatpush1.bf16.msra.mxu1 %v11159_v0  ;;  %v7622_v0 = vsel %vm12542_vm12, %v7618_v35, 0  ;;  %v7877_v35 = vld [vmem:[#allocation16 + $0x3] ss:$8 sm:$0x3] }
 0x97e   : > { %7593 = vmatprep.subr.bf16.mxu1 %v11164_v38  ;;  %v11225_v38 = vld [vmem:[#allocation12 + $0x3f0] ss:$8 sps:$4 sm:$0xff]  }
 0x981   : > { %7594 = vmatpush1.bf16.msra.mxu1 %v11162_v41  ;;  %v11230_v41 = vld [vmem:[#allocation13 + $0x204] ss:$8 sps:$4 sm:$0xff]  }
 0x982   : > { %7595 = vmatprep.subr.bf16.mxu1 %v11167_v4  ;;  %v7661_v4 = vrot.slane %v7620_v18, 2  ;;  %v7882_v18 = vrot.slane %v7877_v35, %v12412_v11 }
 0x985   : > { %7596 = vmatpush1.bf16.msra.mxu1 %v11165_v39  ;;  %v7662_v39 = vrot.slane %v7622_v0, 2  ;;  %v7886_v0 = vrot.slane %v7877_v35, %v12415_v13 }
 0x986   : > { %7597 = vmatprep.subr.bf16.mxu1 %v11170_v56  ;;  %v11228_v56 = vld [vmem:[#allocation13 + $0x200] ss:$8 sps:$4 sm:$0xff]  }
 0x989   : > { %7598 = vmatpush1.bf16.msra.mxu1 %v11168_v12  ;;  %v11233_v12 = vld [vmem:[#allocation13 + $0x214] ss:$8 sps:$4 sm:$0xff]  }
 0x98a   : > { %7599 = vmatprep.subr.bf16.mxu1 %v11173_v40  ;;  %v7663_v40 = vsel %vm6864_vm13, %v7661_v4, %v7662_v39 }
 0x98d   : > { %7600 = vmatpush1.bf16.msra.mxu1 %v11171_v44  ;;  %v11231_v44 = vld [vmem:[#allocation13 + $0x210] ss:$8 sps:$4 sm:$0xff]  }
 0x98e   : > { %7601 = vmatprep.subr.bf16.mxu1 %v11176_v31  ;;  %v11236_v31 = vld [vmem:[#allocation13 + $0x224] ss:$8 sps:$4 sm:$0xff]  }
 0x991   : > { %7602 = vmatpush1.bf16.msra.mxu1 %v11174_v43  ;;  %v11239_v43 = vld [vmem:[#allocation13 + $0x234] ss:$8 sps:$4 sm:$0xff]  }
 0x992   : > { %7603 = vmatprep.subr.bf16.mxu1 %v11179_v47  ;;  %v11240_v47 = vld [vmem:[#allocation13 + $0x240] ss:$8 sps:$4 sm:$0xff]  }
 0x995   : > { %7604 = vmatpush1.bf16.msra.mxu1 %v11177_v52  ;;  %v11251_v52 = vld [vmem:[#allocation13 + $0x274] ss:$8 sps:$4 sm:$0xff]  }
 0x996   : > { %7829 = vmatprep.subr.bf16.mxu1 %v11182_v57  ;;  %v11252_v57 = vld [vmem:[#allocation13 + $0x280] ss:$8 sps:$4 sm:$0xff]  }
 0x998   : > { %7606 = vmatmul.mubr.bf16.vlgmr.msra.gmra.mrb[8].mxu1 %v7407_v62  ;;  %v11266_v62 = vld [vmem:[#allocation13 + $0x2c4] ss:$8 sps:$4 sm:$0xff]  }
 0x999   : > { %7830 = vmatpush1.bf16.msra.mxu1 %v11180_v50  ;;  %7861 = vmatprep.mubr.bf16.mxu1 %v7666_v34  ;;  %v11263_v50 = vld [vmem:[#allocation13 + $0x2b4] ss:$8 sps:$4 sm:$0xff]   ;;  %v11264_v34 = vld [vmem:[#allocation13 + $0x2c0] ss:$8 sps:$4 sm:$0xff]  }
 0x99a   : > { %7831 = vmatprep.subr.bf16.mxu1 %v11185_v8  ;;  %v11261_v8 = vld [vmem:[#allocation13 + $0x2b0] ss:$8 sps:$4 sm:$0xff]  }
 0x99d   : > { %7832 = vmatpush1.bf16.msra.mxu1 %v11183_v19  ;;  %v11269_v19 = vld [vmem:[#allocation13 + $0x2d4] ss:$8 sps:$4 sm:$0xff]  }
 0x99e   : > { %7833 = vmatprep.subr.bf16.mxu1 %v11188_v20  ;;  %v11267_v20 = vld [vmem:[#allocation13 + $0x2d0] ss:$8 sps:$4 sm:$0xff]  }
 0x9a1   : > { %7834 = vmatpush1.bf16.msra.mxu1 %v11186_v3  ;;  %v11272_v3 = vld [vmem:[#allocation13 + $0x2e4] ss:$8 sps:$4 sm:$0xff]  }
 0x9a2   : > { %7835 = vmatprep.subr.bf16.mxu1 %v11191_v21  ;;  %v11270_v21 = vld [vmem:[#allocation13 + $0x2e0] ss:$8 sps:$4 sm:$0xff]  }
 0x9a5   : > { %7836 = vmatpush1.bf16.msra.mxu1 %v11189_v14  ;;  %v11273_v14 = vld [vmem:[#allocation13 + $0x2f0] ss:$8 sps:$4 sm:$0xff]  }
 0x9a6   : > { %7837 = vmatprep.subr.bf16.mxu1 %v11194_v42  ;;  %v11275_v42 = vld [vmem:[#allocation13 + $0x2f4] ss:$8 sps:$4 sm:$0xff]  }
 0x9a9   : > { %7838 = vmatpush1.bf16.msra.mxu1 %v11192_v6  ;;  %v11276_v6 = vld [vmem:[#allocation15 + $0x200] ss:$8 sps:$4 sm:$0xff]  }
 0x9aa   : > { %7839 = vmatprep.subr.bf16.mxu1 %v11197_v63  ;;  %v11278_v63 = vld [vmem:[#allocation15 + $0x204] ss:$8 sps:$4 sm:$0xff]  }
 0x9ab   : > { %8393 = vmatprep.subr.bf16.mxu0 %v11278_v63 }
 0x9ac   : > { %8394 = vmatpush1.bf16.msra.mxu0 %v11276_v6 }
 0x9ad   : > { %7840 = vmatpush1.bf16.msra.mxu1 %v11195_v15  ;;  %v11281_v15 = vld [vmem:[#allocation15 + $0x214] ss:$8 sps:$4 sm:$0xff]  }
 0x9ae   : > { %7841 = vmatprep.subr.bf16.mxu1 %v11200_v23  ;;  %v11279_v23 = vld [vmem:[#allocation15 + $0x210] ss:$8 sps:$4 sm:$0xff]   ;;  %8395 = vmatprep.subr.bf16.mxu0 %v11281_v15 }
 0x9b0   : > { %8396 = vmatpush1.bf16.msra.mxu0 %v11279_v23 }
 0x9b1   : > { %7842 = vmatpush1.bf16.msra.mxu1 %v11198_v24  ;;  %v11284_v24 = vld [vmem:[#allocation15 + $0x224] ss:$8 sps:$4 sm:$0xff]  }
 0x9b2   : > { %7843 = vmatprep.subr.bf16.mxu1 %v11203_v16  ;;  %v11282_v16 = vld [vmem:[#allocation15 + $0x220] ss:$8 sps:$4 sm:$0xff]   ;;  %8397 = vmatprep.subr.bf16.mxu0 %v11284_v24 }
 0x9b4   : > { %8398 = vmatpush1.bf16.msra.mxu0 %v11282_v16 }
 0x9b5   : > { %7844 = vmatpush1.bf16.msra.mxu1 %v11201_v25  ;;  %v11287_v25 = vld [vmem:[#allocation15 + $0x234] ss:$8 sps:$4 sm:$0xff]  }
 0x9b6   : > { %7845 = vmatprep.subr.bf16.mxu1 %v11206_v60  ;;  %v11285_v60 = vld [vmem:[#allocation15 + $0x230] ss:$8 sps:$4 sm:$0xff]   ;;  %8399 = vmatprep.subr.bf16.mxu0 %v11287_v25 }
 0x9b8   : > { %8400 = vmatpush1.bf16.msra.mxu0 %v11285_v60 }
 0x9b9   : > { %7846 = vmatpush1.bf16.msra.mxu1 %v11204_v2  ;;  %v11290_v2 = vld [vmem:[#allocation15 + $0x244] ss:$8 sps:$4 sm:$0xff]  }
 0x9ba   : > { %7847 = vmatprep.subr.bf16.mxu1 %v11209_v22  ;;  %v11288_v22 = vld [vmem:[#allocation15 + $0x240] ss:$8 sps:$4 sm:$0xff]   ;;  %8401 = vmatprep.subr.bf16.mxu0 %v11290_v2 }
 0x9bc   : > { %8402 = vmatpush1.bf16.msra.mxu0 %v11288_v22 }
 0x9bd   : > { %7848 = vmatpush1.bf16.msra.mxu1 %v11207_v9  ;;  %v11293_v9 = vld [vmem:[#allocation15 + $0x254] ss:$8 sps:$4 sm:$0xff]  }
 0x9be   : > { %7849 = vmatprep.subr.bf16.mxu1 %v11212_v26  ;;  %v11291_v26 = vld [vmem:[#allocation15 + $0x250] ss:$8 sps:$4 sm:$0xff]   ;;  %8403 = vmatprep.subr.bf16.mxu0 %v11293_v9 }
 0x9c0   : > { %8404 = vmatpush1.bf16.msra.mxu0 %v11291_v26 }
 0x9c1   : > { %7850 = vmatpush1.bf16.msra.mxu1 %v11210_v36  ;;  %v11296_v36 = vld [vmem:[#allocation15 + $0x264] ss:$8 sps:$4 sm:$0xff]  }
 0x9c2   : > { %7851 = vmatprep.subr.bf16.mxu1 %v11215_v29  ;;  %v11294_v29 = vld [vmem:[#allocation15 + $0x260] ss:$8 sps:$4 sm:$0xff]   ;;  %8405 = vmatprep.subr.bf16.mxu0 %v11296_v36 }
 0x9c4   : > { %8406 = vmatpush1.bf16.msra.mxu0 %v11294_v29 }
 0x9c5   : > { %7852 = vmatpush1.bf16.msra.mxu1 %v11213_v27  ;;  %v11299_v27 = vld [vmem:[#allocation15 + $0x274] ss:$8 sps:$4 sm:$0xff]  }
 0x9c6   : > { %7853 = vmatprep.subr.bf16.mxu1 %v11218_v28  ;;  %v11297_v28 = vld [vmem:[#allocation15 + $0x270] ss:$8 sps:$4 sm:$0xff]   ;;  %8407 = vmatprep.subr.bf16.mxu0 %v11299_v27 }
 0x9c8   : > { %8408 = vmatpush1.bf16.msra.mxu0 %v11297_v28 }
 0x9c9   : > { %7854 = vmatpush1.bf16.msra.mxu1 %v11216_v30  ;;  %v11302_v30 = vld [vmem:[#allocation15 + $0x284] ss:$8 sps:$4 sm:$0xff]  }
 0x9ca   : > { %7855 = vmatprep.subr.bf16.mxu1 %v11221_v5  ;;  %v11300_v5 = vld [vmem:[#allocation15 + $0x280] ss:$8 sps:$4 sm:$0xff]   ;;  %8409 = vmatprep.subr.bf16.mxu0 %v11302_v30 }
 0x9cc   : > { %8410 = vmatpush1.bf16.msra.mxu0 %v11300_v5 }
 0x9cd   : > { %7856 = vmatpush1.bf16.msra.mxu1 %v11219_v32  ;;  %v11305_v32 = vld [vmem:[#allocation15 + $0x294] ss:$8 sps:$4 sm:$0xff]  }
 0x9ce   : > { %7857 = vmatprep.subr.bf16.mxu1 %v11224_v17  ;;  %v11303_v17 = vld [vmem:[#allocation15 + $0x290] ss:$8 sps:$4 sm:$0xff]   ;;  %8411 = vmatprep.subr.bf16.mxu0 %v11305_v32 }
 0x9d0   : > { %8412 = vmatpush1.bf16.msra.mxu0 %v11303_v17  ;;  %v8437_v17 = vld [vmem:[#allocation16 + $0x5] ss:$8 sm:$0x3] }
 0x9d1   : > { %7858 = vmatpush1.bf16.msra.mxu1 %v11222_v33  ;;  %v11308_v33 = vld [vmem:[#allocation15 + $0x2a4] ss:$8 sps:$4 sm:$0xff]   ;;  %v8446_v35 = vrot.slane %v8437_v17, %v12415_v13 }
 0x9d2   : > { %7859 = vmatprep.subr.bf16.mxu1 %v11227_v37  ;;  %8413 = vmatprep.subr.bf16.mxu0 %v11308_v33  ;;  %v7894_v37 = vld [vmem:[#allocation18 + $0x3] ss:$8 sm:$0x3]  ;;  %v8454_v33 = vld [vmem:[#allocation18 + $0x5] ss:$8 sm:$0x3] }
 0x9d3   : > { %v7903_v4 = vrot.slane %v7894_v37, %v12415_v13 }
 0x9d4   : > { %8414 = vmatpush1.bf16.msra.mxu0 %v11306_v1  ;;  %v8442_v1 = vrot.slane %v8437_v17, %v12412_v11 }
 0x9d5   : > { %7860 = vmatpush1.bf16.msra.mxu1 %v11225_v38  ;;  %v7899_v38 = vrot.slane %v7894_v37, %v12412_v11  ;;  %v8459_v37 = vrot.slane %v8454_v33, %v12412_v11 }
 0x9d6   : > { %8113 = vmatprep.subr.bf16.mxu1 %v11230_v41 }
 0x9d8   : > { %7862 = vmatmul.mubr.bf16.vlgmr.msra.gmra.mrb[8].mxu1 %v7663_v40 }
 0x9d9   : > { %8114 = vmatpush1.bf16.msra.mxu1 %v11228_v56 }
 0x9da   : > { %8115 = vmatprep.subr.bf16.mxu1 %v11233_v12 }
 0x9dd   : > { %8116 = vmatpush1.bf16.msra.mxu1 %v11231_v44 }
 0x9de   : > { %8117 = vmatprep.subr.bf16.mxu1 %v11236_v31 }
 0x9e1   : > { %8118 = vmatpush1.bf16.msra.mxu1 %v11234_v46 }
 0x9e2   : > { %8119 = vmatprep.subr.bf16.mxu1 %v11239_v43 }
 0x9e5   : > { %8120 = vmatpush1.bf16.msra.mxu1 %v11237_v45 }
 0x9e6   : > { %8121 = vmatprep.subr.bf16.mxu1 %v11242_v48 }
 0x9e9   : > { %8122 = vmatpush1.bf16.msra.mxu1 %v11240_v47 }
 0x9ea   : > { %8123 = vmatprep.subr.bf16.mxu1 %v11245_v51 }
 0x9ed   : > { %8124 = vmatpush1.bf16.msra.mxu1 %v11243_v49 }
 0x9ee   : > { %8125 = vmatprep.subr.bf16.mxu1 %v11248_v54 }
 0x9f1   : > { %8126 = vmatpush1.bf16.msra.mxu1 %v11246_v59 }
 0x9f2   : > { %8127 = vmatprep.subr.bf16.mxu1 %v11251_v52 }
 0x9f5   : > { %8128 = vmatpush1.bf16.msra.mxu1 %v11249_v53 }
 0x9f6   : > { %8129 = vmatprep.subr.bf16.mxu1 %v11254_v58  ;;  %v11336_v58 = vld [vmem:[#allocation3] sm:$0xff] }
 0x9f9   : > { %8130 = vmatpush1.bf16.msra.mxu1 %v11252_v57  ;;  %v11311_v57 = vld [vmem:[#allocation15 + $0x2b4] ss:$8 sps:$4 sm:$0xff]  }
 0x9fa   : > { %8131 = vmatprep.subr.bf16.mxu1 %v11257_v61  ;;  %v11309_v61 = vld [vmem:[#allocation15 + $0x2b0] ss:$8 sps:$4 sm:$0xff]   ;;  %8415 = vmatprep.subr.bf16.mxu0 %v11311_v57 }
 0x9fb   : > { %8416 = vmatpush1.bf16.msra.mxu0 %v11309_v61 }
 0x9fd   : > { %8132 = vmatpush1.bf16.msra.mxu1 %v11255_v7  ;;  %v11314_v7 = vld [vmem:[#allocation15 + $0x2c4] ss:$8 sps:$4 sm:$0xff]  }
 0x9fe   : > { %8133 = vmatprep.subr.bf16.mxu1 %v11260_v55  ;;  %v11312_v55 = vld [vmem:[#allocation15 + $0x2c0] ss:$8 sps:$4 sm:$0xff]   ;;  %8417 = vmatprep.subr.bf16.mxu0 %v11314_v7 }
 0x9ff   : > { %8418 = vmatpush1.bf16.msra.mxu0 %v11312_v55 }
 0xa01   : > { %8134 = vmatpush1.bf16.msra.mxu1 %v11258_v10  ;;  %v11317_v10 = vld [vmem:[#allocation15 + $0x2d4] ss:$8 sps:$4 sm:$0xff]  }
 0xa02   : > { %8135 = vmatprep.subr.bf16.mxu1 %v11263_v50  ;;  %v11315_v50 = vld [vmem:[#allocation15 + $0x2d0] ss:$8 sps:$4 sm:$0xff]   ;;  %8419 = vmatprep.subr.bf16.mxu0 %v11317_v10 }
 0xa03   : > { %8420 = vmatpush1.bf16.msra.mxu0 %v11315_v50 }
 0xa05   : > { %8136 = vmatpush1.bf16.msra.mxu1 %v11261_v8  ;;  %v11320_v8 = vld [vmem:[#allocation15 + $0x2e4] ss:$8 sps:$4 sm:$0xff]  }
 0xa06   : > { %8137 = vmatprep.subr.bf16.mxu1 %v11266_v62  ;;  %v11318_v62 = vld [vmem:[#allocation15 + $0x2e0] ss:$8 sps:$4 sm:$0xff]   ;;  %8421 = vmatprep.subr.bf16.mxu0 %v11320_v8 }
 0xa07   : > { %8422 = vmatpush1.bf16.msra.mxu0 %v11318_v62 }
 0xa09   : > { %8138 = vmatpush1.bf16.msra.mxu1 %v11264_v34  ;;  %v11323_v34 = vld [vmem:[#allocation15 + $0x2f4] ss:$8 sps:$4 sm:$0xff]  }
 0xa0a   : > { %8139 = vmatprep.subr.bf16.mxu1 %v11269_v19  ;;  %v11321_v19 = vld [vmem:[#allocation15 + $0x2f0] ss:$8 sps:$4 sm:$0xff]   ;;  %8423 = vmatprep.subr.bf16.mxu0 %v11323_v34 }
 0xa0b   : > { %8424 = vmatpush1.bf16.msra.mxu0 %v11321_v19 }
 0xa0d   : > { %8140 = vmatpush1.bf16.msra.mxu1 %v11267_v20  ;;  %v8157_v20 = vld [vmem:[#allocation16 + $0x4] ss:$8 sm:$0x3] }
 0xa0e   : > { %8141 = vmatprep.subr.bf16.mxu1 %v11272_v3  ;;  %v8174_v3 = vld [vmem:[#allocation18 + $0x4] ss:$8 sm:$0x3] }
 0xa0f   : > { %v8183_v63 = vrot.slane %v8174_v3, %v12415_v13 }
 0xa11   : > { %8142 = vmatpush1.bf16.msra.mxu1 %v11270_v21  ;;  %v8162_v21 = vrot.slane %v8157_v20, %v12412_v11 }
 0xa12   : > { %8143 = vmatprep.subr.bf16.mxu1 %v11275_v42  ;;  %v8179_v42 = vrot.slane %v8174_v3, %v12412_v11 }
 0xa15   : > { %8144 = vmatpush1.bf16.msra.mxu1 %v11273_v14  ;;  %v8166_v14 = vrot.slane %v8157_v20, %v12415_v13 }
 0xaab   : > { %v7863_v41 = vpop.f32.mrb[8].mxu1 }
 0xaac   : > { %v7889_v39 = vmul.f32 %v7882_v18, %v7863_v41  ;;  %v7865_v56 = vpop.f32.mrb[9].mxu1 }
 0xaad   : > { %v7890_v12 = vmul.f32 %v7886_v0, %v7865_v56  ;;  %v7867_v40 = vpop.f32.mrb[10].mxu1 }
 0xaae   : > { %v7906_v44 = vadd.f32 %v7899_v38, %v7889_v39  ;;  %v7891_v31 = vmul.f32 %v7882_v18, %v7867_v40  ;;  %v7869_v46 = vpop.f32.mrb[11].mxu1 }
 0xaaf   : > { %v7907_v43 = vadd.f32 %v7903_v4, %v7890_v12  ;;  %v7892_v45 = vmul.f32 %v7886_v0, %v7869_v46  ;;  %v8463_v0 = vrot.slane %v8454_v33, %v12415_v13  ;;  %v11324_v13 = vld [vmem:[#allocation19] sm:$0xff]  }
 0xab0   : > { %v7908_v48 = vadd.f32 %v7899_v38, %v7891_v31  ;;  %v7910_v51 = vmax.f32 %v7906_v44, 0.0 }
 0xab1   : > { %v7909_v47 = vadd.f32 %v7903_v4, %v7892_v45  ;;  %v7911_v54 = vmax.f32 %v7907_v43, 0.0 }
 0xab2   : > { %v7912_v49 = vmax.f32 %v7908_v48, 0.0 }
 0xab3   : > { %v7913_v59 = vmax.f32 %v7909_v47, 0.0 }
 0xab4   : > { %v7914_v52 = vpack.c.bf16 %v7912_v49, %v7910_v51 }
 0xab5   : > { %v7915_v53 = vpack.c.bf16 %v7913_v59, %v7911_v54 }
 0xab7   : > { %8145 = vmatprep.mubr.bf16.mxu1 %v7915_v53 }
 0xab8   : > { %8146 = vmatmul.mubr.bf16.vlgmr.msra.gmra.mrb[12].mxu1 %v7914_v52 }
 0xab9   : > { %8519 = vmatprep.mubr.bf16.mxu1 %v11336_v58 }
 0xb8b   : > { %v8147_v6 = vpop.f32.mrb[12].mxu1 }
 0xb8c   : > { %v8169_v15 = vmul.f32 %v8162_v21, %v8147_v6  ;;  %v8149_v23 = vpop.f32.mrb[13].mxu1 }
 0xb8d   : > { %v8170_v24 = vmul.f32 %v8166_v14, %v8149_v23  ;;  %v8151_v16 = vpop.f32.mrb[14].mxu1 }
 0xb8e   : > { %v8186_v25 = vadd.f32 %v8179_v42, %v8169_v15  ;;  %v8171_v60 = vmul.f32 %v8162_v21, %v8151_v16  ;;  %v8153_v2 = vpop.f32.mrb[15].mxu1 }
 0xb8f   : > { %v8187_v22 = vadd.f32 %v8183_v63, %v8170_v24  ;;  %v8172_v9 = vmul.f32 %v8166_v14, %v8153_v2 }
 0xb90   : > { %v8188_v26 = vadd.f32 %v8179_v42, %v8171_v60  ;;  %v8190_v29 = vmax.f32 %v8186_v25, 0.0 }
 0xb91   : > { %v8189_v36 = vadd.f32 %v8183_v63, %v8172_v9  ;;  %v8191_v28 = vmax.f32 %v8187_v22, 0.0 }
 0xb92   : > { %v8192_v27 = vmax.f32 %v8188_v26, 0.0 }
 0xb93   : > { %v8193_v30 = vmax.f32 %v8189_v36, 0.0 }
 0xb94   : > { %v8194_v5 = vpack.c.bf16 %v8192_v27, %v8190_v29 }
 0xb95   : > { %v8195_v32 = vpack.c.bf16 %v8193_v30, %v8191_v28 }
 0xb96   : > { %8196 = vst [vmem:[#allocation3 + $0x20] sm:$0xff] %v8194_v5 }
 0xb97   : > { %8197 = vst [vmem:[#allocation3 + $0x28] sm:$0xff] %v8195_v32  ;;  %8425 = vmatprep.mubr.bf16.mxu0 %v8195_v32 }
 0xb98   : > { %8426 = vmatmul.mubr.bf16.vlgmr.msra.gmra.mrb[4].mxu0 %v8194_v5 }
 0xc6b   : > { %v8427_v18 = vpop.f32.mrb[4].mxu0 }
 0xc6c   : > { %v8449_v38 = vmul.f32 %v8442_v1, %v8427_v18  ;;  %v8429_v41 = vpop.f32.mrb[5].mxu0 }
 0xc6d   : > { %v8450_v4 = vmul.f32 %v8446_v35, %v8429_v41  ;;  %v8431_v39 = vpop.f32.mrb[6].mxu0 }
 0xc6e   : > { %v8466_v56 = vadd.f32 %v8459_v37, %v8449_v38  ;;  %v8451_v12 = vmul.f32 %v8442_v1, %v8431_v39  ;;  %v8433_v40 = vpop.f32.mrb[7].mxu0 }
 0xc6f   : > { %v8467_v44 = vadd.f32 %v8463_v0, %v8450_v4  ;;  %v8452_v31 = vmul.f32 %v8446_v35, %v8433_v40 }
 0xc70   : > { %v8468_v46 = vadd.f32 %v8459_v37, %v8451_v12  ;;  %v8470_v45 = vmax.f32 %v8466_v56, 0.0 }
 0xc71   : > { %v8469_v43 = vadd.f32 %v8463_v0, %v8452_v31  ;;  %v8471_v47 = vmax.f32 %v8467_v44, 0.0 }
 0xc72   : > { %v8472_v48 = vmax.f32 %v8468_v46, 0.0 }
 0xc73   : > { %v8473_v11 = vmax.f32 %v8469_v43, 0.0 }
 0xc74   : > { %v8476_v51 = vpack.c.bf16 %v8472_v48, %v8470_v45 }
 0xc75   : > { %v8477_v49 = vpack.c.bf16 %v8473_v11, %v8471_v47 }
 0xc77   : > { %8487 = vmatprep.subr.bf16.mxu1 %v8477_v49 }
 0xc78   : > { %8488 = vmatpush1.bf16.msra.mxu1 %v8476_v51 }
 0xc7b   : > { %9677 = vmatmul.mubr.msk.bf16.vlgmr.msra.gmra.mrb[16].mxu1 %vm8483_vm3, %v11324_v13 }
 0xd4e   : > { %v8521_v54 = vpop.f32.mrb[16].mxu1 }
 0xd4f   : > { %8530 = vst [vmem:[%s505_s23] sm:$0xff] %v8521_v54  ;;  %v8523_v59 = vpop.f32.mrb[17].mxu1 }
 0xd50   : > { %8531 = vst [vmem:[%s505_s23 + $0x8] sm:$0xff] %v8523_v59  ;;  %v8525_v52 = vpop.f32.mrb[18].mxu1 }
 0xd51   : > { %8532 = vst [vmem:[%s505_s23 + $0x10] sm:$0xff] %v8525_v52  ;;  %v8527_v53 = vpop.f32.mrb[19].mxu1 }
 0xd52   : > { %8533 = vst [vmem:[%s505_s23 + $0x18] sm:$0xff] %v8527_v53 }
 0xd53   : > { %11632 = shalt.err (!%p11629_p0)
}
 0xd54   : > { %s11633_s29 = scalar_lea.hbm %s12605_s28, 512  ;;  %s11637_s20 = scalar_lea.hbm %s12705_s17, 1024 }
 0xd55   : > { %p11634_p5 = scmp.ne.s32.totalorder %s12605_s28, %s11633_s29  ;;  %p11638_p4 = scmp.lt.u32.totalorder %s12605_s28, %s12705_s17 }
 0xd56   : > { %p11639_p12 = scmp.lt.u32.totalorder %s11637_s20, %s11633_s29  ;;  %p11641_p1 = scmp.lt.u32.totalorder %s11633_s29, %s12605_s28 }
 0xd57   : > { %p11635_p9 = pnand %p11634_p5, %p12706_p3 }
 0xd58   : > { %p11640_p13 = por %p11639_p12, %p11638_p4 }
 0xd59   : > { %p11636_p7 = pneg %p11635_p9 }
 0xd5a   : > { %p11642_p2 = por %p11641_p1, %p11640_p13 }
 0xd5c   : > { %p11643_p8 = pnand %p11642_p2, %p11636_p7 }
 0xd5e   : > { %11646 = shalt.err (!%p11643_p8)
}
 0xd5f   : > { %s11725_s19 = smov 256   ;;  %s11726_s1 = smov 16  }
 0xd60   : > { %9818 = dma.vmem_to_hbm [thread:$0]  (%p12706_p3), %s12600_s10, 512, %s12605_s28, %s8535_s21, %s11725_s19, %s11725_s19, %s11726_s1  }
 0xd61 PF: > { %s8564_s11 = sand.u32 1, %s11693_s13   ;;  %p12707_p6 = scmp.ne.s32.totalorder %s12675_s12, 0 }
 0xd62   : > { %p12708_p10 = scmp.ge.s32.totalorder %s11705_s16, 2  ;;  %s8565_s29 = scalar_lea.sflag [#allocation6], %s8564_s11 }
 0xd64   : > { %p9853_p11 = pnand %p12708_p10, %p12707_p6 }
 0xd66   : > { %11688 = dma.done.wait (!%p9853_p11), %s8565_s29, 512  }
 0xd67   : > { %11690 = vsyncadd (!%p9853_p11), %s8565_s29, 4294966784  ;;  %p28_p0 = scmp.ge.s32.totalorder %s12030_s26, 4   ;;  %s12709_s13 = smov %s11697_s14 }
 0xd68   : > { %s12710_s14 = smov %s11701_s15  ;;  %s12711_s15 = smov %s12042_s25 }
 0xd69   : > { %s12712_s16 = smov %s12030_s26  ;;  %30 = sbr.rel (!%p28_p0) target bundleno = 13 (0xd), region = 170 }
 0xd70   :  { %8570 = vsyncpa [#allocation5], 1 }
 0xd71   :  { %8572 = vsyncpa [#allocation5 + $0x1], 1 }
 0xd72   :  { %8573 = vsyncpa [#allocation8], 1 }
 0xd73   :  { %8574 = vsyncpa [#allocation11], 1 }
 0xd74   :  { %8575 = vsyncpa [#allocation14], 1 }
 0xd75   :  { %8576 = vsyncpa [#allocation17], 1 }
 0xd76   :  { %8577 = vsyncpa [#allocation20], 1 }
 0xd77   :  { %8578 = vsyncpa [#allocation6], 1 }
 0xd78   :  { %8580 = vsyncpa [#allocation6 + $0x1], 1 }

</bundles_post_ra>
